<compile_context>
chip_gen: v6e
topology: v6e:2x2x1
jax: 0.10.0
libtpu: 0.0.40
codegen_flags: <defaults>
</compile_context>

<pallas_src>
import numpy as np
import jax
import jax.numpy as jnp
from jax.experimental import pallas as pl
from jax.experimental.pallas import tpu as pltpu


def _layer_norm(x, g, b, eps=1e-5):
    mu = jnp.mean(x, axis=-1, keepdims=True)
    var = jnp.mean((x - mu) ** 2, axis=-1, keepdims=True)
    return (x - mu) * jax.lax.rsqrt(var + eps) * g + b


# ---------------------------------------------------------------------------
# Pallas kernel
# ---------------------------------------------------------------------------
def make_decoder_layer_kernel(Bt, Lq, Lk, d_model, d_inner, n_head, d_k, d_v):
    H = n_head
    bf16 = jnp.bfloat16
    f32 = jnp.float32
    Mq = Bt * Lq
    Mk = Bt * Lk

    def to_heads(x, L, d):
        # (Bt*L, H*d) -> (Bt*H, L, d): one reshape + one transpose
        # (no per-head lane slices, no concatenates).
        return x.reshape(Bt, L, H, d).transpose(0, 2, 1, 3).reshape(Bt * H, L, d)

    def from_heads(x, L, d):
        # (Bt*H, L, d) -> (Bt*L, H*d), head-major feature order (matches torch fc input)
        return x.reshape(Bt, H, L, d).transpose(0, 2, 1, 3).reshape(Bt * L, H * d)

    def attention(q2d, k2d, v2d, Lkv, bias, fcw, fcb, g, be, residual, attn_ref):
        # q2d: (Bt*Lq, H*d_k) f32 (already scaled by 1/sqrt(d_k), folded into the weights)
        # k2d: (Bt*Lkv, H*d_k), v2d: (Bt*Lkv, H*d_v); bias: (Bt, Lq, Lkv) additive mask.
        q3 = to_heads(q2d, Lq, d_k).astype(bf16)     # (Bt*H, Lq, d_k)
        k3 = to_heads(k2d, Lkv, d_k).astype(bf16)    # (Bt*H, Lkv, d_k)
        v3 = to_heads(v2d, Lkv, d_v).astype(bf16)    # (Bt*H, Lkv, d_v)

        # scores: single dot_general batched over Bt*H  ('nqd,nkd->nqk')
        scores = jax.lax.dot_general(
            q3, k3, (((2,), (2,)), ((0,), (0,))),
            preferred_element_type=f32)              # (Bt*H, Lq, Lkv)

        s4 = scores.reshape(Bt, H, Lq, Lkv) + bias[:, None, :, :]
        m = jnp.max(s4, axis=-1, keepdims=True)
        e = jnp.exp(s4 - m)
        attn = e / jnp.sum(e, axis=-1, keepdims=True)   # (Bt, H, Lq, Lkv) f32
        attn_ref[...] = attn                            # one contiguous per-step store

        # context: single dot_general batched over Bt*H  ('nqk,nkd->nqd')
        ctx = jax.lax.dot_general(
            attn.reshape(Bt * H, Lq, Lkv).astype(bf16), v3,
            (((2,), (1,)), ((0,), (0,))),
            preferred_element_type=f32)              # (Bt*H, Lq, d_v)

        # fused output projection: (Bt*Lq, H*d_v) @ (H*d_v, d_model)
        ctx2 = from_heads(ctx, Lq, d_v).astype(bf16)
        out = jnp.dot(ctx2, fcw, preferred_element_type=f32) + fcb
        return _layer_norm(out + residual, g, be)

    def kernel(dec_ref, enc_ref, npm_ref, sbias_ref, ebias_ref,
               s_wqkv, s_bqkv, s_fcw, s_fcb, s_g, s_b,
               e_wq, e_bq, e_wkv, e_bkv, e_fcw, e_fcb, e_g, e_b,
               f_w1, f_b1, f_w2, f_b2, f_g, f_be,
               out_ref, slf_attn_ref, enc_attn_ref):
        # Flatten batch into the matmul M dimension.
        dec = dec_ref[...].reshape(Mq, d_model)          # bf16
        enc = enc_ref[...].reshape(Mk, d_model)          # bf16
        npm = npm_ref[...].reshape(Mq, 1)                # f32
        sbias = sbias_ref[...]                           # (Bt, Lq, Lq) f32
        ebias = ebias_ref[...]                           # (Bt, Lq, Lk) f32
        residual0 = dec.astype(jnp.float32)

        # ---------------- self attention (fused QKV projection) ----------------
        qkv = jnp.dot(dec, s_wqkv[...], preferred_element_type=jnp.float32) + s_bqkv[...]
        o1, o2 = H * d_k, 2 * H * d_k
        x = attention(qkv[:, :o1], qkv[:, o1:o2], qkv[:, o2:], Lq,
                      sbias, s_fcw[...], s_fcb[...], s_g[...], s_b[...],
                      residual0, slf_attn_ref)
        x = x * npm

        # ------------- encoder-decoder attention (fused KV projection) ---------
        q = jnp.dot(x.astype(bf16), e_wq[...],
                    preferred_element_type=jnp.float32) + e_bq[...]
        kv = jnp.dot(enc, e_wkv[...],
                     preferred_element_type=jnp.float32) + e_bkv[...]
        x = attention(q, kv[:, :H * d_k], kv[:, H * d_k:], Lk,
                      ebias, e_fcw[...], e_fcb[...], e_g[...], e_b[...],
                      x, enc_attn_ref)
        x = x * npm

        # ------------- position-wise FFN (Conv1d k=1 == pointwise linear) ------
        h1 = jnp.maximum(
            jnp.dot(x.astype(bf16), f_w1[...],
                    preferred_element_type=jnp.float32) + f_b1[...], 0.0)
        h2 = jnp.dot(h1.astype(bf16), f_w2[...],
                     preferred_element_type=jnp.float32) + f_b2[...]
        y = _layer_norm(h2 + x, f_g[...], f_be[...])
        out_ref[...] = y * npm

    return kernel


# ---------------------------------------------------------------------------
# Wrapper
# ---------------------------------------------------------------------------
def decoder_layer_forward(dec_input, enc_output, non_pad_mask,
                          slf_attn_mask, dec_enc_attn_mask, params,
                          *, n_head, d_k, d_v, d_inner, batch_tile=None):
    B, Lq, d_model = dec_input.shape
    Lk = enc_output.shape[1]
    H = n_head
    bf16, f32 = jnp.bfloat16, jnp.float32

    # Default: one grid step covering the whole batch (best on v5e/v6e single-core).
    # On v7x set batch_tile = B // 2 so the "parallel" axis feeds both TensorCores.
    Bt = B if batch_tile is None else batch_tile
    assert B % Bt == 0
    nb = B // Bt

    (s_wq, s_bq, s_wk, s_bk, s_wv, s_bv, s_fcw, s_fcb, s_g, s_b) = params[0:10]
    (e_wq, e_bq, e_wk, e_bk, e_wv, e_bv, e_fcw, e_fcb, e_g, e_b) = params[10:20]
    (f_w1, f_b1, f_w2, f_b2, f_g, f_be) = params[20:26]

    inv_temp = 1.0 / float(np.sqrt(d_k))
    # Fuse projections host-side; fold 1/sqrt(d_k) into the Q weight/bias.
    s_wqkv = jnp.concatenate([s_wq * inv_temp, s_wk, s_wv], axis=1).astype(bf16)
    s_bqkv = jnp.concatenate([s_bq * inv_temp, s_bk, s_bv], axis=1).astype(f32)
    e_wq_s = (e_wq * inv_temp).astype(bf16)
    e_bq_s = (e_bq * inv_temp).astype(f32)
    e_wkv = jnp.concatenate([e_wk, e_wv], axis=1).astype(bf16)
    e_bkv = jnp.concatenate([e_bk, e_bv], axis=1).astype(f32)

    weights = [
        s_wqkv, s_bqkv, s_fcw.astype(bf16), s_fcb.astype(f32),
        s_g.astype(f32), s_b.astype(f32),
        e_wq_s, e_bq_s, e_wkv, e_bkv, e_fcw.astype(bf16), e_fcb.astype(f32),
        e_g.astype(f32), e_b.astype(f32),
        f_w1.astype(bf16), f_b1.astype(f32), f_w2.astype(bf16), f_b2.astype(f32),
        f_g.astype(f32), f_be.astype(f32),
    ]

    # Additive attention-mask bias: 0 = keep, -1e30 = masked (finite, NaN-safe; exp -> 0).
    sbias = jnp.where(slf_attn_mask, -1e30, 0.0).astype(f32)       # (B, Lq, Lq)
    ebias = jnp.where(dec_enc_attn_mask, -1e30, 0.0).astype(f32)   # (B, Lq, Lk)

    data = [dec_input.astype(bf16), enc_output.astype(bf16),
            non_pad_mask.astype(f32), sbias, ebias]

    def batch_spec(shape):          # per-batch-tile block; pipelined over the grid
        rest = tuple(shape[1:])
        return pl.BlockSpec((Bt,) + rest, lambda b, n=len(rest): (b,) + (0,) * n)

    def const_spec(shape):          # whole array, constant index -> VMEM-resident
        return pl.BlockSpec(tuple(shape), lambda b, n=len(shape): (0,) * n)

    in_specs = ([batch_spec(a.shape) for a in data]
                + [const_spec(w.shape) for w in weights])

    out_shapes = (
        jax.ShapeDtypeStruct((B * Lq, d_model), f32),   # flat decoder output slab
        jax.ShapeDtypeStruct((B, H, Lq, Lq), f32),      # self-attn maps (batch-major)
        jax.ShapeDtypeStruct((B, H, Lq, Lk), f32),      # enc-dec attn maps
    )
    out_specs = (
        pl.BlockSpec((Bt * Lq, d_model), lambda b: (b, 0)),
        pl.BlockSpec((Bt, H, Lq, Lq), lambda b: (b, 0, 0, 0)),
        pl.BlockSpec((Bt, H, Lq, Lk), lambda b: (b, 0, 0, 0)),
    )

    kernel = make_decoder_layer_kernel(Bt, Lq, Lk, d_model, d_inner, n_head, d_k, d_v)
    out, slf_attn, enc_attn = pl.pallas_call(
        kernel,
        out_shape=out_shapes,
        grid=(nb,),
        in_specs=in_specs,
        out_specs=out_specs,
        compiler_params=pltpu.CompilerParams(
            dimension_semantics=("parallel",),          # batch tiles -> megacore on v7x
            vmem_limit_bytes=48 * 1024 * 1024),         # safe on v5e/v6e (128M) and v7x (64M)
    )(*data, *weights)

    # Restore torch layouts in the wrapper (cheap XLA reshapes/transposes).
    out = out.reshape(B, Lq, d_model)
    slf_attn = jnp.transpose(slf_attn, (1, 0, 2, 3)).reshape(H * B, Lq, Lq)
    enc_attn = jnp.transpose(enc_attn, (1, 0, 2, 3)).reshape(H * B, Lq, Lk)
    return out, slf_attn, enc_attn


# ---------------------------------------------------------------------------
# Deterministic parameter init (shapes follow the torch module; weights are
# pre-transposed to (in, out), biases / LN params reshaped to (1, N))
# ---------------------------------------------------------------------------
def init_params(key, d_model, d_inner, n_head, d_k, d_v):
    ks = jax.random.split(key, 3)
    std_qk = float(np.sqrt(2.0 / (d_model + d_k)))
    std_v = float(np.sqrt(2.0 / (d_model + d_v)))

    def mha_params(kk):
        k1, k2, k3, k4, k5, k6, k7, k8 = jax.random.split(kk, 8)
        wq = jax.random.normal(k1, (d_model, n_head * d_k), jnp.float32) * std_qk
        wk = jax.random.normal(k2, (d_model, n_head * d_k), jnp.float32) * std_qk
        wv = jax.random.normal(k3, (d_model, n_head * d_v), jnp.float32) * std_v
        bq = jax.random.normal(k4, (1, n_head * d_k), jnp.float32) * 0.02
        bk = jax.random.normal(k5, (1, n_head * d_k), jnp.float32) * 0.02
        bv = jax.random.normal(k6, (1, n_head * d_v), jnp.float32) * 0.02
        xav = float(np.sqrt(2.0 / (n_head * d_v + d_model)))
        fcw = jax.random.normal(k7, (n_head * d_v, d_model), jnp.float32) * xav
        fcb = jax.random.normal(k8, (1, d_model), jnp.float32) * 0.02
        g = jnp.ones((1, d_model), jnp.float32)
        b = jnp.zeros((1, d_model), jnp.float32)
        return [wq, bq, wk, bk, wv, bv, fcw, fcb, g, b]

    slf = mha_params(ks[0])
    enc = mha_params(ks[1])
    k1, k2, k3, k4 = jax.random.split(ks[2], 4)
    w1 = jax.random.normal(k1, (d_model, d_inner), jnp.float32) * float(np.sqrt(1.0 / d_model))
    b1 = jax.random.normal(k2, (1, d_inner), jnp.float32) * 0.02
    w2 = jax.random.normal(k3, (d_inner, d_model), jnp.float32) * float(np.sqrt(1.0 / d_inner))
    b2 = jax.random.normal(k4, (1, d_model), jnp.float32) * 0.02
    g = jnp.ones((1, d_model), jnp.float32)
    be = jnp.zeros((1, d_model), jnp.float32)
    return slf + enc + [w1, b1, w2, b2, g, be]


# ---------------------------------------------------------------------------
# Pure-JAX f32 reference (mirrors torch semantics, dropout = identity)
# ---------------------------------------------------------------------------
def mha_ref(xq, xk, xv, mask, p, n_head, d_k, d_v):
    wq, bq, wk, bk, wv, bv, fcw, fcb, g, be = p
    B, Lq, _ = xq.shape
    Lk = xk.shape[1]
    q = (xq @ wq + bq).reshape(B, Lq, n_head, d_k).transpose(2, 0, 1, 3).reshape(n_head * B, Lq, d_k)
    k = (xk @ wk + bk).reshape(B, Lk, n_head, d_k).transpose(2, 0, 1, 3).reshape(n_head * B, Lk, d_k)
    v = (xv @ wv + bv).reshape(B, Lk, n_head, d_v).transpose(2, 0, 1, 3).reshape(n_head * B, Lk, d_v)
    attn = jnp.einsum('nqd,nkd->nqk', q, k) / float(np.sqrt(d_k))
    attn = jnp.where(jnp.tile(mask, (n_head, 1, 1)), -jnp.inf, attn)
    attn = jax.nn.softmax(attn, axis=2)
    out = jnp.einsum('nqk,nkd->nqd', attn, v)
    out = out.reshape(n_head, B, Lq, d_v).transpose(1, 2, 0, 3).reshape(B, Lq, n_head * d_v)
    out = out @ fcw + fcb
    return _layer_norm(out + xq, g, be), attn


def decoder_ref(dec, enc, npm, smask, emask, params, n_head, d_k, d_v):
    slf, enc_p, ffn = params[0:10], params[10:20], params[20:26]
    x, a1 = mha_ref(dec, dec, dec, smask, slf, n_head, d_k, d_v)
    x = x * npm
    x, a2 = mha_ref(x, enc, enc, emask, enc_p, n_head, d_k, d_v)
    x = x * npm
    w1, b1, w2, b2, g, be = ffn
    h = jnp.maximum(x @ w1 + b1, 0.0) @ w2 + b2
    y = _layer_norm(h + x, g, be) * npm
    return y, a1, a2


# ---------------------------------------------------------------------------
if __name__ == "__main__":
    B, Lq, Lk = 2, 8, 12
    d_model, d_inner, n_head, d_k, d_v = 32, 64, 4, 8, 8

    key = jax.random.PRNGKey(0)
    k1, k2, k3 = jax.random.split(key, 3)
    dec_input = jax.random.normal(k1, (B, Lq, d_model), jnp.float32)
    enc_output = jax.random.normal(k2, (B, Lk, d_model), jnp.float32)

    # non_pad_mask: (B, Lq, 1); last decoder position of batch 1 is padding
    non_pad_mask = jnp.ones((B, Lq, 1), jnp.float32).at[1, -1, 0].set(0.0)
    # self-attn mask: causal (True = masked)
    slf_attn_mask = jnp.broadcast_to(
        jnp.triu(jnp.ones((Lq, Lq), bool), k=1)[None], (B, Lq, Lq))
    # enc-dec attn mask: batch 0 has 9 valid encoder keys, batch 1 has all 12
    key_pos = jnp.arange(Lk)[None, None, :]
    valid_len = jnp.array([9, 12])[:, None, None]
    dec_enc_attn_mask = jnp.broadcast_to(key_pos >= valid_len, (B, Lq, Lk))

    params = init_params(k3, d_model, d_inner, n_head, d_k, d_v)

    out, slf_attn, enc_attn = decoder_layer_forward(
        dec_input, enc_output, non_pad_mask, slf_attn_mask, dec_enc_attn_mask,
        params, n_head=n_head, d_k=d_k, d_v=d_v, d_inner=d_inner)
    jax.block_until_ready((out, slf_attn, enc_attn))

    ref_out, ref_a1, ref_a2 = decoder_ref(
        dec_input, enc_output, non_pad_mask, slf_attn_mask, dec_enc_attn_mask,
        params, n_head, d_k, d_v)

    # Tolerance accounts for bf16 activations/weights (f32 accumulate) vs the all-f32 reference.
    tol = dict(rtol=5e-2, atol=5e-2)
    assert np.allclose(np.asarray(out), np.asarray(ref_out), **tol)
    assert np.allclose(np.asarray(slf_attn), np.asarray(ref_a1), **tol)
    assert np.allclose(np.asarray(enc_attn), np.asarray(ref_a2), **tol)
    print("KERNEL_OK")
</pallas_src>

<mosaic_0001>
module attributes {stable_mosaic.version = 11 : i64} {
  func.func @kernel(%arg0: i32, %arg1: memref<2x8x32xbf16, #tpu.memory_space<vmem>>, %arg2: memref<2x12x32xbf16, #tpu.memory_space<vmem>>, %arg3: memref<2x8x1xf32, #tpu.memory_space<vmem>>, %arg4: memref<2x8x8xf32, #tpu.memory_space<vmem>>, %arg5: memref<2x8x12xf32, #tpu.memory_space<vmem>>, %arg6: memref<32x96xbf16, #tpu.memory_space<vmem>>, %arg7: memref<1x96xf32, #tpu.memory_space<vmem>>, %arg8: memref<32x32xbf16, #tpu.memory_space<vmem>>, %arg9: memref<1x32xf32, #tpu.memory_space<vmem>>, %arg10: memref<1x32xf32, #tpu.memory_space<vmem>>, %arg11: memref<1x32xf32, #tpu.memory_space<vmem>>, %arg12: memref<32x32xbf16, #tpu.memory_space<vmem>>, %arg13: memref<1x32xf32, #tpu.memory_space<vmem>>, %arg14: memref<32x64xbf16, #tpu.memory_space<vmem>>, %arg15: memref<1x64xf32, #tpu.memory_space<vmem>>, %arg16: memref<32x32xbf16, #tpu.memory_space<vmem>>, %arg17: memref<1x32xf32, #tpu.memory_space<vmem>>, %arg18: memref<1x32xf32, #tpu.memory_space<vmem>>, %arg19: memref<1x32xf32, #tpu.memory_space<vmem>>, %arg20: memref<32x64xbf16, #tpu.memory_space<vmem>>, %arg21: memref<1x64xf32, #tpu.memory_space<vmem>>, %arg22: memref<64x32xbf16, #tpu.memory_space<vmem>>, %arg23: memref<1x32xf32, #tpu.memory_space<vmem>>, %arg24: memref<1x32xf32, #tpu.memory_space<vmem>>, %arg25: memref<1x32xf32, #tpu.memory_space<vmem>>, %arg26: memref<16x32xf32, #tpu.memory_space<vmem>>, %arg27: memref<2x4x8x8xf32, #tpu.memory_space<vmem>>, %arg28: memref<2x4x8x12xf32, #tpu.memory_space<vmem>>) attributes {dimension_semantics = [#tpu.dimension_semantics<parallel>], iteration_bounds = array<i64: 1>, scalar_prefetch = 0 : i64, scratch_operands = 0 : i64, tpu.core_type = #tpu.core_type<tc>, window_params = [{transform_indices = @transform_0, window_bounds = array<i64: 2, 8, 32>}, {transform_indices = @transform_1, window_bounds = array<i64: 2, 12, 32>}, {transform_indices = @transform_2, window_bounds = array<i64: 2, 8, 1>}, {transform_indices = @transform_3, window_bounds = array<i64: 2, 8, 8>}, {transform_indices = @transform_4, window_bounds = array<i64: 2, 8, 12>}, {pipeline_mode = #tpu.pipeline_mode<synchronous>, transform_indices = @transform_5, window_bounds = array<i64: 32, 96>}, {pipeline_mode = #tpu.pipeline_mode<synchronous>, transform_indices = @transform_6, window_bounds = array<i64: 1, 96>}, {pipeline_mode = #tpu.pipeline_mode<synchronous>, transform_indices = @transform_7, window_bounds = array<i64: 32, 32>}, {pipeline_mode = #tpu.pipeline_mode<synchronous>, transform_indices = @transform_8, window_bounds = array<i64: 1, 32>}, {pipeline_mode = #tpu.pipeline_mode<synchronous>, transform_indices = @transform_9, window_bounds = array<i64: 1, 32>}, {pipeline_mode = #tpu.pipeline_mode<synchronous>, transform_indices = @transform_10, window_bounds = array<i64: 1, 32>}, {pipeline_mode = #tpu.pipeline_mode<synchronous>, transform_indices = @transform_11, window_bounds = array<i64: 32, 32>}, {pipeline_mode = #tpu.pipeline_mode<synchronous>, transform_indices = @transform_12, window_bounds = array<i64: 1, 32>}, {pipeline_mode = #tpu.pipeline_mode<synchronous>, transform_indices = @transform_13, window_bounds = array<i64: 32, 64>}, {pipeline_mode = #tpu.pipeline_mode<synchronous>, transform_indices = @transform_14, window_bounds = array<i64: 1, 64>}, {pipeline_mode = #tpu.pipeline_mode<synchronous>, transform_indices = @transform_15, window_bounds = array<i64: 32, 32>}, {pipeline_mode = #tpu.pipeline_mode<synchronous>, transform_indices = @transform_16, window_bounds = array<i64: 1, 32>}, {pipeline_mode = #tpu.pipeline_mode<synchronous>, transform_indices = @transform_17, window_bounds = array<i64: 1, 32>}, {pipeline_mode = #tpu.pipeline_mode<synchronous>, transform_indices = @transform_18, window_bounds = array<i64: 1, 32>}, {pipeline_mode = #tpu.pipeline_mode<synchronous>, transform_indices = @transform_19, window_bounds = array<i64: 32, 64>}, {pipeline_mode = #tpu.pipeline_mode<synchronous>, transform_indices = @transform_20, window_bounds = array<i64: 1, 64>}, {pipeline_mode = #tpu.pipeline_mode<synchronous>, transform_indices = @transform_21, window_bounds = array<i64: 64, 32>}, {pipeline_mode = #tpu.pipeline_mode<synchronous>, transform_indices = @transform_22, window_bounds = array<i64: 1, 32>}, {pipeline_mode = #tpu.pipeline_mode<synchronous>, transform_indices = @transform_23, window_bounds = array<i64: 1, 32>}, {pipeline_mode = #tpu.pipeline_mode<synchronous>, transform_indices = @transform_24, window_bounds = array<i64: 1, 32>}, {transform_indices = @transform_25, window_bounds = array<i64: 16, 32>}, {transform_indices = @transform_26, window_bounds = array<i64: 2, 4, 8, 8>}, {transform_indices = @transform_27, window_bounds = array<i64: 2, 4, 8, 12>}]} {
    %c0 = arith.constant 0 : index
    %c0_0 = arith.constant 0 : index
    %c0_1 = arith.constant 0 : index
    %0 = vector.load %arg1[%c0, %c0_0, %c0_1] : memref<2x8x32xbf16, #tpu.memory_space<vmem>>, vector<2x8x32xbf16>
    %1 = vector.shape_cast %0 : vector<2x8x32xbf16> to vector<16x32xbf16>
    %c0_2 = arith.constant 0 : index
    %c0_3 = arith.constant 0 : index
    %c0_4 = arith.constant 0 : index
    %2 = vector.load %arg2[%c0_2, %c0_3, %c0_4] : memref<2x12x32xbf16, #tpu.memory_space<vmem>>, vector<2x12x32xbf16>
    %3 = vector.shape_cast %2 : vector<2x12x32xbf16> to vector<24x32xbf16>
    %c0_5 = arith.constant 0 : index
    %c0_6 = arith.constant 0 : index
    %c0_7 = arith.constant 0 : index
    %4 = vector.load %arg3[%c0_5, %c0_6, %c0_7] : memref<2x8x1xf32, #tpu.memory_space<vmem>>, vector<2x8x1xf32>
    %5 = vector.shape_cast %4 : vector<2x8x1xf32> to vector<16x1xf32>
    %c0_8 = arith.constant 0 : index
    %c0_9 = arith.constant 0 : index
    %c0_10 = arith.constant 0 : index
    %6 = vector.load %arg4[%c0_8, %c0_9, %c0_10] : memref<2x8x8xf32, #tpu.memory_space<vmem>>, vector<2x8x8xf32>
    %c0_11 = arith.constant 0 : index
    %c0_12 = arith.constant 0 : index
    %c0_13 = arith.constant 0 : index
    %7 = vector.load %arg5[%c0_11, %c0_12, %c0_13] : memref<2x8x12xf32, #tpu.memory_space<vmem>>, vector<2x8x12xf32>
    %8 = arith.extf %1 : vector<16x32xbf16> to vector<16x32xf32>
    %c0_14 = arith.constant 0 : index
    %c0_15 = arith.constant 0 : index
    %9 = vector.load %arg6[%c0_14, %c0_15] : memref<32x96xbf16, #tpu.memory_space<vmem>>, vector<32x96xbf16>
    %cst = arith.constant dense<0.000000e+00> : vector<16x96xf32>
    %10 = tpu.matmul %1, %9, %cst {dimension_numbers = #tpu.dot_dimension_numbers<[1], [0], [0], [1], [0, 0, 1, 1], [], []>} : vector<16x32xbf16>, vector<32x96xbf16>, vector<16x96xf32> -> vector<16x96xf32>
    %c0_16 = arith.constant 0 : index
    %c0_17 = arith.constant 0 : index
    %11 = vector.load %arg7[%c0_16, %c0_17] : memref<1x96xf32, #tpu.memory_space<vmem>>, vector<1x96xf32>
    %12 = vector.broadcast %11 : vector<1x96xf32> to vector<16x96xf32>
    %13 = arith.addf %10, %12 : vector<16x96xf32>
    %14 = vector.extract_strided_slice %13 {offsets = [0, 0], sizes = [16, 32], strides = [1, 1]} : vector<16x96xf32> to vector<16x32xf32>
    %15 = vector.extract_strided_slice %13 {offsets = [0, 32], sizes = [16, 32], strides = [1, 1]} : vector<16x96xf32> to vector<16x32xf32>
    %16 = vector.extract_strided_slice %13 {offsets = [0, 64], sizes = [16, 32], strides = [1, 1]} : vector<16x96xf32> to vector<16x32xf32>
    %c0_18 = arith.constant 0 : index
    %c0_19 = arith.constant 0 : index
    %17 = vector.load %arg8[%c0_18, %c0_19] : memref<32x32xbf16, #tpu.memory_space<vmem>>, vector<32x32xbf16>
    %c0_20 = arith.constant 0 : index
    %c0_21 = arith.constant 0 : index
    %18 = vector.load %arg9[%c0_20, %c0_21] : memref<1x32xf32, #tpu.memory_space<vmem>>, vector<1x32xf32>
    %c0_22 = arith.constant 0 : index
    %c0_23 = arith.constant 0 : index
    %19 = vector.load %arg10[%c0_22, %c0_23] : memref<1x32xf32, #tpu.memory_space<vmem>>, vector<1x32xf32>
    %c0_24 = arith.constant 0 : index
    %c0_25 = arith.constant 0 : index
    %20 = vector.load %arg11[%c0_24, %c0_25] : memref<1x32xf32, #tpu.memory_space<vmem>>, vector<1x32xf32>
    %21 = vector.shape_cast %14 : vector<16x32xf32> to vector<2x8x4x8xf32>
    %22 = tpu.transpose %21, [0, 2, 1, 3] : vector<2x8x4x8xf32> -> vector<2x4x8x8xf32>
    %23 = vector.shape_cast %22 : vector<2x4x8x8xf32> to vector<8x8x8xf32>
    %24 = arith.truncf %23 : vector<8x8x8xf32> to vector<8x8x8xbf16>
    %25 = vector.shape_cast %15 : vector<16x32xf32> to vector<2x8x4x8xf32>
    %26 = tpu.transpose %25, [0, 2, 1, 3] : vector<2x8x4x8xf32> -> vector<2x4x8x8xf32>
    %27 = vector.shape_cast %26 : vector<2x4x8x8xf32> to vector<8x8x8xf32>
    %28 = arith.truncf %27 : vector<8x8x8xf32> to vector<8x8x8xbf16>
    %29 = vector.shape_cast %16 : vector<16x32xf32> to vector<2x8x4x8xf32>
    %30 = tpu.transpose %29, [0, 2, 1, 3] : vector<2x8x4x8xf32> -> vector<2x4x8x8xf32>
    %31 = vector.shape_cast %30 : vector<2x4x8x8xf32> to vector<8x8x8xf32>
    %32 = arith.truncf %31 : vector<8x8x8xf32> to vector<8x8x8xbf16>
    %cst_26 = arith.constant dense<0.000000e+00> : vector<8x8x8xf32>
    %33 = tpu.matmul %24, %28, %cst_26 {dimension_numbers = #tpu.dot_dimension_numbers<[2], [2], [1], [1], [0, 0, 0, 1, 1, 1], [0], [0]>} : vector<8x8x8xbf16>, vector<8x8x8xbf16>, vector<8x8x8xf32> -> vector<8x8x8xf32>
    %34 = vector.shape_cast %33 : vector<8x8x8xf32> to vector<2x4x8x8xf32>
    %35 = vector.shape_cast %6 : vector<2x8x8xf32> to vector<2x1x8x8xf32>
    %36 = vector.broadcast %35 : vector<2x1x8x8xf32> to vector<2x4x8x8xf32>
    %37 = arith.addf %34, %36 : vector<2x4x8x8xf32>
    %cst_27 = arith.constant dense<0xFF800000> : vector<2x4x8xf32>
    %38 = vector.multi_reduction <maximumf>, %37, %cst_27 [3] : vector<2x4x8x8xf32> to vector<2x4x8xf32>
    %39 = vector.shape_cast %38 : vector<2x4x8xf32> to vector<2x4x8x1xf32>
    %40 = vector.broadcast %39 : vector<2x4x8x1xf32> to vector<2x4x8x8xf32>
    %41 = arith.subf %37, %40 : vector<2x4x8x8xf32>
    %42 = math.exp %41 : vector<2x4x8x8xf32>
    %cst_28 = arith.constant dense<0.000000e+00> : vector<2x4x8xf32>
    %43 = vector.multi_reduction <add>, %42, %cst_28 [3] : vector<2x4x8x8xf32> to vector<2x4x8xf32>
    %44 = vector.shape_cast %43 : vector<2x4x8xf32> to vector<2x4x8x1xf32>
    %45 = vector.broadcast %44 : vector<2x4x8x1xf32> to vector<2x4x8x8xf32>
    %46 = arith.divf %42, %45 : vector<2x4x8x8xf32>
    %c0_29 = arith.constant 0 : index
    %c0_30 = arith.constant 0 : index
    %c0_31 = arith.constant 0 : index
    %c0_32 = arith.constant 0 : index
    %47 = vector.load %arg27[%c0_29, %c0_30, %c0_31, %c0_32] : memref<2x4x8x8xf32, #tpu.memory_space<vmem>>, vector<2x4x8x8xf32>
    tpu.vector_store %arg27[%c0_29, %c0_30, %c0_31, %c0_32], %46 {strides = array<i32>} : memref<2x4x8x8xf32, #tpu.memory_space<vmem>>, vector<2x4x8x8xf32>,
    %48 = vector.shape_cast %46 : vector<2x4x8x8xf32> to vector<8x8x8xf32>
    %49 = arith.truncf %48 : vector<8x8x8xf32> to vector<8x8x8xbf16>
    %cst_33 = arith.constant dense<0.000000e+00> : vector<8x8x8xf32>
    %50 = tpu.matmul %49, %32, %cst_33 {dimension_numbers = #tpu.dot_dimension_numbers<[2], [1], [1], [2], [0, 0, 0, 1, 1, 2], [0], [0]>} : vector<8x8x8xbf16>, vector<8x8x8xbf16>, vector<8x8x8xf32> -> vector<8x8x8xf32>
    %51 = vector.shape_cast %50 : vector<8x8x8xf32> to vector<2x4x8x8xf32>
    %52 = tpu.transpose %51, [0, 2, 1, 3] : vector<2x4x8x8xf32> -> vector<2x8x4x8xf32>
    %53 = vector.shape_cast %52 : vector<2x8x4x8xf32> to vector<16x32xf32>
    %54 = arith.truncf %53 : vector<16x32xf32> to vector<16x32xbf16>
    %cst_34 = arith.constant dense<0.000000e+00> : vector<16x32xf32>
    %55 = tpu.matmul %54, %17, %cst_34 {dimension_numbers = #tpu.dot_dimension_numbers<[1], [0], [0], [1], [0, 0, 1, 1], [], []>} : vector<16x32xbf16>, vector<32x32xbf16>, vector<16x32xf32> -> vector<16x32xf32>
    %56 = vector.broadcast %18 : vector<1x32xf32> to vector<16x32xf32>
    %57 = arith.addf %55, %56 : vector<16x32xf32>
    %58 = arith.addf %57, %8 : vector<16x32xf32>
    %cst_35 = arith.constant dense<0.000000e+00> : vector<16xf32>
    %59 = vector.multi_reduction <add>, %58, %cst_35 [1] : vector<16x32xf32> to vector<16xf32>
    %60 = vector.shape_cast %59 : vector<16xf32> to vector<16x1xf32>
    %cst_36 = arith.constant 3.200000e+01 : f32
    %61 = vector.broadcast %cst_36 : f32 to vector<16x1xf32>
    %62 = arith.divf %60, %61 : vector<16x1xf32>
    %63 = vector.broadcast %62 : vector<16x1xf32> to vector<16x32xf32>
    %64 = arith.subf %58, %63 : vector<16x32xf32>
    %65 = arith.mulf %64, %64 : vector<16x32xf32>
    %cst_37 = arith.constant dense<0.000000e+00> : vector<16xf32>
    %66 = vector.multi_reduction <add>, %65, %cst_37 [1] : vector<16x32xf32> to vector<16xf32>
    %67 = vector.shape_cast %66 : vector<16xf32> to vector<16x1xf32>
    %cst_38 = arith.constant 3.200000e+01 : f32
    %68 = vector.broadcast %cst_38 : f32 to vector<16x1xf32>
    %69 = arith.divf %67, %68 : vector<16x1xf32>
    %70 = vector.broadcast %62 : vector<16x1xf32> to vector<16x32xf32>
    %71 = arith.subf %58, %70 : vector<16x32xf32>
    %cst_39 = arith.constant 9.99999974E-6 : f32
    %72 = vector.broadcast %cst_39 : f32 to vector<16x1xf32>
    %73 = arith.addf %69, %72 : vector<16x1xf32>
    %74 = math.rsqrt %73 : vector<16x1xf32>
    %75 = vector.broadcast %74 : vector<16x1xf32> to vector<16x32xf32>
    %76 = arith.mulf %71, %75 : vector<16x32xf32>
    %77 = vector.broadcast %19 : vector<1x32xf32> to vector<16x32xf32>
    %78 = arith.mulf %76, %77 : vector<16x32xf32>
    %79 = vector.broadcast %20 : vector<1x32xf32> to vector<16x32xf32>
    %80 = arith.addf %78, %79 : vector<16x32xf32>
    %81 = vector.broadcast %5 : vector<16x1xf32> to vector<16x32xf32>
    %82 = arith.mulf %80, %81 : vector<16x32xf32>
    %83 = arith.truncf %82 : vector<16x32xf32> to vector<16x32xbf16>
    %c0_40 = arith.constant 0 : index
    %c0_41 = arith.constant 0 : index
    %84 = vector.load %arg12[%c0_40, %c0_41] : memref<32x32xbf16, #tpu.memory_space<vmem>>, vector<32x32xbf16>
    %cst_42 = arith.constant dense<0.000000e+00> : vector<16x32xf32>
    %85 = tpu.matmul %83, %84, %cst_42 {dimension_numbers = #tpu.dot_dimension_numbers<[1], [0], [0], [1], [0, 0, 1, 1], [], []>} : vector<16x32xbf16>, vector<32x32xbf16>, vector<16x32xf32> -> vector<16x32xf32>
    %c0_43 = arith.constant 0 : index
    %c0_44 = arith.constant 0 : index
    %86 = vector.load %arg13[%c0_43, %c0_44] : memref<1x32xf32, #tpu.memory_space<vmem>>, vector<1x32xf32>
    %87 = vector.broadcast %86 : vector<1x32xf32> to vector<16x32xf32>
    %88 = arith.addf %85, %87 : vector<16x32xf32>
    %c0_45 = arith.constant 0 : index
    %c0_46 = arith.constant 0 : index
    %89 = vector.load %arg14[%c0_45, %c0_46] : memref<32x64xbf16, #tpu.memory_space<vmem>>, vector<32x64xbf16>
    %cst_47 = arith.constant dense<0.000000e+00> : vector<24x64xf32>
    %90 = tpu.matmul %3, %89, %cst_47 {dimension_numbers = #tpu.dot_dimension_numbers<[1], [0], [0], [1], [0, 0, 1, 1], [], []>} : vector<24x32xbf16>, vector<32x64xbf16>, vector<24x64xf32> -> vector<24x64xf32>
    %c0_48 = arith.constant 0 : index
    %c0_49 = arith.constant 0 : index
    %91 = vector.load %arg15[%c0_48, %c0_49] : memref<1x64xf32, #tpu.memory_space<vmem>>, vector<1x64xf32>
    %92 = vector.broadcast %91 : vector<1x64xf32> to vector<24x64xf32>
    %93 = arith.addf %90, %92 : vector<24x64xf32>
    %94 = vector.extract_strided_slice %93 {offsets = [0, 0], sizes = [24, 32], strides = [1, 1]} : vector<24x64xf32> to vector<24x32xf32>
    %95 = vector.extract_strided_slice %93 {offsets = [0, 32], sizes = [24, 32], strides = [1, 1]} : vector<24x64xf32> to vector<24x32xf32>
    %c0_50 = arith.constant 0 : index
    %c0_51 = arith.constant 0 : index
    %96 = vector.load %arg16[%c0_50, %c0_51] : memref<32x32xbf16, #tpu.memory_space<vmem>>, vector<32x32xbf16>
    %c0_52 = arith.constant 0 : index
    %c0_53 = arith.constant 0 : index
    %97 = vector.load %arg17[%c0_52, %c0_53] : memref<1x32xf32, #tpu.memory_space<vmem>>, vector<1x32xf32>
    %c0_54 = arith.constant 0 : index
    %c0_55 = arith.constant 0 : index
    %98 = vector.load %arg18[%c0_54, %c0_55] : memref<1x32xf32, #tpu.memory_space<vmem>>, vector<1x32xf32>
    %c0_56 = arith.constant 0 : index
    %c0_57 = arith.constant 0 : index
    %99 = vector.load %arg19[%c0_56, %c0_57] : memref<1x32xf32, #tpu.memory_space<vmem>>, vector<1x32xf32>
    %100 = vector.shape_cast %88 : vector<16x32xf32> to vector<2x8x4x8xf32>
    %101 = tpu.transpose %100, [0, 2, 1, 3] : vector<2x8x4x8xf32> -> vector<2x4x8x8xf32>
    %102 = vector.shape_cast %101 : vector<2x4x8x8xf32> to vector<8x8x8xf32>
    %103 = arith.truncf %102 : vector<8x8x8xf32> to vector<8x8x8xbf16>
    %104 = vector.shape_cast %94 : vector<24x32xf32> to vector<2x12x4x8xf32>
    %105 = tpu.transpose %104, [0, 2, 1, 3] : vector<2x12x4x8xf32> -> vector<2x4x12x8xf32>
    %106 = vector.shape_cast %105 : vector<2x4x12x8xf32> to vector<8x12x8xf32>
    %107 = arith.truncf %106 : vector<8x12x8xf32> to vector<8x12x8xbf16>
    %108 = vector.shape_cast %95 : vector<24x32xf32> to vector<2x12x4x8xf32>
    %109 = tpu.transpose %108, [0, 2, 1, 3] : vector<2x12x4x8xf32> -> vector<2x4x12x8xf32>
    %110 = vector.shape_cast %109 : vector<2x4x12x8xf32> to vector<8x12x8xf32>
    %111 = arith.truncf %110 : vector<8x12x8xf32> to vector<8x12x8xbf16>
    %cst_58 = arith.constant dense<0.000000e+00> : vector<8x8x12xf32>
    %112 = tpu.matmul %103, %107, %cst_58 {dimension_numbers = #tpu.dot_dimension_numbers<[2], [2], [1], [1], [0, 0, 0, 1, 1, 1], [0], [0]>} : vector<8x8x8xbf16>, vector<8x12x8xbf16>, vector<8x8x12xf32> -> vector<8x8x12xf32>
    %113 = vector.shape_cast %112 : vector<8x8x12xf32> to vector<2x4x8x12xf32>
    %114 = vector.shape_cast %7 : vector<2x8x12xf32> to vector<2x1x8x12xf32>
    %115 = vector.broadcast %114 : vector<2x1x8x12xf32> to vector<2x4x8x12xf32>
    %116 = arith.addf %113, %115 : vector<2x4x8x12xf32>
    %cst_59 = arith.constant dense<0xFF800000> : vector<2x4x8xf32>
    %117 = vector.multi_reduction <maximumf>, %116, %cst_59 [3] : vector<2x4x8x12xf32> to vector<2x4x8xf32>
    %118 = vector.shape_cast %117 : vector<2x4x8xf32> to vector<2x4x8x1xf32>
    %119 = vector.broadcast %118 : vector<2x4x8x1xf32> to vector<2x4x8x12xf32>
    %120 = arith.subf %116, %119 : vector<2x4x8x12xf32>
    %121 = math.exp %120 : vector<2x4x8x12xf32>
    %cst_60 = arith.constant dense<0.000000e+00> : vector<2x4x8xf32>
    %122 = vector.multi_reduction <add>, %121, %cst_60 [3] : vector<2x4x8x12xf32> to vector<2x4x8xf32>
    %123 = vector.shape_cast %122 : vector<2x4x8xf32> to vector<2x4x8x1xf32>
    %124 = vector.broadcast %123 : vector<2x4x8x1xf32> to vector<2x4x8x12xf32>
    %125 = arith.divf %121, %124 : vector<2x4x8x12xf32>
    %c0_61 = arith.constant 0 : index
    %c0_62 = arith.constant 0 : index
    %c0_63 = arith.constant 0 : index
    %c0_64 = arith.constant 0 : index
    %126 = vector.load %arg28[%c0_61, %c0_62, %c0_63, %c0_64] : memref<2x4x8x12xf32, #tpu.memory_space<vmem>>, vector<2x4x8x12xf32>
    tpu.vector_store %arg28[%c0_61, %c0_62, %c0_63, %c0_64], %125 {strides = array<i32>} : memref<2x4x8x12xf32, #tpu.memory_space<vmem>>, vector<2x4x8x12xf32>,
    %127 = vector.shape_cast %125 : vector<2x4x8x12xf32> to vector<8x8x12xf32>
    %128 = arith.truncf %127 : vector<8x8x12xf32> to vector<8x8x12xbf16>
    %cst_65 = arith.constant dense<0.000000e+00> : vector<8x8x8xf32>
    %129 = tpu.matmul %128, %111, %cst_65 {dimension_numbers = #tpu.dot_dimension_numbers<[2], [1], [1], [2], [0, 0, 0, 1, 1, 2], [0], [0]>} : vector<8x8x12xbf16>, vector<8x12x8xbf16>, vector<8x8x8xf32> -> vector<8x8x8xf32>
    %130 = vector.shape_cast %129 : vector<8x8x8xf32> to vector<2x4x8x8xf32>
    %131 = tpu.transpose %130, [0, 2, 1, 3] : vector<2x4x8x8xf32> -> vector<2x8x4x8xf32>
    %132 = vector.shape_cast %131 : vector<2x8x4x8xf32> to vector<16x32xf32>
    %133 = arith.truncf %132 : vector<16x32xf32> to vector<16x32xbf16>
    %cst_66 = arith.constant dense<0.000000e+00> : vector<16x32xf32>
    %134 = tpu.matmul %133, %96, %cst_66 {dimension_numbers = #tpu.dot_dimension_numbers<[1], [0], [0], [1], [0, 0, 1, 1], [], []>} : vector<16x32xbf16>, vector<32x32xbf16>, vector<16x32xf32> -> vector<16x32xf32>
    %135 = vector.broadcast %97 : vector<1x32xf32> to vector<16x32xf32>
    %136 = arith.addf %134, %135 : vector<16x32xf32>
    %137 = arith.addf %136, %82 : vector<16x32xf32>
    %cst_67 = arith.constant dense<0.000000e+00> : vector<16xf32>
    %138 = vector.multi_reduction <add>, %137, %cst_67 [1] : vector<16x32xf32> to vector<16xf32>
    %139 = vector.shape_cast %138 : vector<16xf32> to vector<16x1xf32>
    %cst_68 = arith.constant 3.200000e+01 : f32
    %140 = vector.broadcast %cst_68 : f32 to vector<16x1xf32>
    %141 = arith.divf %139, %140 : vector<16x1xf32>
    %142 = vector.broadcast %141 : vector<16x1xf32> to vector<16x32xf32>
    %143 = arith.subf %137, %142 : vector<16x32xf32>
    %144 = arith.mulf %143, %143 : vector<16x32xf32>
    %cst_69 = arith.constant dense<0.000000e+00> : vector<16xf32>
    %145 = vector.multi_reduction <add>, %144, %cst_69 [1] : vector<16x32xf32> to vector<16xf32>
    %146 = vector.shape_cast %145 : vector<16xf32> to vector<16x1xf32>
    %cst_70 = arith.constant 3.200000e+01 : f32
    %147 = vector.broadcast %cst_70 : f32 to vector<16x1xf32>
    %148 = arith.divf %146, %147 : vector<16x1xf32>
    %149 = vector.broadcast %141 : vector<16x1xf32> to vector<16x32xf32>
    %150 = arith.subf %137, %149 : vector<16x32xf32>
    %cst_71 = arith.constant 9.99999974E-6 : f32
    %151 = vector.broadcast %cst_71 : f32 to vector<16x1xf32>
    %152 = arith.addf %148, %151 : vector<16x1xf32>
    %153 = math.rsqrt %152 : vector<16x1xf32>
    %154 = vector.broadcast %153 : vector<16x1xf32> to vector<16x32xf32>
    %155 = arith.mulf %150, %154 : vector<16x32xf32>
    %156 = vector.broadcast %98 : vector<1x32xf32> to vector<16x32xf32>
    %157 = arith.mulf %155, %156 : vector<16x32xf32>
    %158 = vector.broadcast %99 : vector<1x32xf32> to vector<16x32xf32>
    %159 = arith.addf %157, %158 : vector<16x32xf32>
    %160 = vector.broadcast %5 : vector<16x1xf32> to vector<16x32xf32>
    %161 = arith.mulf %159, %160 : vector<16x32xf32>
    %162 = arith.truncf %161 : vector<16x32xf32> to vector<16x32xbf16>
    %c0_72 = arith.constant 0 : index
    %c0_73 = arith.constant 0 : index
    %163 = vector.load %arg20[%c0_72, %c0_73] : memref<32x64xbf16, #tpu.memory_space<vmem>>, vector<32x64xbf16>
    %cst_74 = arith.constant dense<0.000000e+00> : vector<16x64xf32>
    %164 = tpu.matmul %162, %163, %cst_74 {dimension_numbers = #tpu.dot_dimension_numbers<[1], [0], [0], [1], [0, 0, 1, 1], [], []>} : vector<16x32xbf16>, vector<32x64xbf16>, vector<16x64xf32> -> vector<16x64xf32>
    %c0_75 = arith.constant 0 : index
    %c0_76 = arith.constant 0 : index
    %165 = vector.load %arg21[%c0_75, %c0_76] : memref<1x64xf32, #tpu.memory_space<vmem>>, vector<1x64xf32>
    %166 = vector.broadcast %165 : vector<1x64xf32> to vector<16x64xf32>
    %167 = arith.addf %164, %166 : vector<16x64xf32>
    %cst_77 = arith.constant 0.000000e+00 : f32
    %168 = vector.broadcast %cst_77 : f32 to vector<16x64xf32>
    %169 = arith.maximumf %167, %168 : vector<16x64xf32>
    %170 = arith.truncf %169 : vector<16x64xf32> to vector<16x64xbf16>
    %c0_78 = arith.constant 0 : index
    %c0_79 = arith.constant 0 : index
    %171 = vector.load %arg22[%c0_78, %c0_79] : memref<64x32xbf16, #tpu.memory_space<vmem>>, vector<64x32xbf16>
    %cst_80 = arith.constant dense<0.000000e+00> : vector<16x32xf32>
    %172 = tpu.matmul %170, %171, %cst_80 {dimension_numbers = #tpu.dot_dimension_numbers<[1], [0], [0], [1], [0, 0, 1, 1], [], []>} : vector<16x64xbf16>, vector<64x32xbf16>, vector<16x32xf32> -> vector<16x32xf32>
    %c0_81 = arith.constant 0 : index
    %c0_82 = arith.constant 0 : index
    %173 = vector.load %arg23[%c0_81, %c0_82] : memref<1x32xf32, #tpu.memory_space<vmem>>, vector<1x32xf32>
    %174 = vector.broadcast %173 : vector<1x32xf32> to vector<16x32xf32>
    %175 = arith.addf %172, %174 : vector<16x32xf32>
    %176 = arith.addf %175, %161 : vector<16x32xf32>
    %c0_83 = arith.constant 0 : index
    %c0_84 = arith.constant 0 : index
    %177 = vector.load %arg24[%c0_83, %c0_84] : memref<1x32xf32, #tpu.memory_space<vmem>>, vector<1x32xf32>
    %c0_85 = arith.constant 0 : index
    %c0_86 = arith.constant 0 : index
    %178 = vector.load %arg25[%c0_85, %c0_86] : memref<1x32xf32, #tpu.memory_space<vmem>>, vector<1x32xf32>
    %cst_87 = arith.constant dense<0.000000e+00> : vector<16xf32>
    %179 = vector.multi_reduction <add>, %176, %cst_87 [1] : vector<16x32xf32> to vector<16xf32>
    %180 = vector.shape_cast %179 : vector<16xf32> to vector<16x1xf32>
    %cst_88 = arith.constant 3.200000e+01 : f32
    %181 = vector.broadcast %cst_88 : f32 to vector<16x1xf32>
    %182 = arith.divf %180, %181 : vector<16x1xf32>
    %183 = vector.broadcast %182 : vector<16x1xf32> to vector<16x32xf32>
    %184 = arith.subf %176, %183 : vector<16x32xf32>
    %185 = arith.mulf %184, %184 : vector<16x32xf32>
    %cst_89 = arith.constant dense<0.000000e+00> : vector<16xf32>
    %186 = vector.multi_reduction <add>, %185, %cst_89 [1] : vector<16x32xf32> to vector<16xf32>
    %187 = vector.shape_cast %186 : vector<16xf32> to vector<16x1xf32>
    %cst_90 = arith.constant 3.200000e+01 : f32
    %188 = vector.broadcast %cst_90 : f32 to vector<16x1xf32>
    %189 = arith.divf %187, %188 : vector<16x1xf32>
    %190 = vector.broadcast %182 : vector<16x1xf32> to vector<16x32xf32>
    %191 = arith.subf %176, %190 : vector<16x32xf32>
    %cst_91 = arith.constant 9.99999974E-6 : f32
    %192 = vector.broadcast %cst_91 : f32 to vector<16x1xf32>
    %193 = arith.addf %189, %192 : vector<16x1xf32>
    %194 = math.rsqrt %193 : vector<16x1xf32>
    %195 = vector.broadcast %194 : vector<16x1xf32> to vector<16x32xf32>
    %196 = arith.mulf %191, %195 : vector<16x32xf32>
    %197 = vector.broadcast %177 : vector<1x32xf32> to vector<16x32xf32>
    %198 = arith.mulf %196, %197 : vector<16x32xf32>
    %199 = vector.broadcast %178 : vector<1x32xf32> to vector<16x32xf32>
    %200 = arith.addf %198, %199 : vector<16x32xf32>
    %201 = vector.broadcast %5 : vector<16x1xf32> to vector<16x32xf32>
    %202 = arith.mulf %200, %201 : vector<16x32xf32>
    %c0_92 = arith.constant 0 : index
    %c0_93 = arith.constant 0 : index
    %203 = vector.load %arg26[%c0_92, %c0_93] : memref<16x32xf32, #tpu.memory_space<vmem>>, vector<16x32xf32>
    tpu.vector_store %arg26[%c0_92, %c0_93], %202 {strides = array<i32>} : memref<16x32xf32, #tpu.memory_space<vmem>>, vector<16x32xf32>,
    return
  }
  func.func @transform_0(%arg0: i32) -> (i32, i32, i32) {
    %c0_i32 = arith.constant 0 : i32
    %c0_i32_0 = arith.constant 0 : i32
    %c0_i32_1 = arith.constant 0 : i32
    return %arg0, %c0_i32, %c0_i32_0 : i32, i32, i32
  }
  func.func @transform_1(%arg0: i32) -> (i32, i32, i32) {
    %c0_i32 = arith.constant 0 : i32
    %c0_i32_0 = arith.constant 0 : i32
    %c0_i32_1 = arith.constant 0 : i32
    return %arg0, %c0_i32, %c0_i32_0 : i32, i32, i32
  }
  func.func @transform_2(%arg0: i32) -> (i32, i32, i32) {
    %c0_i32 = arith.constant 0 : i32
    %c0_i32_0 = arith.constant 0 : i32
    %c0_i32_1 = arith.constant 0 : i32
    return %arg0, %c0_i32, %c0_i32_0 : i32, i32, i32
  }
  func.func @transform_3(%arg0: i32) -> (i32, i32, i32) {
    %c0_i32 = arith.constant 0 : i32
    %c0_i32_0 = arith.constant 0 : i32
    %c0_i32_1 = arith.constant 0 : i32
    return %arg0, %c0_i32, %c0_i32_0 : i32, i32, i32
  }
  func.func @transform_4(%arg0: i32) -> (i32, i32, i32) {
    %c0_i32 = arith.constant 0 : i32
    %c0_i32_0 = arith.constant 0 : i32
    %c0_i32_1 = arith.constant 0 : i32
    return %arg0, %c0_i32, %c0_i32_0 : i32, i32, i32
  }
  func.func @transform_5(%arg0: i32) -> (i32, i32) {
    %c0_i32 = arith.constant 0 : i32
    %c0_i32_0 = arith.constant 0 : i32
    %c0_i32_1 = arith.constant 0 : i32
    return %c0_i32, %c0_i32_0 : i32, i32
  }
  func.func @transform_6(%arg0: i32) -> (i32, i32) {
    %c0_i32 = arith.constant 0 : i32
    %c0_i32_0 = arith.constant 0 : i32
    %c0_i32_1 = arith.constant 0 : i32
    return %c0_i32, %c0_i32_0 : i32, i32
  }
  func.func @transform_7(%arg0: i32) -> (i32, i32) {
    %c0_i32 = arith.constant 0 : i32
    %c0_i32_0 = arith.constant 0 : i32
    %c0_i32_1 = arith.constant 0 : i32
    return %c0_i32, %c0_i32_0 : i32, i32
  }
  func.func @transform_8(%arg0: i32) -> (i32, i32) {
    %c0_i32 = arith.constant 0 : i32
    %c0_i32_0 = arith.constant 0 : i32
    %c0_i32_1 = arith.constant 0 : i32
    return %c0_i32, %c0_i32_0 : i32, i32
  }
  func.func @transform_9(%arg0: i32) -> (i32, i32) {
    %c0_i32 = arith.constant 0 : i32
    %c0_i32_0 = arith.constant 0 : i32
    %c0_i32_1 = arith.constant 0 : i32
    return %c0_i32, %c0_i32_0 : i32, i32
  }
  func.func @transform_10(%arg0: i32) -> (i32, i32) {
    %c0_i32 = arith.constant 0 : i32
    %c0_i32_0 = arith.constant 0 : i32
    %c0_i32_1 = arith.constant 0 : i32
    return %c0_i32, %c0_i32_0 : i32, i32
  }
  func.func @transform_11(%arg0: i32) -> (i32, i32) {
    %c0_i32 = arith.constant 0 : i32
    %c0_i32_0 = arith.constant 0 : i32
    %c0_i32_1 = arith.constant 0 : i32
    return %c0_i32, %c0_i32_0 : i32, i32
  }
  func.func @transform_12(%arg0: i32) -> (i32, i32) {
    %c0_i32 = arith.constant 0 : i32
    %c0_i32_0 = arith.constant 0 : i32
    %c0_i32_1 = arith.constant 0 : i32
    return %c0_i32, %c0_i32_0 : i32, i32
  }
  func.func @transform_13(%arg0: i32) -> (i32, i32) {
    %c0_i32 = arith.constant 0 : i32
    %c0_i32_0 = arith.constant 0 : i32
    %c0_i32_1 = arith.constant 0 : i32
    return %c0_i32, %c0_i32_0 : i32, i32
  }
  func.func @transform_14(%arg0: i32) -> (i32, i32) {
    %c0_i32 = arith.constant 0 : i32
    %c0_i32_0 = arith.constant 0 : i32
    %c0_i32_1 = arith.constant 0 : i32
    return %c0_i32, %c0_i32_0 : i32, i32
  }
  func.func @transform_15(%arg0: i32) -> (i32, i32) {
    %c0_i32 = arith.constant 0 : i32
    %c0_i32_0 = arith.constant 0 : i32
    %c0_i32_1 = arith.constant 0 : i32
    return %c0_i32, %c0_i32_0 : i32, i32
  }
  func.func @transform_16(%arg0: i32) -> (i32, i32) {
    %c0_i32 = arith.constant 0 : i32
    %c0_i32_0 = arith.constant 0 : i32
    %c0_i32_1 = arith.constant 0 : i32
    return %c0_i32, %c0_i32_0 : i32, i32
  }
  func.func @transform_17(%arg0: i32) -> (i32, i32) {
    %c0_i32 = arith.constant 0 : i32
    %c0_i32_0 = arith.constant 0 : i32
    %c0_i32_1 = arith.constant 0 : i32
    return %c0_i32, %c0_i32_0 : i32, i32
  }
  func.func @transform_18(%arg0: i32) -> (i32, i32) {
    %c0_i32 = arith.constant 0 : i32
    %c0_i32_0 = arith.constant 0 : i32
    %c0_i32_1 = arith.constant 0 : i32
    return %c0_i32, %c0_i32_0 : i32, i32
  }
  func.func @transform_19(%arg0: i32) -> (i32, i32) {
    %c0_i32 = arith.constant 0 : i32
    %c0_i32_0 = arith.constant 0 : i32
    %c0_i32_1 = arith.constant 0 : i32
    return %c0_i32, %c0_i32_0 : i32, i32
  }
  func.func @transform_20(%arg0: i32) -> (i32, i32) {
    %c0_i32 = arith.constant 0 : i32
    %c0_i32_0 = arith.constant 0 : i32
    %c0_i32_1 = arith.constant 0 : i32
    return %c0_i32, %c0_i32_0 : i32, i32
  }
  func.func @transform_21(%arg0: i32) -> (i32, i32) {
    %c0_i32 = arith.constant 0 : i32
    %c0_i32_0 = arith.constant 0 : i32
    %c0_i32_1 = arith.constant 0 : i32
    return %c0_i32, %c0_i32_0 : i32, i32
  }
  func.func @transform_22(%arg0: i32) -> (i32, i32) {
    %c0_i32 = arith.constant 0 : i32
    %c0_i32_0 = arith.constant 0 : i32
    %c0_i32_1 = arith.constant 0 : i32
    return %c0_i32, %c0_i32_0 : i32, i32
  }
  func.func @transform_23(%arg0: i32) -> (i32, i32) {
    %c0_i32 = arith.constant 0 : i32
    %c0_i32_0 = arith.constant 0 : i32
    %c0_i32_1 = arith.constant 0 : i32
    return %c0_i32, %c0_i32_0 : i32, i32
  }
  func.func @transform_24(%arg0: i32) -> (i32, i32) {
    %c0_i32 = arith.constant 0 : i32
    %c0_i32_0 = arith.constant 0 : i32
    %c0_i32_1 = arith.constant 0 : i32
    return %c0_i32, %c0_i32_0 : i32, i32
  }
  func.func @transform_25(%arg0: i32) -> (i32, i32) {
    %c0_i32 = arith.constant 0 : i32
    %c0_i32_0 = arith.constant 0 : i32
    return %arg0, %c0_i32 : i32, i32
  }
  func.func @transform_26(%arg0: i32) -> (i32, i32, i32, i32) {
    %c0_i32 = arith.constant 0 : i32
    %c0_i32_0 = arith.constant 0 : i32
    %c0_i32_1 = arith.constant 0 : i32
    %c0_i32_2 = arith.constant 0 : i32
    return %arg0, %c0_i32, %c0_i32_0, %c0_i32_1 : i32, i32, i32, i32
  }
  func.func @transform_27(%arg0: i32) -> (i32, i32, i32, i32) {
    %c0_i32 = arith.constant 0 : i32
    %c0_i32_0 = arith.constant 0 : i32
    %c0_i32_1 = arith.constant 0 : i32
    %c0_i32_2 = arith.constant 0 : i32
    return %arg0, %c0_i32, %c0_i32_0, %c0_i32_1 : i32, i32, i32, i32
  }
}

</mosaic_0001>

<bundles_post_ra>
// kernel: tpu_custom_call.1
= control target key start
LH: loop header
LB: loop body
LE: loop exit
PB: predicated region body
PF: predicated region fallthrough
CT: control target
= control target key end

     0   :  { %s7579_s0 = inlined_call_operand.hbm [shape: bf16[2,8,32], index: 0, kind: input, shape index: {}]   ;;  %s7580_s1 = inlined_call_operand.vmem [shape: bf16[2,12,32], index: 1, kind: input, shape index: {}]   ;;  %s7581_s2 = inlined_call_operand.vmem [shape: f32[2,8,1], index: 2, kind: input, shape index: {}]   ;;  %s7582_s3 = inlined_call_operand.vmem [shape: f32[2,8,8], index: 3, kind: input, shape index: {}]   ;;  %s7583_s4 = inlined_call_operand.vmem [shape: f32[2,8,12], index: 4, kind: input, shape index: {}]   ;;  %s7584_s5 = inlined_call_operand.vmem [shape: bf16[32,96], index: 5, kind: input, shape index: {}]   ;;  %s7585_s6 = inlined_call_operand.hbm [shape: f32[1,96], index: 6, kind: input, shape index: {}]   ;;  %s7586_s7 = inlined_call_operand.vmem [shape: bf16[32,32], index: 7, kind: input, shape index: {}]   ;;  %s7587_s8 = inlined_call_operand.hbm [shape: f32[1,32], index: 8, kind: input, shape index: {}]   ;;  %s7588_s9 = inlined_call_operand.hbm [shape: f32[1,32], index: 9, kind: input, shape index: {}]   ;;  %s7589_s10 = inlined_call_operand.hbm [shape: f32[1,32], index: 10, kind: input, shape index: {}]   ;;  %s7590_s11 = inlined_call_operand.vmem [shape: bf16[32,32], index: 11, kind: input, shape index: {}]   ;;  %s7591_s12 = inlined_call_operand.hbm [shape: f32[1,32], index: 12, kind: input, shape index: {}]   ;;  %s7592_s13 = inlined_call_operand.vmem [shape: bf16[32,64], index: 13, kind: input, shape index: {}]   ;;  %s7593_s14 = inlined_call_operand.hbm [shape: f32[1,64], index: 14, kind: input, shape index: {}]   ;;  %s7594_s15 = inlined_call_operand.vmem [shape: bf16[32,32], index: 15, kind: input, shape index: {}]   ;;  %s7595_s16 = inlined_call_operand.hbm [shape: f32[1,32], index: 16, kind: input, shape index: {}]   ;;  %s7596_s17 = inlined_call_operand.hbm [shape: f32[1,32], index: 17, kind: input, shape index: {}]   ;;  %s7597_s18 = inlined_call_operand.hbm [shape: f32[1,32], index: 18, kind: input, shape index: {}]   ;;  %s7598_s19 = inlined_call_operand.vmem [shape: bf16[32,64], index: 19, kind: input, shape index: {}]   ;;  %s7599_s20 = inlined_call_operand.vmem [shape: f32[1,64], index: 20, kind: input, shape index: {}]   ;;  %s7600_s21 = inlined_call_operand.vmem [shape: bf16[64,32], index: 21, kind: input, shape index: {}]   ;;  %s7601_s22 = inlined_call_operand.vmem [shape: f32[1,32], index: 22, kind: input, shape index: {}]   ;;  %s7602_s23 = inlined_call_operand.vmem [shape: f32[1,32], index: 23, kind: input, shape index: {}]   ;;  %s7603_s24 = inlined_call_operand.vmem [shape: f32[1,32], index: 24, kind: input, shape index: {}]   ;;  %s7604_s25 = inlined_call_operand.hbm [shape: f32[16,32], index: 25, kind: output, shape index: {0}]   ;;  %s7605_s26 = inlined_call_operand.hbm [shape: f32[2,4,8,8], index: 26, kind: output, shape index: {1}]   ;;  %s7606_s27 = inlined_call_operand.hbm [shape: f32[2,4,8,12], index: 27, kind: output, shape index: {2}]  }
   0x1   :  { %7614 = sst [smem:[#allocation31_spill]] %s7579_s0 }
   0x2   :  { %7615 = sst [smem:[#allocation32_spill]] %s7580_s1 }
   0x3   :  { %7616 = sst [smem:[#allocation33_spill]] %s7581_s2 }
   0x4   :  { %7617 = sst [smem:[#allocation34_spill]] %s7582_s3 }
   0x5   :  { %7618 = sst [smem:[#allocation35_spill]] %s7583_s4 }
   0x6   :  { %7619 = sst [smem:[#allocation36_spill]] %s7584_s5 }
   0x7   :  { %7620 = sst [smem:[#allocation37_spill]] %s7585_s6 }
   0x8   :  { %7621 = sst [smem:[#allocation38_spill]] %s7586_s7 }
   0x9   :  { %7622 = sst [smem:[#allocation39_spill]] %s7587_s8 }
   0xa   :  { %7623 = sst [smem:[#allocation40_spill]] %s7588_s9 }
   0xb   :  { %7624 = sst [smem:[#allocation41_spill]] %s7589_s10 }
   0xc   :  { %7625 = sst [smem:[#allocation42_spill]] %s7590_s11 }
   0xd   :  { %33 = vsyncpa [#allocation3], 0 }
   0xe   :  { %34 = vsyncpa [#allocation6], 0 }
   0xf   :  { %35 = vsyncpa [#allocation9], 0 }
  0x10   :  { %36 = vsyncpa [#allocation12], 0 }
  0x11   :  { %37 = vsyncpa [#allocation15], 0 }
  0x12   :  { %38 = vsyncpa [#allocation18], 0 }
  0x13   :  { %39 = vsyncpa [#allocation4], 0 }
  0x14   :  { %40 = vsyncpa [#allocation21], 0  ;;  %s6289_s7 = smov [#allocation5]   ;;  %s6290_s8 = smov [#allocation8]  }
  0x15   :  { %s69_s4 = sshll.u32 %s6289_s7, 4  ;;  %s91_s30 = sshll.u32 %s6290_s8, 4  ;;  %s70_s4 = int_to_ptr.vmem [resolvable:$true] %s69_s4  ;;  %s92_s30 = int_to_ptr.vmem [resolvable:$true] %s91_s30 }
  0x16   :  { %s6021_s9 = scalar_lea.vmem %s70_s4, 16  ;;  %s6025_s5 = scalar_lea.vmem %s70_s4, 32 }
  0x17   :  { %p6022_p0 = scmp.ne.s32.totalorder %s70_s4, %s6021_s9  ;;  %p6026_p1 = scmp.lt.s32.totalorder %s70_s4, %s70_s4 }
  0x18   :  { %p6027_p2 = scmp.lt.s32.totalorder %s6025_s5, %s6021_s9 }
  0x1a   :  { %p6028_p3 = por %p6027_p2, %p6026_p1 }
  0x1c   :  { %p6029_p4 = pnand %p6028_p3, %p6022_p0 }
  0x1e   :  { %6032 = shalt.err (!%p6029_p4)
}
  0x1f   :  { %s7626_s10 = sld [smem:[#allocation37_spill]]  ;;  %s6041_s29 = scalar_lea.vmem %s92_s30, 16 }
  0x20   :  { %p6042_p5 = scmp.ne.s32.totalorder %s92_s30, %s6041_s29  ;;  %s6045_s1 = scalar_lea.vmem %s92_s30, 32 }
  0x21   :  { %p6046_p6 = scmp.lt.s32.totalorder %s92_s30, %s92_s30  ;;  %p6047_p7 = scmp.lt.s32.totalorder %s6045_s1, %s6041_s29 }
  0x23   :  { %p6048_p8 = por %p6047_p7, %p6046_p6 }
  0x25   :  { %72 = dma.hbm_to_vmem [thread:$0]  %s7626_s10, 16, %s70_s4, [#allocation6]  }
  0x26   :  { %p6049_p9 = pnand %p6048_p8, %p6042_p5 }
  0x28   :  { %6052 = shalt.err (!%p6049_p9)
}
  0x29   :  { %s7627_s2 = sld [smem:[#allocation40_spill]]  ;;  %s6291_s3 = smov [#allocation11]  }
  0x2a   :  { %s113_s7 = sshll.u32 %s6291_s3, 4  ;;  %s6292_s8 = smov [#allocation14]   ;;  %s114_s7 = int_to_ptr.vmem [resolvable:$true] %s113_s7 }
  0x2b   :  { %s137_s9 = sshll.u32 %s6292_s8, 4  ;;  %s6061_s5 = scalar_lea.vmem %s114_s7, 16  ;;  %s138_s9 = int_to_ptr.vmem [resolvable:$true] %s137_s9 }
  0x2c   :  { %p6062_p10 = scmp.ne.s32.totalorder %s114_s7, %s6061_s5  ;;  %s6065_s4 = scalar_lea.vmem %s114_s7, 32 }
  0x2d   :  { %p6066_p11 = scmp.lt.s32.totalorder %s114_s7, %s114_s7  ;;  %p6067_p12 = scmp.lt.s32.totalorder %s6065_s4, %s6061_s5 }
  0x2f   :  { %94 = dma.hbm_to_vmem [thread:$0]  %s7627_s2, 16, %s92_s30, [#allocation9]  }
  0x30   :  { %p6068_p13 = por %p6067_p12, %p6066_p11 }
  0x32   :  { %p6069_p0 = pnand %p6068_p13, %p6062_p10 }
  0x34   :  { %6072 = shalt.err (!%p6069_p0)
}
  0x35   :  { %116 = dma.hbm_to_vmem [thread:$0]  %s7591_s12, 16, %s114_s7, [#allocation12]  }
  0x36   :  { %s6081_s10 = scalar_lea.vmem %s138_s9, 16  ;;  %s6085_s30 = scalar_lea.vmem %s138_s9, 32 }
  0x37   :  { %p6082_p1 = scmp.ne.s32.totalorder %s138_s9, %s6081_s10  ;;  %p6086_p2 = scmp.lt.s32.totalorder %s138_s9, %s138_s9 }
  0x38   :  { %p6087_p3 = scmp.lt.s32.totalorder %s6085_s30, %s6081_s10 }
  0x3a   :  { %p6088_p4 = por %p6087_p3, %p6086_p2 }
  0x3c   :  { %p6089_p5 = pnand %p6088_p4, %p6082_p1 }
  0x3e   :  { %6092 = shalt.err (!%p6089_p5)
}
  0x3f   :  { %140 = dma.hbm_to_vmem [thread:$0]  %s7595_s16, 16, %s138_s9, [#allocation15]  }
  0x40   :  { %s6293_s6 = smov [#allocation2]  }
  0x41   :  { %s46_s11 = sshll.u32 %s6293_s6, 4  ;;  %s47_s11 = int_to_ptr.vmem [resolvable:$true] %s46_s11 }
  0x42   :  { %s6101_s2 = scalar_lea.vmem %s47_s11, 128  ;;  %p6106_p7 = scmp.lt.s32.totalorder %s47_s11, %s47_s11 }
  0x43   :  { %p6102_p6 = scmp.ne.s32.totalorder %s47_s11, %s6101_s2  ;;  %p6107_p8 = scmp.lt.s32.totalorder %s6101_s2, %s6101_s2 }
  0x45   :  { %p6108_p9 = por %p6107_p8, %p6106_p7 }
  0x47   :  { %p6109_p10 = pnand %p6108_p9, %p6102_p6 }
  0x49   :  { %6112 = shalt.err (!%p6109_p10)
}
  0x4a   :  { %s6294_s12 = smov 64   ;;  %s6295_s3 = smov 4  }
  0x4b   :  { %s7628_s5 = sld [smem:[#allocation31_spill]]  ;;  %s6296_s4 = smov [#allocation7]  }
  0x4c   :  { %s81_s16 = sshll.u32 %s6296_s4, 4  ;;  %s6297_s9 = smov [#allocation10]   ;;  %s82_s16 = int_to_ptr.vmem [resolvable:$true] %s81_s16 }
  0x4d   :  { %s101_s28 = sshll.u32 %s6297_s9, 4  ;;  %s6121_s0 = scalar_lea.vmem %s82_s16, 16  ;;  %s102_s28 = int_to_ptr.vmem [resolvable:$true] %s101_s28 }
  0x4e   :  { %p6122_p11 = scmp.ne.s32.totalorder %s82_s16, %s6121_s0  ;;  %s6125_s10 = scalar_lea.vmem %s82_s16, 32 }
  0x4f   :  { %p6126_p12 = scmp.lt.s32.totalorder %s82_s16, %s82_s16  ;;  %p6127_p13 = scmp.lt.s32.totalorder %s6125_s10, %s6121_s0 }
  0x51   :  { %52 = dma.hbm_to_vmem [thread:$0]  %s7628_s5, 128, %s47_s11, [#allocation3], %s6294_s12, %s6294_s12, %s6295_s3  }
  0x52   :  { %p6128_p0 = por %p6127_p13, %p6126_p12 }
  0x54   :  { %p6129_p1 = pnand %p6128_p0, %p6122_p11 }
  0x56   :  { %6132 = shalt.err (!%p6129_p1)
}
  0x57   :  { %s7629_s1 = sld [smem:[#allocation39_spill]]  ;;  %s6141_s6 = scalar_lea.vmem %s102_s28, 16 }
  0x58   :  { %p6142_p2 = scmp.ne.s32.totalorder %s102_s28, %s6141_s6  ;;  %s6145_s11 = scalar_lea.vmem %s102_s28, 32 }
  0x59   :  { %p6146_p3 = scmp.lt.s32.totalorder %s102_s28, %s102_s28  ;;  %p6147_p4 = scmp.lt.s32.totalorder %s6145_s11, %s6141_s6 }
  0x5b   :  { %p6148_p5 = por %p6147_p4, %p6146_p3 }
  0x5d   :  { %84 = dma.hbm_to_vmem [thread:$0]  %s7629_s1, 16, %s82_s16, [#allocation6]  }
  0x5e   :  { %p6149_p6 = pnand %p6148_p5, %p6142_p2 }
  0x60   :  { %6152 = shalt.err (!%p6149_p6)
}
  0x61   :  { %s7630_s7 = sld [smem:[#allocation41_spill]]  ;;  %s6298_s8 = smov [#allocation13]  }
  0x62   :  { %s125_s5 = sshll.u32 %s6298_s8, 4  ;;  %s6299_s4 = smov [#allocation16]   ;;  %s126_s5 = int_to_ptr.vmem [resolvable:$true] %s125_s5 }
  0x63   :  { %s147_s9 = sshll.u32 %s6299_s4, 4  ;;  %s6161_s0 = scalar_lea.vmem %s126_s5, 16  ;;  %s148_s9 = int_to_ptr.vmem [resolvable:$true] %s147_s9 }
  0x64   :  { %p6162_p7 = scmp.ne.s32.totalorder %s126_s5, %s6161_s0  ;;  %s6165_s16 = scalar_lea.vmem %s126_s5, 32 }
  0x65   :  { %p6166_p8 = scmp.lt.s32.totalorder %s126_s5, %s126_s5  ;;  %p6167_p9 = scmp.lt.s32.totalorder %s6165_s16, %s6161_s0 }
  0x67   :  { %104 = dma.hbm_to_vmem [thread:$0]  %s7630_s7, 16, %s102_s28, [#allocation9]  }
  0x68   :  { %p6168_p10 = por %p6167_p9, %p6166_p8 }
  0x6a   :  { %p6169_p11 = pnand %p6168_p10, %p6162_p7 }
  0x6c   :  { %6172 = shalt.err (!%p6169_p11)
}
  0x6d   :  { %128 = dma.hbm_to_vmem [thread:$0]  %s7593_s14, 16, %s126_s5, [#allocation12]  }
  0x6e   :  { %s6181_s29 = scalar_lea.vmem %s148_s9, 16  ;;  %s6185_s28 = scalar_lea.vmem %s148_s9, 32 }
  0x6f   :  { %p6182_p12 = scmp.ne.s32.totalorder %s148_s9, %s6181_s29  ;;  %p6186_p13 = scmp.lt.s32.totalorder %s148_s9, %s148_s9 }
  0x70   :  { %p6187_p0 = scmp.lt.s32.totalorder %s6185_s28, %s6181_s29 }
  0x72   :  { %p6188_p1 = por %p6187_p0, %p6186_p13 }
  0x74   :  { %p6189_p2 = pnand %p6188_p1, %p6182_p12 }
  0x76   :  { %6192 = shalt.err (!%p6189_p2)
}
  0x77   :  { %150 = dma.hbm_to_vmem [thread:$0]  %s7596_s17, 16, %s148_s9, [#allocation15]  }
  0x78   :  { %s6300_s11 = smov [#allocation17]  }
  0x79   :  { %s157_s2 = sshll.u32 %s6300_s11, 4  ;;  %s158_s2 = int_to_ptr.vmem [resolvable:$true] %s157_s2 }
  0x7a   :  { %s6201_s3 = scalar_lea.vmem %s158_s2, 16  ;;  %s6205_s7 = scalar_lea.vmem %s158_s2, 32 }
  0x7b   :  { %p6202_p3 = scmp.ne.s32.totalorder %s158_s2, %s6201_s3  ;;  %p6206_p4 = scmp.lt.s32.totalorder %s158_s2, %s158_s2 }
  0x7c   :  { %p6207_p5 = scmp.lt.s32.totalorder %s6205_s7, %s6201_s3 }
  0x7e   :  { %p6208_p6 = por %p6207_p5, %p6206_p4 }
  0x80   :  { %p6209_p7 = pnand %p6208_p6, %p6202_p3 }
  0x82   :  { %6212 = shalt.err (!%p6209_p7)
}
  0x83   :  { %160 = dma.hbm_to_vmem [thread:$0]  %s7597_s18, 16, %s158_s2, [#allocation18]  }
  0x84   :  { %6273 = dma.done.wait [#allocation3], 128  }
  0x85   :  { %6274 = vsyncadd [#allocation3], 4294967168 }
  0x86   :  { %6275 = dma.done.wait [#allocation6], 32  }
  0x87   :  { %6276 = vsyncadd [#allocation6], 4294967264 }
  0x88   :  { %6277 = dma.done.wait [#allocation9], 32  }
  0x89   :  { %6278 = vsyncadd [#allocation9], 4294967264 }
  0x8a   :  { %6279 = dma.done.wait [#allocation12], 32  }
  0x8b   :  { %6280 = vsyncadd [#allocation12], 4294967264 }
  0x8c   :  { %6281 = dma.done.wait [#allocation15], 32  }
  0x8d   :  { %6282 = vsyncadd [#allocation15], 4294967264 }
  0x8e   :  { %6283 = dma.done.wait [#allocation18], 16  }
  0x8f   :  { %6284 = vsyncadd [#allocation18], 4294967280  ;;  %v6301_v0 = vmov 0.0   ;;  %vm6302_vm0 = vmmov 0   ;;  %s7631_s5 = sld [smem:[#allocation36_spill]]  ;;  %v204_v3 = vld [vmem:[#allocation2] sm:$0xff]   ;;  %v357_v19 = vlaneseq }
  0x90   :  { %5606 = vmatprep.subr.bf16.mxu1 %v6301_v0  ;;  %5610 = vmatprep.mubr.msk.bf16.mxu1 %vm6302_vm0, %v6301_v0  ;;  %vm280_vm1 = vcmask 261120   ;;  %v5412_v4 = vld [vmem:[#allocation5] ss:$0 sm:$0xff]  ;;  %s6303_s0 = smov 104   ;;  %s6304_s16 = smov 120   ;;  %vm1240_vm2 = vcmask 64512  }
  0x91   :  { %5620 = vmatprep.subr.bf16.mxu0 %v6301_v0  ;;  %5622 = vmatprep.mubr.msk.bf16.mxu0 %vm6302_vm0, %v6301_v0  ;;  %s6305_s10 = smov 112   ;;  %s6306_s30 = smov 96   ;;  %v6307_v17 = vmov 1983009808   ;;  %v358_v21 = vshrl.u32 %v357_v19, 7  ;;  %vm1724_vm3 = vcmask 1043456  }
  0x92   :  { %v355_v18 = vunpack.c.l.s4 %v6307_v17  ;;  %v6308_v22 = vmov 1934713408   ;;  %s7632_s1 = sld [smem:[#allocation34_spill]]  ;;  %s6309_s8 = smov 16   ;;  %vm2388_vm4 = vcmask 130048   ;;  %vm2391_vm5 = vcmask 195584  }
  0x93   :  { %v387_v23 = vunpack.c.l.s4 %v6308_v22  ;;  %s7633_s3 = sld [smem:[#allocation38_spill]]  ;;  %s6310_s17 = smov 8   ;;  %vm4265_vm6 = vcmask 97280   ;;  %vm4373_vm7 = vcmask 1045504   ;;  %vm5260_vm8 = vcmask 523264  }
  0x94   :  { %v356_v20 = vunpack.c.0.s8 %v355_v18  ;;  %s6311_s18 = smov 24   ;;  %s7634_s28 = sld [smem:[#allocation32_spill]] }
  0x95   :  { %v5918_v1 = vld [vmem:[%s7631_s5 + $0x8] sm:$0xff]   ;;  %v5919_v2 = vld [vmem:[%s7631_s5] sm:$0xff]   ;;  %v388_v29 = vunpack.c.0.s8 %v387_v23  ;;  %s7635_s4 = sld [smem:[#allocation33_spill]] }
  0x96   :  { %5607 = vmatpush3.bf16.msra.mxu1 %v5918_v1  ;;  %v6546_v25 = vsub.s32 %v356_v20, %v358_v21  ;;  %s7636_s6 = sld [smem:[#allocation42_spill]] }
  0x97   :  { %5608 = vmatprep.subr.bf16.mxu1 %v6301_v0  ;;  %v6557_v34 = vsub.s32 %v388_v29, %v358_v21 }
  0x9a   :  { %5609 = vmatpush3.bf16.msra.mxu1 %v5919_v2 }
  0x9b   :  { %5614 = vmatprep.subr.bf16.mxu1 %v6301_v0 }
  0x9d   :  { %5611 = vmatmul.mubr.msk.bf16.vlgmr.msra.gmra.mxu1 %vm280_vm1, %v204_v3 }
  0x9e   :  { %5616 = vmatprep.mubr.msk.bf16.mxu1 %vm6302_vm0, %v6301_v0 }
 0x15d   :  { %v318_v5 = vpop.f32.mrf.mxu1 }
 0x15e   :  { %v319_v6 = vadd.f32 %v5412_v4, %v318_v5 }
 0x15f   :  { %v5612_v7 = vpop.f32.mrf.mxu1 }
 0x160   :  { %346 = vrot.lane.b32.xlu1 %v319_v6, %s6303_s0  ;;  %334 = vrot.lane.b32.xlu0 %v319_v6, %s6304_s16 }
 0x161   :  { %v321_v8 = vpop.f32.mrf.mxu1 }
 0x162   :  { %v6508_v9 = vadd.f32 %v5412_v4, %v321_v8 }
 0x163   :  { %v5613_v10 = vpop.f32.mrf.mxu1 }
 0x164   :  { %340 = vrot.lane.b32.xlu0 %v319_v6, %s6305_s10  ;;  %336 = vrot.lane.b32.xlu1 %v6508_v9, %s6304_s16 }
 0x168   :  { %342 = vrot.lane.b32.xlu0 %v6508_v9, %s6305_s10  ;;  %348 = vrot.lane.b32.xlu1 %v6508_v9, %s6303_s0 }
 0x16c   :  { %632 = vrot.lane.b32.xlu0 %v319_v6, %s6306_s30 }
 0x1d2   :  { %v6518_v11 = vpop.permute.xlu0 %334  ;;  %v6520_v12 = vpop.permute.xlu1 %346 }
 0x1d3   :  { %636 = vrot.lane.b32.xlu1 %v6518_v11, %s6306_s30  ;;  %v368_v26 = vcombine.low %v6518_v11, %v6520_v12  ;;  %v369_v28 = vcombine.high %v6518_v11, %v6520_v12 }
 0x1d5   :  { %v376_v31 = vrot.slane %v368_v26, %v6546_v25  ;;  %v383_v33 = vrot.slane %v369_v28, %v6546_v25 }
 0x1d6   :  { %v6524_v13 = vpop.permute.xlu0 %340  ;;  %v6530_v14 = vpop.permute.xlu1 %336 }
 0x1d7   :  { %640 = vrot.lane.b32.xlu0 %v6524_v13, %s6306_s30  ;;  %644 = vrot.lane.b32.xlu1 %v6520_v12, %s6306_s30  ;;  %v352_v24 = vcombine.low %v319_v6, %v6524_v13  ;;  %v353_v27 = vcombine.high %v319_v6, %v6524_v13 }
 0x1d9   :  { %v360_v30 = vrot.slane %v352_v24, %v6546_v25  ;;  %v367_v32 = vrot.slane %v353_v27, %v6546_v25 }
 0x1da   :  { %v6536_v15 = vpop.permute.xlu0 %342  ;;  %v6538_v16 = vpop.permute.xlu1 %348 }
 0x1db   :  { %634 = vrot.lane.b32.xlu0 %v6508_v9, %s6306_s30  ;;  %638 = vrot.lane.b32.xlu1 %v6530_v14, %s6306_s30  ;;  %v384_v35 = vcombine.low %v360_v30, %v376_v31  ;;  %v385_v36 = vcombine.high %v360_v30, %v376_v31  ;;  %v400_v37 = vcombine.low %v367_v32, %v383_v33 }
 0x1dc   :  { %v401_v38 = vcombine.high %v367_v32, %v383_v33  ;;  %v420_v39 = vcombine.low %v6508_v9, %v6536_v15  ;;  %v436_v40 = vcombine.low %v6530_v14, %v6538_v16  ;;  %v421_v43 = vcombine.high %v6508_v9, %v6536_v15 }
 0x1dd   :  { %v392_v41 = vrot.slane %v384_v35, %v6557_v34  ;;  %v399_v42 = vrot.slane %v385_v36, %v6557_v34  ;;  %v437_v44 = vcombine.high %v6530_v14, %v6538_v16  ;;  %v408_v45 = vrot.slane %v400_v37, %v6557_v34 }
 0x1de   :  { %v415_v46 = vrot.slane %v401_v38, %v6557_v34  ;;  %v428_v47 = vrot.slane %v420_v39, %v6546_v25  ;;  %v444_v48 = vrot.slane %v436_v40, %v6546_v25  ;;  %v633_v49 = vpop.permute.xlu0 %632  ;;  %v435_v53 = vrot.slane %v421_v43, %v6546_v25 }
 0x1df   :  { %642 = vrot.lane.b32.xlu0 %v6536_v15, %s6306_s30  ;;  %646 = vrot.lane.b32.xlu1 %v6538_v16, %s6306_s30  ;;  %v488_v51 = vcombine.low %v392_v41, %v399_v42  ;;  %v5417_v52 = vcombine.high %v392_v41, %v399_v42  ;;  %v451_v54 = vrot.slane %v437_v44, %v6546_v25 }
 0x1e0   :  { %v504_v55 = vcombine.low %v408_v45, %v415_v46  ;;  %v5418_v56 = vcombine.high %v408_v45, %v415_v46  ;;  %v452_v57 = vcombine.low %v428_v47, %v444_v48  ;;  %v453_v58 = vcombine.high %v428_v47, %v444_v48 }
 0x1e1   :  { %v6576_v2 = vrot.slane %v488_v51, %v6546_v25  ;;  %v6579_v3 = vrot.slane %v5417_v52, %v6546_v25  ;;  %v468_v4 = vcombine.low %v435_v53, %v451_v54  ;;  %v469_v5 = vcombine.high %v435_v53, %v451_v54 }
 0x1e2   :  { %v6586_v17 = vrot.slane %v504_v55, %v6546_v25  ;;  %v6589_v18 = vrot.slane %v5418_v56, %v6546_v25  ;;  %v6592_v19 = vrot.slane %v452_v57, %v6557_v34  ;;  %v6595_v20 = vrot.slane %v453_v58, %v6557_v34 }
 0x1e3   :  { %936 = vrot.lane.b32.xlu1 %v319_v6, %s6294_s12  ;;  %v6598_v28 = vrot.slane %v468_v4, %v6557_v34  ;;  %v6601_v29 = vrot.slane %v469_v5, %v6557_v34  ;;  %v520_v37 = vcombine.low %v6576_v2, %v6579_v3  ;;  %v521_v39 = vcombine.high %v6576_v2, %v6579_v3 }
 0x1e4   :  { %v556_v35 = vcombine.low %v6592_v19, %v6595_v20  ;;  %v536_v38 = vcombine.low %v6586_v17, %v6589_v18 }
 0x245   :  { %v637_v50 = vpop.permute.xlu1 %636 }
 0x249   :  { %v641_v59 = vpop.permute.xlu0 %640  ;;  %v645_v60 = vpop.permute.xlu1 %644 }
 0x24a   :  { %v656_v61 = vcombine.low %v633_v49, %v641_v59  ;;  %v657_v62 = vcombine.high %v633_v49, %v641_v59  ;;  %v672_v63 = vcombine.low %v637_v50, %v645_v60  ;;  %v673_v1 = vcombine.high %v637_v50, %v645_v60 }
 0x24c   :  { %v664_v6 = vrot.slane %v656_v61, %v6546_v25  ;;  %v671_v7 = vrot.slane %v657_v62, %v6546_v25  ;;  %v680_v8 = vrot.slane %v672_v63, %v6546_v25  ;;  %v687_v10 = vrot.slane %v673_v1, %v6546_v25 }
 0x24d   :  { %v635_v21 = vpop.permute.xlu0 %634  ;;  %v639_v27 = vpop.permute.xlu1 %638 }
 0x24e   :  { %v688_v22 = vcombine.low %v664_v6, %v680_v8  ;;  %v689_v23 = vcombine.high %v664_v6, %v680_v8  ;;  %v704_v24 = vcombine.low %v671_v7, %v687_v10  ;;  %v705_v26 = vcombine.high %v671_v7, %v687_v10 }
 0x250   :  { %v696_v30 = vrot.slane %v688_v22, %v6557_v34  ;;  %v703_v31 = vrot.slane %v689_v23, %v6557_v34  ;;  %v712_v32 = vrot.slane %v704_v24, %v6557_v34  ;;  %v719_v33 = vrot.slane %v705_v26, %v6557_v34 }
 0x251   :  { %v643_v36 = vpop.permute.xlu0 %642  ;;  %v647_v44 = vpop.permute.xlu1 %646  ;;  %v5419_v23 = vcombine.high %v6592_v19, %v6595_v20 }
 0x252   :  { %v792_v40 = vcombine.low %v696_v30, %v703_v31  ;;  %v5421_v41 = vcombine.high %v696_v30, %v703_v31  ;;  %v808_v42 = vcombine.low %v712_v32, %v719_v33  ;;  %v5422_v43 = vcombine.high %v712_v32, %v719_v33 }
 0x253   :  { %v724_v45 = vcombine.low %v635_v21, %v643_v36  ;;  %v725_v46 = vcombine.high %v635_v21, %v643_v36  ;;  %v740_v47 = vcombine.low %v639_v27, %v647_v44  ;;  %v741_v48 = vcombine.high %v639_v27, %v647_v44 }
 0x254   :  { %v799_v49 = vrot.slane %v792_v40, %v6546_v25  ;;  %v807_v50 = vrot.slane %v5421_v41, %v6546_v25  ;;  %v815_v51 = vrot.slane %v808_v42, %v6546_v25  ;;  %v823_v52 = vrot.slane %v5422_v43, %v6546_v25 }
 0x255   :  { %v732_v53 = vrot.slane %v724_v45, %v6546_v25  ;;  %v739_v54 = vrot.slane %v725_v46, %v6546_v25  ;;  %v748_v55 = vrot.slane %v740_v47, %v6546_v25  ;;  %v755_v56 = vrot.slane %v741_v48, %v6546_v25 }
 0x256   :  { %v824_v57 = vcombine.low %v799_v49, %v807_v50  ;;  %v840_v58 = vcombine.low %v815_v51, %v823_v52  ;;  %v825_v59 = vcombine.high %v799_v49, %v807_v50  ;;  %v841_v60 = vcombine.high %v815_v51, %v823_v52 }
 0x257   :  { %v756_v61 = vcombine.low %v732_v53, %v748_v55  ;;  %v757_v62 = vcombine.high %v732_v53, %v748_v55  ;;  %v772_v63 = vcombine.low %v739_v54, %v755_v56  ;;  %v773_v1 = vcombine.high %v739_v54, %v755_v56 }
 0x258   :  { %v832_v4 = vrot.slane %v824_v57, %v6557_v34  ;;  %v848_v5 = vrot.slane %v840_v58, %v6557_v34  ;;  %v839_v6 = vrot.slane %v825_v59, %v6557_v34  ;;  %v855_v7 = vrot.slane %v841_v60, %v6557_v34 }
 0x259   :  { %v764_v8 = vrot.slane %v756_v61, %v6557_v34  ;;  %v771_v10 = vrot.slane %v757_v62, %v6557_v34  ;;  %v780_v21 = vrot.slane %v772_v63, %v6557_v34  ;;  %v787_v22 = vrot.slane %v773_v1, %v6557_v34 }
 0x25a   :  { %v856_v24 = vcombine.low %v832_v4, %v848_v5  ;;  %v857_v26 = vcombine.high %v832_v4, %v848_v5  ;;  %v528_v27 = vrot.slane %v520_v37, %v6557_v34  ;;  %v544_v41 = vrot.slane %v536_v38, %v6557_v34 }
 0x25b   :  { %v860_v30 = vcombine.low %v764_v8, %v771_v10  ;;  %v5423_v31 = vcombine.high %v764_v8, %v771_v10  ;;  %v876_v32 = vcombine.low %v780_v21, %v787_v22  ;;  %v5424_v33 = vcombine.high %v780_v21, %v787_v22 }
 0x25c   :  { %v928_v36 = vpack.c.bf16 %v856_v24, %v856_v24  ;;  %v929_v40 = vpack.c.bf16 %v857_v26, %v857_v26  ;;  %v858_v42 = vcombine.low %v839_v6, %v855_v7  ;;  %v572_v37 = vcombine.low %v6598_v28, %v6601_v29 }
 0x25d   :  { %v867_v43 = vrot.slane %v860_v30, %v6546_v25  ;;  %v875_v44 = vrot.slane %v5423_v31, %v6546_v25  ;;  %v883_v45 = vrot.slane %v876_v32, %v6546_v25  ;;  %v891_v46 = vrot.slane %v5424_v33, %v6546_v25 }
 0x25e   :  { %v1245_v47 = vsel %vm1240_vm2, %v928_v36, 0  ;;  %v1291_v48 = vsel %vm1240_vm2, %v929_v40, 0  ;;  %v859_v49 = vcombine.high %v839_v6, %v855_v7  ;;  %v5420_v38 = vcombine.high %v6598_v28, %v6601_v29 }
 0x25f   :  { %5615 = vmatpush3.bf16.xpose.msra.mxu1 %v1245_v47  ;;  %5621 = vmatpush3.bf16.xpose.msra.mxu0 %v1291_v48  ;;  %v892_v50 = vcombine.low %v867_v43, %v875_v44  ;;  %v908_v51 = vcombine.low %v883_v45, %v891_v46  ;;  %v552_v52 = vcombine.low %v528_v27, %v544_v41 }
 0x260   :  { %v553_v53 = vcombine.high %v528_v27, %v544_v41  ;;  %5626 = vmatprep.subr.bf16.mxu1 %v6301_v0  ;;  %5632 = vmatprep.subr.bf16.mxu0 %v6301_v0  ;;  %v537_v54 = vcombine.high %v6586_v17, %v6589_v18  ;;  %v930_v55 = vpack.c.bf16 %v858_v42, %v858_v42 }
 0x261   :  { %v931_v56 = vpack.c.bf16 %v859_v49, %v859_v49  ;;  %v900_v57 = vrot.slane %v892_v50, %v6557_v34  ;;  %v916_v58 = vrot.slane %v908_v51, %v6557_v34  ;;  %v535_v28 = vrot.slane %v521_v39, %v6557_v34  ;;  %v246_v51 = vld [vmem:[%s7632_s1] sm:$0xff] }
 0x262   :  { %v563_v29 = vrot.slane %v556_v35, %v6546_v25  ;;  %v571_v59 = vrot.slane %v5419_v23, %v6546_v25  ;;  %v579_v17 = vrot.slane %v572_v37, %v6546_v25  ;;  %v624_v18 = vpack.c.bf16 %v552_v52, %v552_v52 }
 0x263   :  { %v625_v60 = vpack.c.bf16 %v553_v53, %v553_v53  ;;  %v551_v61 = vrot.slane %v537_v54, %v6557_v34  ;;  %v587_v62 = vrot.slane %v5420_v38, %v6546_v25  ;;  %v1337_v63 = vsel %vm1240_vm2, %v930_v55, 0 }
 0x264   :  { %v893_v1 = vcombine.high %v867_v43, %v875_v44  ;;  %v1383_v2 = vsel %vm1240_vm2, %v931_v56, 0  ;;  %v924_v3 = vcombine.low %v900_v57, %v916_v58  ;;  %v925_v19 = vcombine.high %v900_v57, %v916_v58 }
 0x265   :  { %v909_v20 = vcombine.high %v883_v45, %v891_v46  ;;  %v588_v35 = vcombine.low %v563_v29, %v571_v59  ;;  %v554_v39 = vcombine.low %v535_v28, %v551_v61  ;;  %v555_v4 = vcombine.high %v535_v28, %v551_v61 }
 0x266   :  { %5617 = vmatmul.mubr.msk.bf16.vlgmr.msra.gmra.mxu1 %vm1240_vm2, %v624_v18  ;;  %5623 = vmatmul.mubr.msk.bf16.vlgmr.msra.gmra.mxu0 %vm1240_vm2, %v625_v60  ;;  %v604_v5 = vcombine.low %v579_v17, %v587_v62  ;;  %v932_v6 = vpack.c.bf16 %v924_v3, %v924_v3  ;;  %v933_v7 = vpack.c.bf16 %v925_v19, %v925_v19 }
 0x267   :  { %5627 = vmatpush3.bf16.xpose.msra.mxu1 %v1337_v63  ;;  %5633 = vmatpush3.bf16.xpose.msra.mxu0 %v1383_v2  ;;  %v907_v8 = vrot.slane %v893_v1, %v6557_v34  ;;  %v923_v10 = vrot.slane %v909_v20, %v6557_v34  ;;  %v626_v21 = vpack.c.bf16 %v554_v39, %v554_v39 }
 0x268   :  { %5628 = vmatprep.mubr.msk.bf16.mxu1 %vm6302_vm0, %v6301_v0  ;;  %5634 = vmatprep.mubr.msk.bf16.mxu0 %vm6302_vm0, %v6301_v0  ;;  %v627_v22 = vpack.c.bf16 %v555_v4, %v555_v4  ;;  %v596_v23 = vrot.slane %v588_v35, %v6557_v34  ;;  %v612_v24 = vrot.slane %v604_v5, %v6557_v34  ;;  %v1429_v26 = vsel %vm1240_vm2, %v932_v6, 0  ;;  %v247_v4 = vld [vmem:[%s7632_s1 + $0x8] sm:$0xff] }
 0x269   :  { %5638 = vmatprep.subr.bf16.mxu1 %v6301_v0  ;;  %5644 = vmatprep.subr.bf16.mxu0 %v6301_v0  ;;  %v1475_v27 = vsel %vm1240_vm2, %v933_v7, 0  ;;  %v926_v30 = vcombine.low %v907_v8, %v923_v10  ;;  %v927_v31 = vcombine.high %v907_v8, %v923_v10  ;;  %v589_v32 = vcombine.high %v563_v29, %v571_v59 }
 0x26a   :  { %v620_v33 = vcombine.low %v596_v23, %v612_v24  ;;  %v621_v36 = vcombine.high %v596_v23, %v612_v24  ;;  %v605_v40 = vcombine.high %v579_v17, %v587_v62 }
 0x26b   :  { %v934_v41 = vpack.c.bf16 %v926_v30, %v926_v30  ;;  %v935_v42 = vpack.c.bf16 %v927_v31, %v927_v31  ;;  %v603_v45 = vrot.slane %v589_v32, %v6557_v34 }
 0x26c   :  { %v628_v43 = vpack.c.bf16 %v620_v33, %v620_v33  ;;  %v629_v44 = vpack.c.bf16 %v621_v36, %v621_v36  ;;  %v619_v46 = vrot.slane %v605_v40, %v6557_v34 }
 0x26d   :  { %v1521_v37 = vsel %vm1240_vm2, %v934_v41, 0  ;;  %v1567_v47 = vsel %vm1240_vm2, %v935_v42, 0 }
 0x26e   :  { %5629 = vmatmul.mubr.msk.bf16.vlgmr.msra.gmra.mxu1 %vm1240_vm2, %v626_v21  ;;  %5635 = vmatmul.mubr.msk.bf16.vlgmr.msra.gmra.mxu0 %vm1240_vm2, %v627_v22  ;;  %v622_v48 = vcombine.low %v603_v45, %v619_v46  ;;  %v623_v49 = vcombine.high %v603_v45, %v619_v46 }
 0x26f   :  { %5639 = vmatpush3.bf16.xpose.msra.mxu1 %v1429_v26  ;;  %5645 = vmatpush3.bf16.xpose.msra.mxu0 %v1475_v27 }
 0x270   :  { %5640 = vmatprep.mubr.msk.bf16.mxu1 %vm6302_vm0, %v6301_v0  ;;  %5646 = vmatprep.mubr.msk.bf16.mxu0 %vm6302_vm0, %v6301_v0  ;;  %v630_v38 = vpack.c.bf16 %v622_v48, %v622_v48  ;;  %v631_v50 = vpack.c.bf16 %v623_v49, %v623_v49  ;;  %v937_v48 = vpop.permute.xlu1 %936 }
 0x271   :  { %5650 = vmatprep.subr.bf16.mxu1 %v6301_v0  ;;  %5656 = vmatprep.subr.bf16.mxu0 %v6301_v0 }
 0x276   :  { %5641 = vmatmul.mubr.msk.bf16.vlgmr.msra.gmra.mxu1 %vm1240_vm2, %v628_v43  ;;  %5647 = vmatmul.mubr.msk.bf16.vlgmr.msra.gmra.mxu0 %vm1240_vm2, %v629_v44 }
 0x277   :  { %5651 = vmatpush3.bf16.xpose.msra.mxu1 %v1521_v37  ;;  %5657 = vmatpush3.bf16.xpose.msra.mxu0 %v1567_v47 }
 0x278   :  { %5652 = vmatprep.mubr.msk.bf16.mxu1 %vm6302_vm0, %v6301_v0  ;;  %5658 = vmatprep.mubr.msk.bf16.mxu0 %vm6302_vm0, %v6301_v0 }
 0x279   :  { %5662 = vmatprep.subr.bf16.mxu1 %v6301_v0  ;;  %5668 = vmatprep.subr.bf16.mxu0 %v6301_v0 }
 0x27e   :  { %5653 = vmatmul.mubr.msk.bf16.vlgmr.msra.gmra.mxu1 %vm1240_vm2, %v630_v38  ;;  %5659 = vmatmul.mubr.msk.bf16.vlgmr.msra.gmra.mxu0 %vm1240_vm2, %v631_v50 }
 0x27f   :  { %5664 = vmatprep.mubr.msk.bf16.mxu1 %vm6302_vm0, %v6301_v0  ;;  %5670 = vmatprep.mubr.msk.bf16.mxu0 %vm6302_vm0, %v6301_v0 }
 0x326   :  { %v1281_v52 = vpop.f32.mrf.mxu1  ;;  %v1327_v53 = vpop.f32.mrf.mxu0 }
 0x327   :  { %v6708_v54 = vadd.f32 %v1281_v52, %v246_v51  ;;  %v6710_v55 = vadd.f32 %v1327_v53, %v246_v51 }
 0x328   :  { %v5618_v56 = vpop.f32.mrf.mxu1  ;;  %v5624_v57 = vpop.f32.mrf.mxu0 }
 0x329   :  { %v1620_v58 = vsel %vm1240_vm2, %v6710_v55, -inf  ;;  %v1617_v28 = vsel %vm1240_vm2, %v6708_v54, -inf }
 0x32a   :  { %1621 = vmax.xlane.f32.xlu1 %v1620_v58  ;;  %v1330_v29 = vpop.f32.mrf.mxu0  ;;  %1618 = vmax.xlane.f32.xlu0 %v1617_v28  ;;  %v1284_v59 = vpop.f32.mrf.mxu1 }
 0x32c   :  { %v5619_v17 = vpop.f32.mrf.mxu1  ;;  %v5625_v18 = vpop.f32.mrf.mxu0 }
 0x32e   :  { %v1373_v60 = vpop.f32.mrf.mxu1  ;;  %v1419_v61 = vpop.f32.mrf.mxu0 }
 0x32f   :  { %v1611_v62 = vadd.f32 %v1373_v60, %v246_v51  ;;  %v1612_v2 = vadd.f32 %v1419_v61, %v246_v51 }
 0x330   :  { %v5630_v63 = vpop.f32.mrf.mxu1  ;;  %v5636_v1 = vpop.f32.mrf.mxu0 }
 0x331   :  { %v1623_v3 = vsel %vm1240_vm2, %v1611_v62, -inf  ;;  %v1626_v5 = vsel %vm1240_vm2, %v1612_v2, -inf }
 0x332   :  { %v1422_v19 = vpop.f32.mrf.mxu0  ;;  %1624 = vmax.xlane.f32.xlu0 %v1623_v3  ;;  %v1376_v20 = vpop.f32.mrf.mxu1 }
 0x334   :  { %v5631_v35 = vpop.f32.mrf.mxu1  ;;  %v5637_v39 = vpop.f32.mrf.mxu0 }
 0x336   :  { %v1511_v6 = vpop.f32.mrf.mxu0  ;;  %1627 = vmax.xlane.f32.xlu0 %v1626_v5  ;;  %v1465_v7 = vpop.f32.mrf.mxu1 }
 0x337   :  { %v1614_v8 = vadd.f32 %v1511_v6, %v247_v4  ;;  %v1613_v10 = vadd.f32 %v1465_v7, %v247_v4 }
 0x338   :  { %v5642_v21 = vpop.f32.mrf.mxu1  ;;  %v5648_v22 = vpop.f32.mrf.mxu0 }
 0x339   :  { %v1632_v23 = vsel %vm1240_vm2, %v1614_v8, -inf  ;;  %v1629_v24 = vsel %vm1240_vm2, %v1613_v10, -inf }
 0x33a   :  { %v1514_v26 = vpop.f32.mrf.mxu0  ;;  %1633 = vmax.xlane.f32.xlu0 %v1632_v23  ;;  %1630 = vmax.xlane.f32.xlu1 %v1629_v24  ;;  %v1468_v27 = vpop.f32.mrf.mxu1 }
 0x33c   :  { %v5643_v30 = vpop.f32.mrf.mxu1  ;;  %v5649_v31 = vpop.f32.mrf.mxu0 }
 0x33e   :  { %v1557_v32 = vpop.f32.mrf.mxu1  ;;  %v1603_v33 = vpop.f32.mrf.mxu0 }
 0x33f   :  { %v6723_v36 = vadd.f32 %v1557_v32, %v247_v4  ;;  %v6725_v40 = vadd.f32 %v1603_v33, %v247_v4 }
 0x340   :  { %v5654_v41 = vpop.f32.mrf.mxu1  ;;  %v5660_v42 = vpop.f32.mrf.mxu0 }
 0x341   :  { %v1638_v43 = vsel %vm1240_vm2, %v6725_v40, -inf  ;;  %v1635_v44 = vsel %vm1240_vm2, %v6723_v36, -inf }
 0x342   :  { %v1606_v45 = vpop.f32.mrf.mxu0  ;;  %1639 = vmax.xlane.f32.xlu0 %v1638_v43  ;;  %1636 = vmax.xlane.f32.xlu1 %v1635_v44  ;;  %v1560_v46 = vpop.f32.mrf.mxu1 }
 0x344   :  { %v5655_v37 = vpop.f32.mrf.mxu1  ;;  %v5661_v47 = vpop.f32.mrf.mxu0 }
 0x353   :  { %944 = vrot.lane.b32.xlu1 %v6524_v13, %s6294_s12 }
 0x357   :  { %948 = vrot.lane.b32.xlu1 %v6520_v12, %s6294_s12 }
 0x358   :  { %940 = vrot.lane.b32.xlu0 %v6518_v11, %s6294_s12 }
 0x35b   :  { %938 = vrot.lane.b32.xlu1 %v6508_v9, %s6294_s12 }
 0x3b3   :  { %v1622_v49 = vpop.xlane.xlu1 %1621  ;;  %v1619_v38 = vpop.xlane.xlu0 %1618 }
 0x3b4   :  { %v1642_v50 = vsub.f32 %v6710_v55, %v1622_v49  ;;  %v1641_v51 = vsub.f32 %v6708_v54, %v1619_v38 }
 0x3b6   :  { %v1651_v52 = vmul.f32 1.442695, %v1642_v50  ;;  %v1649_v53 = vmul.f32 1.442695, %v1641_v51 }
 0x3b8   :  { %5936 = vpow2.f32 %v1651_v52 }
 0x3b9   :  { %5938 = vpow2.f32 %v1649_v53 }
 0x3bb   :  { %v1625_v13 = vpop.xlane.xlu0 %1624 }
 0x3bc   :  { %v1643_v56 = vsub.f32 %v1611_v62, %v1625_v13 }
 0x3be   :  { %v1653_v12 = vmul.f32 1.442695, %v1643_v56 }
 0x3bf   :  { %v1628_v57 = vpop.xlane.xlu0 %1627 }
 0x3c0   :  { %5940 = vpow2.f32 %v1653_v12  ;;  %v1644_v11 = vsub.f32 %v1612_v2, %v1628_v57 }
 0x3c2   :  { %v1655_v58 = vmul.f32 1.442695, %v1644_v11 }
 0x3c3   :  { %v1634_v28 = vpop.xlane.xlu0 %1633  ;;  %v1631_v9 = vpop.xlane.xlu1 %1630 }
 0x3c4   :  { %5942 = vpow2.f32 %v1655_v58  ;;  %v1646_v29 = vsub.f32 %v1614_v8, %v1634_v28  ;;  %v1645_v59 = vsub.f32 %v1613_v10, %v1631_v9 }
 0x3c5   :  { %v6741_v17 = vpop.eup %5936 }
 0x3c6   :  { %v6743_v55 = vpop.eup %5938  ;;  %v1657_v54 = vmul.f32 1.442695, %v1645_v59  ;;  %v1668_v18 = vsel %vm1240_vm2, %v6741_v17, 0.0  ;;  %v1659_v60 = vmul.f32 1.442695, %v1646_v29 }
 0x3c7   :  { %1669 = vadd.xlane.f32.xlu0 %v1668_v18  ;;  %v1665_v61 = vsel %vm1240_vm2, %v6743_v55, 0.0 }
 0x3c8   :  { %1666 = vadd.xlane.f32.xlu1 %v1665_v61  ;;  %5944 = vpow2.f32 %v1657_v54 }
 0x3c9   :  { %5946 = vpow2.f32 %v1659_v60 }
 0x3cb   :  { %v6749_v62 = vpop.xlane.xlu1 %1636  ;;  %v6753_v1 = vpop.xlane.xlu0 %1639 }
 0x3cd   :  { %v6751_v63 = vpop.eup %5940 }
 0x3ce   :  { %v1671_v2 = vsel %vm1240_vm2, %v6751_v63, 0.0 }
 0x3cf   :  { %1672 = vadd.xlane.f32.xlu0 %v1671_v2  ;;  %v945_v3 = vpop.permute.xlu1 %944  ;;  %v941_v4 = vpop.permute.xlu0 %940 }
 0x3d0   :  { %v960_v20 = vcombine.low %v937_v48, %v945_v3  ;;  %v961_v35 = vcombine.high %v937_v48, %v945_v3 }
 0x3d1   :  { %v6757_v19 = vpop.eup %5942 }
 0x3d2   :  { %v1674_v39 = vsel %vm1240_vm2, %v6757_v19, 0.0  ;;  %v968_v10 = vrot.slane %v960_v20, %v6546_v25  ;;  %v975_v21 = vrot.slane %v961_v35, %v6546_v25 }
 0x3d3   :  { %1675 = vadd.xlane.f32.xlu1 %v1674_v39  ;;  %v949_v5 = vpop.permute.xlu1 %948 }
 0x3d4   :  { %v976_v6 = vcombine.low %v941_v4, %v949_v5  ;;  %v977_v7 = vcombine.high %v941_v4, %v949_v5 }
 0x3d5   :  { %v6761_v8 = vpop.eup %5944 }
 0x3d6   :  { %v984_v22 = vrot.slane %v976_v6, %v6546_v25  ;;  %v991_v23 = vrot.slane %v977_v7, %v6546_v25  ;;  %v1677_v24 = vsel %vm1240_vm2, %v6761_v8, 0.0  ;;  %v6769_v26 = vpop.eup %5946 }
 0x3d7   :  { %1678 = vadd.xlane.f32.xlu0 %v1677_v24  ;;  %v1680_v44 = vsel %vm1240_vm2, %v6769_v26, 0.0 }
 0x3d8   :  { %v992_v27 = vcombine.low %v968_v10, %v984_v22  ;;  %v993_v30 = vcombine.high %v968_v10, %v984_v22  ;;  %v1008_v31 = vcombine.low %v975_v21, %v991_v23  ;;  %v1009_v32 = vcombine.high %v975_v21, %v991_v23 }
 0x3da   :  { %v1000_v33 = vrot.slane %v992_v27, %v6557_v34  ;;  %v1007_v41 = vrot.slane %v993_v30, %v6557_v34  ;;  %v1016_v42 = vrot.slane %v1008_v31, %v6557_v34  ;;  %v1023_v43 = vrot.slane %v1009_v32, %v6557_v34 }
 0x3db   :  { %1681 = vadd.xlane.f32.xlu0 %v1680_v44 }
 0x3dc   :  { %v1096_v45 = vcombine.low %v1000_v33, %v1007_v41  ;;  %v5425_v46 = vcombine.high %v1000_v33, %v1007_v41  ;;  %v1112_v37 = vcombine.low %v1016_v42, %v1023_v43  ;;  %v5426_v47 = vcombine.high %v1016_v42, %v1023_v43 }
 0x3de   :  { %v1103_v48 = vrot.slane %v1096_v45, %v6546_v25  ;;  %v1111_v49 = vrot.slane %v5425_v46, %v6546_v25  ;;  %v1119_v38 = vrot.slane %v1112_v37, %v6546_v25  ;;  %v1127_v50 = vrot.slane %v5426_v47, %v6546_v25 }
 0x3e0   :  { %v1128_v51 = vcombine.low %v1103_v48, %v1111_v49  ;;  %v1144_v52 = vcombine.low %v1119_v38, %v1127_v50  ;;  %v1129_v53 = vcombine.high %v1103_v48, %v1111_v49  ;;  %v1145_v13 = vcombine.high %v1119_v38, %v1127_v50 }
 0x3e2   :  { %v1136_v56 = vrot.slane %v1128_v51, %v6557_v34  ;;  %v1152_v12 = vrot.slane %v1144_v52, %v6557_v34  ;;  %v1143_v57 = vrot.slane %v1129_v53, %v6557_v34  ;;  %v1159_v11 = vrot.slane %v1145_v13, %v6557_v34 }
 0x3e4   :  { %946 = vrot.lane.b32.xlu1 %v6536_v15, %s6294_s12  ;;  %v1160_v58 = vcombine.low %v1136_v56, %v1152_v12  ;;  %v1161_v28 = vcombine.high %v1136_v56, %v1152_v12  ;;  %v1162_v9 = vcombine.low %v1143_v57, %v1159_v11  ;;  %v1163_v29 = vcombine.high %v1143_v57, %v1159_v11 }
 0x3e5   :  { %v1648_v15 = vsub.f32 %v6725_v40, %v6753_v1  ;;  %v939_v40 = vpop.permute.xlu1 %938 }
 0x3e6   :  { %v1232_v59 = vpack.c.bf16 %v1160_v58, %v1160_v58  ;;  %v1233_v54 = vpack.c.bf16 %v1161_v28, %v1161_v28  ;;  %v1235_v7 = vpack.c.bf16 %v1163_v29, %v1163_v29  ;;  %v1234_v21 = vpack.c.bf16 %v1162_v9, %v1162_v9 }
 0x3e7   :  { %v1663_v61 = vmul.f32 1.442695, %v1648_v15 }
 0x3e8   :  { %950 = vrot.lane.b32.xlu1 %v6538_v16, %s6294_s12  ;;  %v1726_v18 = vsel %vm1724_vm3, %v1232_v59, 0  ;;  %v1772_v60 = vsel %vm1724_vm3, %v1233_v54, 0  ;;  %v1647_v16 = vsub.f32 %v6723_v36, %v6749_v62  ;;  %v1864_v30 = vsel %vm1724_vm3, %v1235_v7, 0 }
 0x3e9   :  { %5663 = vmatpush3.bf16.msra.mxu1 %v1726_v18  ;;  %5669 = vmatpush3.bf16.msra.mxu0 %v1772_v60  ;;  %5948 = vpow2.f32 %v1663_v61 }
 0x3ea   :  { %5674 = vmatprep.subr.bf16.mxu1 %v6301_v0  ;;  %5680 = vmatprep.subr.bf16.mxu0 %v6301_v0  ;;  %v1661_v2 = vmul.f32 1.442695, %v1647_v16 }
 0x3ec   :  { %5950 = vpow2.f32 %v1661_v2 }
 0x3f1   :  { %942 = vrot.lane.b32.xlu0 %v6530_v14, %s6294_s12 }
 0x3f6   :  { %v6799_v3 = vpop.eup %5948 }
 0x3f7   :  { %v1686_v20 = vsel %vm1240_vm2, %v6799_v3, 0.0 }
 0x3f9   :  { %v6803_v35 = vpop.eup %5950 }
 0x3fa   :  { %v1683_v14 = vsel %vm1240_vm2, %v6803_v35, 0.0 }
 0x40c   :  { %1687 = vadd.xlane.f32.xlu1 %v1686_v20 }
 0x410   :  { %1684 = vadd.xlane.f32.xlu0 %v1683_v14 }
 0x450   :  { %v1670_v1 = vpop.xlane.xlu0 %1669 }
 0x451   :  { %5952 = vrcp.f32 %v1670_v1  ;;  %v1667_v39 = vpop.xlane.xlu1 %1666 }
 0x452   :  { %5954 = vrcp.f32 %v1667_v39 }
 0x458   :  { %v1673_v36 = vpop.xlane.xlu0 %1672 }
 0x459   :  { %5956 = vrcp.f32 %v1673_v36 }
 0x45c   :  { %v1676_v62 = vpop.xlane.xlu1 %1675 }
 0x45d   :  { %5958 = vrcp.f32 %v1676_v62 }
 0x45e   :  { %v5953_v4 = vpop.eup %5952 }
 0x45f   :  { %v5955_v5 = vpop.eup %5954  ;;  %v1692_v6 = vmul.f32 %v5953_v4, %v6741_v17  ;;  %v1818_v17 = vsel %vm1724_vm3, %v1234_v21, 0 }
 0x460   :  { %v1690_v10 = vmul.f32 %v5955_v5, %v6743_v55  ;;  %v1679_v22 = vpop.xlane.xlu0 %1678  ;;  %v947_v27 = vpop.permute.xlu1 %946 }
 0x461   :  { %1706 = vst.msk [vmem:[#allocation20 + $0x8] sm:$0xff] %vm1240_vm2, %v1692_v6  ;;  %v1714_v23 = vpack.c.bf16 %v1692_v6, %v1692_v6  ;;  %5960 = vrcp.f32 %v1679_v22  ;;  %v1028_v33 = vcombine.low %v939_v40, %v947_v27  ;;  %v1029_v41 = vcombine.high %v939_v40, %v947_v27 }
 0x462   :  { %1705 = vst.msk [vmem:[#allocation20] sm:$0xff] %vm1240_vm2, %v1690_v10  ;;  %v1713_v24 = vpack.c.bf16 %v1690_v10, %v1690_v10 }
 0x463   :  { %5671 = vmatmul.mubr.msk.bf16.vlgmr.msra.gmra.mxu0 %vm1240_vm2, %v1714_v23  ;;  %v1036_v48 = vrot.slane %v1028_v33, %v6546_v25  ;;  %v1043_v49 = vrot.slane %v1029_v41, %v6546_v25 }
 0x464   :  { %5665 = vmatmul.mubr.msk.bf16.vlgmr.msra.gmra.mxu1 %vm1240_vm2, %v1713_v24  ;;  %5681 = vmatpush3.bf16.msra.mxu0 %v1864_v30  ;;  %v1682_v55 = vpop.xlane.xlu0 %1681  ;;  %v951_v42 = vpop.permute.xlu1 %950 }
 0x465   :  { %5675 = vmatpush3.bf16.msra.mxu1 %v1818_v17  ;;  %5676 = vmatprep.mubr.msk.bf16.mxu1 %vm6302_vm0, %v6301_v0  ;;  %5962 = vrcp.f32 %v1682_v55 }
 0x466   :  { %v5957_v31 = vpop.eup %5956  ;;  %5682 = vmatprep.mubr.msk.bf16.mxu0 %vm6302_vm0, %v6301_v0  ;;  %5686 = vmatprep.subr.bf16.mxu1 %v6301_v0 }
 0x467   :  { %v1694_v32 = vmul.f32 %v5957_v31, %v6751_v63  ;;  %5692 = vmatprep.subr.bf16.mxu0 %v6301_v0 }
 0x468   :  { %v943_v43 = vpop.permute.xlu0 %942 }
 0x469   :  { %1707 = vst.msk [vmem:[#allocation20 + $0x10] sm:$0xff] %vm1240_vm2, %v1694_v32  ;;  %v1715_v44 = vpack.c.bf16 %v1694_v32, %v1694_v32  ;;  %v1044_v46 = vcombine.low %v943_v43, %v951_v42  ;;  %v1045_v37 = vcombine.high %v943_v43, %v951_v42 }
 0x46a   :  { %v5959_v45 = vpop.eup %5958 }
 0x46b   :  { %v1696_v47 = vmul.f32 %v5959_v45, %v6757_v19  ;;  %v1052_v63 = vrot.slane %v1044_v46, %v6546_v25  ;;  %v1059_v38 = vrot.slane %v1045_v37, %v6546_v25 }
 0x46c   :  { %5677 = vmatmul.mubr.msk.bf16.vlgmr.msra.gmra.mxu1 %vm1240_vm2, %v1715_v44 }
 0x46d   :  { %1708 = vst.msk [vmem:[#allocation20 + $0x18] sm:$0xff] %vm1240_vm2, %v1696_v47  ;;  %v1716_v50 = vpack.c.bf16 %v1696_v47, %v1696_v47  ;;  %5688 = vmatprep.mubr.msk.bf16.mxu1 %vm6302_vm0, %v6301_v0  ;;  %v1060_v51 = vcombine.low %v1036_v48, %v1052_v63  ;;  %v1061_v52 = vcombine.high %v1036_v48, %v1052_v63 }
 0x46e   :  { %v1076_v53 = vcombine.low %v1043_v49, %v1059_v38  ;;  %v1077_v19 = vcombine.high %v1043_v49, %v1059_v38  ;;  %v5961_v13 = vpop.eup %5960 }
 0x46f   :  { %5683 = vmatmul.mubr.msk.bf16.vlgmr.msra.gmra.mxu0 %vm1240_vm2, %v1716_v50  ;;  %v1068_v56 = vrot.slane %v1060_v51, %v6557_v34  ;;  %v1075_v12 = vrot.slane %v1061_v52, %v6557_v34  ;;  %v1698_v58 = vmul.f32 %v5961_v13, %v6761_v8 }
 0x470   :  { %v1084_v57 = vrot.slane %v1076_v53, %v6557_v34  ;;  %v1091_v11 = vrot.slane %v1077_v19, %v6557_v34  ;;  %5694 = vmatprep.mubr.msk.bf16.mxu0 %vm6302_vm0, %v6301_v0 }
 0x471   :  { %v1164_v28 = vcombine.low %v1068_v56, %v1075_v12  ;;  %v5427_v9 = vcombine.high %v1068_v56, %v1075_v12  ;;  %1709 = vst.msk [vmem:[#allocation20 + $0x20] sm:$0xff] %vm1240_vm2, %v1698_v58  ;;  %v1717_v24 = vpack.c.bf16 %v1698_v58, %v1698_v58 }
 0x472   :  { %v1180_v29 = vcombine.low %v1084_v57, %v1091_v11  ;;  %v5428_v59 = vcombine.high %v1084_v57, %v1091_v11  ;;  %v5963_v54 = vpop.eup %5962 }
 0x473   :  { %v1171_v18 = vrot.slane %v1164_v28, %v6546_v25  ;;  %v1179_v60 = vrot.slane %v5427_v9, %v6546_v25  ;;  %v1700_v16 = vmul.f32 %v5963_v54, %v6769_v26 }
 0x474   :  { %v1187_v15 = vrot.slane %v1180_v29, %v6546_v25  ;;  %v1195_v61 = vrot.slane %v5428_v59, %v6546_v25 }
 0x475   :  { %v1196_v2 = vcombine.low %v1171_v18, %v1179_v60  ;;  %v1197_v8 = vcombine.high %v1171_v18, %v1179_v60  ;;  %1710 = vst.msk [vmem:[#allocation20 + $0x28] sm:$0xff] %vm1240_vm2, %v1700_v16  ;;  %v1718_v27 = vpack.c.bf16 %v1700_v16, %v1700_v16 }
 0x476   :  { %v1212_v20 = vcombine.low %v1187_v15, %v1195_v61  ;;  %v1213_v14 = vcombine.high %v1187_v15, %v1195_v61 }
 0x477   :  { %v1204_v40 = vrot.slane %v1196_v2, %v6557_v34  ;;  %v1211_v39 = vrot.slane %v1197_v8, %v6557_v34 }
 0x478   :  { %v1220_v1 = vrot.slane %v1212_v20, %v6557_v34  ;;  %v1227_v36 = vrot.slane %v1213_v14, %v6557_v34 }
 0x47a   :  { %v1228_v62 = vcombine.low %v1204_v40, %v1220_v1  ;;  %v1229_v4 = vcombine.high %v1204_v40, %v1220_v1  ;;  %v1230_v5 = vcombine.low %v1211_v39, %v1227_v36  ;;  %v1231_v6 = vcombine.high %v1211_v39, %v1227_v36 }
 0x47c   :  { %v1236_v7 = vpack.c.bf16 %v1228_v62, %v1228_v62  ;;  %v1237_v26 = vpack.c.bf16 %v1229_v4, %v1229_v4  ;;  %v1238_v22 = vpack.c.bf16 %v1230_v5, %v1230_v5  ;;  %v1239_v23 = vpack.c.bf16 %v1231_v6, %v1231_v6 }
 0x47e   :  { %v1910_v10 = vsel %vm1724_vm3, %v1236_v7, 0  ;;  %v1956_v21 = vsel %vm1724_vm3, %v1237_v26, 0  ;;  %v2002_v30 = vsel %vm1724_vm3, %v1238_v22, 0  ;;  %v2048_v17 = vsel %vm1724_vm3, %v1239_v23, 0 }
 0x47f   :  { %5687 = vmatpush3.bf16.msra.mxu1 %v1910_v10  ;;  %5693 = vmatpush3.bf16.msra.mxu0 %v1956_v21 }
 0x480   :  { %5698 = vmatprep.subr.bf16.mxu1 %v6301_v0  ;;  %5704 = vmatprep.subr.bf16.mxu0 %v6301_v0 }
 0x482   :  { %5689 = vmatmul.mubr.msk.bf16.vlgmr.msra.gmra.mxu1 %vm1240_vm2, %v1717_v24  ;;  %5695 = vmatmul.mubr.msk.bf16.vlgmr.msra.gmra.mxu0 %vm1240_vm2, %v1718_v27 }
 0x483   :  { %5699 = vmatpush3.bf16.msra.mxu1 %v2002_v30  ;;  %5705 = vmatpush3.bf16.msra.mxu0 %v2048_v17 }
 0x484   :  { %5706 = vmatprep.mubr.msk.bf16.mxu0 %vm6302_vm0, %v6301_v0  ;;  %5700 = vmatprep.mubr.msk.bf16.mxu1 %vm6302_vm0, %v6301_v0 }
 0x485   :  { %5710 = vmatprep.subr.bf16.mxu1 %v6301_v0  ;;  %5718 = vmatprep.subr.bf16.mxu0 %v6301_v0 }
 0x495   :  { %v1688_v55 = vpop.xlane.xlu1 %1687 }
 0x496   :  { %5964 = vrcp.f32 %v1688_v55 }
 0x499   :  { %v1685_v31 = vpop.xlane.xlu0 %1684 }
 0x49a   :  { %5966 = vrcp.f32 %v1685_v31 }
 0x4a3   :  { %v5965_v32 = vpop.eup %5964 }
 0x4a4   :  { %v1704_v33 = vmul.f32 %v5965_v32, %v6799_v3 }
 0x4a6   :  { %1712 = vst.msk [vmem:[#allocation20 + $0x38] sm:$0xff] %vm1240_vm2, %v1704_v33  ;;  %v1720_v41 = vpack.c.bf16 %v1704_v33, %v1704_v33 }
 0x4a7   :  { %v5967_v42 = vpop.eup %5966 }
 0x4a8   :  { %5707 = vmatmul.mubr.msk.bf16.vlgmr.msra.gmra.mxu0 %vm1240_vm2, %v1720_v41  ;;  %v1702_v43 = vmul.f32 %v5967_v42, %v6803_v35 }
 0x4a9   :  { %5722 = vmatprep.mubr.msk.bf16.mxu0 %vm6302_vm0, %v6301_v0 }
 0x4aa   :  { %1711 = vst.msk [vmem:[#allocation20 + $0x30] sm:$0xff] %vm1240_vm2, %v1702_v43  ;;  %v1719_v44 = vpack.c.bf16 %v1702_v43, %v1702_v43 }
 0x4ac   :  { %5701 = vmatmul.mubr.msk.bf16.vlgmr.msra.gmra.mxu1 %vm1240_vm2, %v1719_v44 }
 0x4ad   :  { %5714 = vmatprep.mubr.msk.bf16.mxu1 %vm6302_vm0, %v6301_v0 }
 0x523   :  { %v1808_v3 = vpop.f32.mrf.mxu0 }
 0x524   :  { %v1762_v45 = vpop.f32.mrf.mxu1 }
 0x525   :  { %v5672_v46 = vpop.f32.mrf.mxu0 }
 0x526   :  { %v5666_v37 = vpop.f32.mrf.mxu1 }
 0x527   :  { %v1811_v47 = vpop.f32.mrf.mxu0 }
 0x528   :  { %v1765_v48 = vpop.f32.mrf.mxu1 }
 0x529   :  { %v5673_v49 = vpop.f32.mrf.mxu0 }
 0x52a   :  { %v5667_v63 = vpop.f32.mrf.mxu1 }
 0x52c   :  { %v1854_v35 = vpop.f32.mrf.mxu1 }
 0x52d   :  { %v2090_v38 = vcombine.low %v1762_v45, %v1854_v35  ;;  %v2091_v50 = vcombine.high %v1762_v45, %v1854_v35 }
 0x52e   :  { %v5678_v51 = vpop.f32.mrf.mxu1 }
 0x52f   :  { %v1900_v52 = vpop.f32.mrf.mxu0  ;;  %v2098_v12 = vrot.slane %v2090_v38, %v6546_v25  ;;  %v2105_v57 = vrot.slane %v2091_v50, %v6546_v25 }
 0x530   :  { %v1857_v53 = vpop.f32.mrf.mxu1  ;;  %v2106_v19 = vcombine.low %v1808_v3, %v1900_v52  ;;  %v2107_v13 = vcombine.high %v1808_v3, %v1900_v52 }
 0x531   :  { %v5684_v56 = vpop.f32.mrf.mxu0 }
 0x532   :  { %v2114_v11 = vrot.slane %v2106_v19, %v6546_v25  ;;  %v2121_v58 = vrot.slane %v2107_v13, %v6546_v25  ;;  %v5679_v28 = vpop.f32.mrf.mxu1 }
 0x533   :  { %v1903_v9 = vpop.f32.mrf.mxu0 }
 0x534   :  { %v2122_v29 = vcombine.low %v2098_v12, %v2114_v11  ;;  %v2123_v59 = vcombine.high %v2098_v12, %v2114_v11  ;;  %v2138_v54 = vcombine.low %v2105_v57, %v2121_v58  ;;  %v2139_v18 = vcombine.high %v2105_v57, %v2121_v58 }
 0x535   :  { %v5685_v60 = vpop.f32.mrf.mxu0 }
 0x536   :  { %v2130_v15 = vrot.slane %v2122_v29, %v6557_v34  ;;  %v2137_v61 = vrot.slane %v2123_v59, %v6557_v34  ;;  %v2146_v16 = vrot.slane %v2138_v54, %v6557_v34  ;;  %v2153_v2 = vrot.slane %v2139_v18, %v6557_v34  ;;  %v5921_v60 = vld [vmem:[%s7633_s3 + $0x8] sm:$0xff]  }
 0x537   :  { %5711 = vmatpush3.bf16.msra.mxu1 %v5921_v60  ;;  %v5411_v60 = vld.sshfl [vmem:[%s7634_s28 + $0xc] sm:$0x3 pattern:$0x76325410] }
 0x538   :  { %v2226_v20 = vcombine.low %v2130_v15, %v2137_v61  ;;  %v5445_v8 = vcombine.high %v2130_v15, %v2137_v61  ;;  %v2242_v14 = vcombine.low %v2146_v16, %v2153_v2  ;;  %v5446_v40 = vcombine.high %v2146_v16, %v2153_v2  ;;  %5712 = vmatprep.subr.bf16.mxu1 %v6301_v0 }
 0x53a   :  { %v2233_v1 = vrot.slane %v2226_v20, %v6546_v25  ;;  %v2241_v39 = vrot.slane %v5445_v8, %v6546_v25  ;;  %v2249_v36 = vrot.slane %v2242_v14, %v6546_v25  ;;  %v2257_v62 = vrot.slane %v5446_v40, %v6546_v25 }
 0x53c   :  { %v2259_v4 = vcombine.high %v2233_v1, %v2241_v39  ;;  %v2275_v5 = vcombine.high %v2249_v36, %v2257_v62  ;;  %v2258_v6 = vcombine.low %v2233_v1, %v2241_v39  ;;  %v2274_v7 = vcombine.low %v2249_v36, %v2257_v62  ;;  %v5922_v1 = vld [vmem:[%s7633_s3] sm:$0xff]  }
 0x53d   :  { %5713 = vmatpush3.bf16.msra.mxu1 %v5922_v1 }
 0x53e   :  { %v6888_v26 = vrot.slane %v2259_v4, %v6557_v34  ;;  %v6891_v10 = vrot.slane %v2275_v5, %v6557_v34  ;;  %v6894_v21 = vrot.slane %v2258_v6, %v6557_v34  ;;  %v6897_v22 = vrot.slane %v2274_v7, %v6557_v34 }
 0x540   :  { %v2292_v23 = vcombine.low %v6888_v26, %v6891_v10  ;;  %v2290_v24 = vcombine.low %v6894_v21, %v6897_v22  ;;  %v2291_v27 = vcombine.high %v6894_v21, %v6897_v22  ;;  %v2293_v30 = vcombine.high %v6888_v26, %v6891_v10  ;;  %v5449_v21 = vld [vmem:[#allocation7] ss:$0 sm:$0xff]  ;;  %v6012_v22 = vld [vmem:[#allocation2] sm:$0xff]  }
 0x542   :  { %v1946_v17 = vpop.f32.mrf.mxu1  ;;  %v1992_v55 = vpop.f32.mrf.mxu0 }
 0x544   :  { %v5690_v31 = vpop.f32.mrf.mxu1  ;;  %v5696_v32 = vpop.f32.mrf.mxu0 }
 0x546   :  { %v1949_v33 = vpop.f32.mrf.mxu1  ;;  %v1995_v41 = vpop.f32.mrf.mxu0 }
 0x548   :  { %v5691_v42 = vpop.f32.mrf.mxu1  ;;  %v5697_v43 = vpop.f32.mrf.mxu0 }
 0x568   :  { %v2084_v44 = vpop.f32.mrf.mxu0 }
 0x569   :  { %v2174_v45 = vcombine.low %v1992_v55, %v2084_v44  ;;  %v2175_v46 = vcombine.high %v1992_v55, %v2084_v44 }
 0x56a   :  { %v5708_v3 = vpop.f32.mrf.mxu0 }
 0x56b   :  { %v2182_v38 = vrot.slane %v2174_v45, %v6546_v25  ;;  %v2189_v50 = vrot.slane %v2175_v46, %v6546_v25 }
 0x56c   :  { %v2087_v37 = vpop.f32.mrf.mxu0  ;;  %v2038_v47 = vpop.f32.mrf.mxu1 }
 0x56d   :  { %v2158_v48 = vcombine.low %v1946_v17, %v2038_v47  ;;  %v2159_v49 = vcombine.high %v1946_v17, %v2038_v47 }
 0x56e   :  { %v5709_v63 = vpop.f32.mrf.mxu0  ;;  %v5702_v35 = vpop.f32.mrf.mxu1 }
 0x56f   :  { %v2166_v51 = vrot.slane %v2158_v48, %v6546_v25  ;;  %v2173_v52 = vrot.slane %v2159_v49, %v6546_v25 }
 0x570   :  { %v2041_v53 = vpop.f32.mrf.mxu1 }
 0x571   :  { %v2190_v19 = vcombine.low %v2166_v51, %v2182_v38  ;;  %v2191_v13 = vcombine.high %v2166_v51, %v2182_v38  ;;  %v2206_v56 = vcombine.low %v2173_v52, %v2189_v50  ;;  %v2207_v12 = vcombine.high %v2173_v52, %v2189_v50 }
 0x572   :  { %v5703_v57 = vpop.f32.mrf.mxu1  ;;  %v251_v50 = vunpack.c.h.bf16 %v6012_v22 }
 0x573   :  { %v2198_v11 = vrot.slane %v2190_v19, %v6557_v34  ;;  %v2205_v58 = vrot.slane %v2191_v13, %v6557_v34  ;;  %v2214_v28 = vrot.slane %v2206_v56, %v6557_v34  ;;  %v2221_v9 = vrot.slane %v2207_v12, %v6557_v34  ;;  %v5923_v12 = vld [vmem:[%s7592_s13 + $0x8] sm:$0xff]   ;;  %v5408_v57 = vld.sshfl [vmem:[%s7634_s28] sm:$0x33 pattern:$0x76325410] }
 0x574   :  { %5726 = vmatprep.subr.bf16.mxu1 %v5923_v12 }
 0x575   :  { %v2294_v29 = vcombine.low %v2198_v11, %v2205_v58  ;;  %v5447_v59 = vcombine.high %v2198_v11, %v2205_v58  ;;  %v2310_v54 = vcombine.low %v2214_v28, %v2221_v9  ;;  %v5448_v18 = vcombine.high %v2214_v28, %v2221_v9  ;;  %v5924_v58 = vld [vmem:[%s7592_s13] sm:$0xff]   ;;  %v5410_v9 = vld.sshfl [vmem:[%s7634_s28 + $0x8] sm:$0x33 pattern:$0x76325410] }
 0x576   :  { %v221_v11 = vcombine.high %v5408_v57, %v5408_v57  ;;  %v5409_v28 = vld.sshfl [vmem:[%s7634_s28 + $0x4] sm:$0x3 pattern:$0x76325410] }
 0x577   :  { %v2301_v15 = vrot.slane %v2294_v29, %v6546_v25  ;;  %v2309_v61 = vrot.slane %v5447_v59, %v6546_v25  ;;  %v2317_v16 = vrot.slane %v2310_v54, %v6546_v25  ;;  %v2325_v2 = vrot.slane %v5448_v18, %v6546_v25 }
 0x578   :  { %v2593_v29 = vcombine.low %v5408_v57, %v221_v11  ;;  %v236_v59 = vcombine.high %v5410_v9, %v5410_v9  ;;  %v2594_v54 = vcombine.low %v5409_v28, %v5410_v9 }
 0x579   :  { %v2327_v20 = vcombine.high %v2301_v15, %v2309_v61  ;;  %v2343_v8 = vcombine.high %v2317_v16, %v2325_v2  ;;  %v2326_v14 = vcombine.low %v2301_v15, %v2309_v61  ;;  %v2342_v40 = vcombine.low %v2317_v16, %v2325_v2 }
 0x57a   :  { %v2601_v18 = vrot.slane %v2593_v29, %v6546_v25  ;;  %v2608_v15 = vrot.slane %v2594_v54, %v6546_v25  ;;  %v2610_v61 = vcombine.low %v236_v59, %v5411_v60  ;;  %v6312_v16 = vmov 0  }
 0x57b   :  { %v2341_v39 = vrot.slane %v2327_v20, %v6557_v34  ;;  %v2357_v36 = vrot.slane %v2343_v8, %v6557_v34  ;;  %v2334_v62 = vrot.slane %v2326_v14, %v6557_v34  ;;  %v2350_v4 = vrot.slane %v2342_v40, %v6557_v34  ;;  %5901 = vset.pattern.permute.xlu0 %v6312_v16 }
 0x57c   :  { %v2609_v2 = vcombine.low %v2601_v18, %v2608_v15  ;;  %v2617_v20 = vrot.slane %v2610_v61, %v6546_v25  ;;  %5902 = vset.pattern.permute.xlu1 %v6312_v16 }
 0x57d   :  { %v2360_v5 = vcombine.low %v2341_v39, %v2357_v36  ;;  %v2359_v6 = vcombine.high %v2334_v62, %v2350_v4  ;;  %v2358_v7 = vcombine.low %v2334_v62, %v2350_v4  ;;  %v2361_v31 = vcombine.high %v2341_v39, %v2357_v36 }
 0x57f   :  { %v5891_v17 = vpack.i.bf16 %v2360_v5, %v2292_v23  ;;  %v5886_v55 = vpack.i.bf16 %v2359_v6, %v2291_v27  ;;  %v5896_v32 = vpack.i.bf16 %v2361_v31, %v2293_v30  ;;  %v5926_v31 = vld [vmem:[%s7636_s6] sm:$0xff]  }
 0x581   :  { %5892 = vrot.lane.b32.xlu1 %v5891_v17, %s6309_s8  ;;  %5887 = vrot.lane.b32.xlu0 %v5886_v55, %s6310_s17  ;;  %v244_v17 = vld [vmem:[%s7635_s4] sm:$0xff]  ;;  %v5925_v55 = vld [vmem:[%s7636_s6 + $0x8] sm:$0xff]  }
 0x582   :  { %5719 = vmatpush3.bf16.msra.mxu0 %v5925_v55 }
 0x583   :  { %5720 = vmatprep.subr.bf16.mxu0 %v6301_v0 }
 0x585   :  { %5897 = vrot.lane.b32.xlu0 %v5896_v32, %s6311_s18 }
 0x586   :  { %5721 = vmatpush3.bf16.msra.mxu0 %v5926_v31 }
 0x587   :  { %5734 = vmatprep.subr.bf16.mxu0 %v6301_v0 }
 0x5f3   :  { %v5893_v33 = vpop.permute.xlu1 %5892  ;;  %v5888_v41 = vpop.permute.xlu0 %5887 }
 0x5f4   :  { %v5890_v42 = vunpack.i.h.bf16 %v5888_v41  ;;  %v5889_v43 = vunpack.i.l.bf16 %v5888_v41  ;;  %v5895_v23 = vunpack.i.h.bf16 %v5893_v33  ;;  %v5894_v27 = vunpack.i.l.bf16 %v5893_v33  ;;  %v5459_v33 = vld [vmem:[#allocation13] ss:$0 sm:$0xff] }
 0x5f6   :  { %v2386_v44 = vsel %vm1240_vm2, %v2290_v24, %v5889_v43  ;;  %v2387_v3 = vsel %vm1240_vm2, %v2358_v7, %v5890_v42  ;;  %v250_v24 = vunpack.c.l.bf16 %v6012_v22  ;;  %v245_v7 = vld [vmem:[%s7635_s4 + $0x8] sm:$0xff] }
 0x5f7   :  { %v5898_v26 = vpop.permute.xlu0 %5897  ;;  %v2389_v45 = vsel %vm2388_vm4, %v2386_v44, %v5894_v27  ;;  %v2390_v46 = vsel %vm2388_vm4, %v2387_v3, %v5895_v23 }
 0x5f8   :  { %v5900_v10 = vunpack.i.h.bf16 %v5898_v26  ;;  %v5899_v30 = vunpack.i.l.bf16 %v5898_v26 }
 0x5fa   :  { %v2392_v37 = vsel %vm2391_vm5, %v2389_v45, %v5899_v30  ;;  %v2393_v47 = vsel %vm2391_vm5, %v2390_v46, %v5900_v10 }
 0x5fb   :  { %v2394_v48 = vpack.c.bf16 %v2393_v47, %v2392_v37  ;;  %v5453_v47 = vld [vmem:[#allocation8] ss:$0 sm:$0xff] }
 0x5fd   :  { %5715 = vmatmul.mubr.msk.bf16.vlgmr.msra.gmra.mxu1 %vm280_vm1, %v2394_v48 }
 0x5fe   :  { %5727 = vmatpush3.bf16.msra.mxu1 %v5923_v12  ;;  %5730 = vmatprep.mubr.msk.bf16.mxu1 %vm280_vm1, %v2609_v2 }
 0x5ff   :  { %5728 = vmatprep.subr.bf16.mxu1 %v5924_v58 }
 0x602   :  { %5729 = vmatpush3.bf16.msra.mxu1 %v5924_v58 }
 0x603   :  { %5740 = vmatprep.subr.bf16.mxu1 %v6301_v0 }
 0x605   :  { %5731 = vmatmul.mubr.msk.bf16.vlgmr.msra.gmra.mxu1 %vm280_vm1, %v2617_v20 }
 0x606   :  { %5742 = vmatprep.mubr.msk.bf16.mxu1 %vm6302_vm0, %v6301_v0 }
 0x6bd   :  { %v2450_v49 = vpop.f32.mrf.mxu1 }
 0x6be   :  { %v2451_v63 = vadd.f32 %v5449_v21, %v2450_v49 }
 0x6bf   :  { %v5716_v35 = vpop.f32.mrf.mxu1 }
 0x6c0   :  { %v2457_v38 = vadd.f32 %v2451_v63, %v250_v24  ;;  %v5454_v24 = vld [vmem:[#allocation10] ss:$0 sm:$0xff] }
 0x6c1   :  { %v2453_v51 = vpop.f32.mrf.mxu1 }
 0x6c2   :  { %v2454_v52 = vadd.f32 %v5449_v21, %v2453_v51  ;;  %v2459_v53 = vsel %vm280_vm1, %v2457_v38, 0.0 }
 0x6c3   :  { %v5717_v19 = vpop.f32.mrf.mxu1  ;;  %2460 = vadd.xlane.f32.xlu1 %v2459_v53 }
 0x6c4   :  { %v2458_v13 = vadd.f32 %v2454_v52, %v251_v50 }
 0x6c5   :  { %v5732_v32 = vpop.f32.mrf.mxu1 }
 0x6c6   :  { %v2462_v56 = vsel %vm280_vm1, %v2458_v13, 0.0  ;;  %v6990_v41 = vadd.f32 %v5732_v32, %v5459_v33 }
 0x6c7   :  { %2463 = vadd.xlane.f32.xlu0 %v2462_v56  ;;  %v2670_v42 = vpop.f32.mrf.mxu1 }
 0x6c8   :  { %v6992_v43 = vadd.f32 %v5459_v33, %v2670_v42 }
 0x6c9   :  { %v5733_v23 = vpop.f32.mrf.mxu1 }
 0x6cb   :  { %v2673_v27 = vpop.f32.mrf.mxu1 }
 0x6cc   :  { %v6996_v44 = vadd.f32 %v5459_v33, %v2673_v27 }
 0x74c   :  { %v2461_v8 = vpop.xlane.xlu1 %2460 }
 0x74d   :  { %v2466_v14 = vmul.f32 0.03125, %v2461_v8 }
 0x74f   :  { %v2468_v40 = vsub.f32 %v2457_v38, %v2466_v14 }
 0x750   :  { %v2464_v1 = vpop.xlane.xlu0 %2463 }
 0x751   :  { %v2467_v39 = vmul.f32 0.03125, %v2464_v1  ;;  %v2470_v36 = vmul.f32 %v2468_v40, %v2468_v40 }
 0x753   :  { %v2469_v62 = vsub.f32 %v2458_v13, %v2467_v39  ;;  %v2472_v4 = vsel %vm280_vm1, %v2470_v36, 0.0 }
 0x754   :  { %2473 = vadd.xlane.f32.xlu0 %v2472_v4 }
 0x755   :  { %v2471_v5 = vmul.f32 %v2469_v62, %v2469_v62 }
 0x757   :  { %v2475_v6 = vsel %vm280_vm1, %v2471_v5, 0.0 }
 0x758   :  { %2476 = vadd.xlane.f32.xlu1 %v2475_v6 }
 0x769   :  { %2509 = vperm.xlu1 %5902, %v245_v7  }
 0x76a   :  { %2504 = vperm.xlu0 %5901, %v244_v17  }
 0x76d   :  { %2994 = vrot.lane.b32.xlu1 %v6992_v43, %s6304_s16 }
 0x771   :  { %2996 = vrot.lane.b32.xlu1 %v6996_v44, %s6304_s16 }
 0x775   :  { %3003 = vrot.lane.b32.xlu1 %v6992_v43, %s6305_s10 }
 0x779   :  { %3005 = vrot.lane.b32.xlu1 %v6996_v44, %s6305_s10 }
 0x77d   :  { %3012 = vrot.lane.b32.xlu1 %v6992_v43, %s6303_s0 }
 0x781   :  { %3014 = vrot.lane.b32.xlu1 %v6996_v44, %s6303_s0 }
 0x7dd   :  { %v2474_v3 = vpop.xlane.xlu0 %2473 }
 0x7de   :  { %v2478_v26 = vmul.f32 0.03125, %v2474_v3 }
 0x7e0   :  { %v2480_v10 = vadd.f32 1e-05, %v2478_v26 }
 0x7e1   :  { %v2477_v30 = vpop.xlane.xlu1 %2476 }
 0x7e2   :  { %5968 = vrsqrt.f32 %v2480_v10  ;;  %v2479_v45 = vmul.f32 0.03125, %v2477_v30 }
 0x7e4   :  { %v2481_v46 = vadd.f32 1e-05, %v2479_v45 }
 0x7e5   :  { %v7008_v38 = vpop.permute.xlu0 %2504  ;;  %v7010_v50 = vpop.permute.xlu1 %2509 }
 0x7e6   :  { %5970 = vrsqrt.f32 %v2481_v46 }
 0x7e9   :  { %v7023_v13 = vpop.permute.xlu1 %2994 }
 0x7ed   :  { %v7025_v56 = vpop.permute.xlu1 %2996 }
 0x7ef   :  { %v5969_v37 = vpop.eup %5968 }
 0x7f0   :  { %v2484_v48 = vmul.f32 %v5969_v37, %v2468_v40 }
 0x7f1   :  { %v7027_v12 = vpop.permute.xlu1 %3003 }
 0x7f2   :  { %v2492_v21 = vmul.f32 %v5453_v47, %v2484_v48  ;;  %v3021_v11 = vcombine.low %v6992_v43, %v7027_v12  ;;  %v3022_v58 = vcombine.high %v6992_v43, %v7027_v12 }
 0x7f3   :  { %v5971_v22 = vpop.eup %5970 }
 0x7f4   :  { %v2485_v49 = vmul.f32 %v5971_v22, %v2469_v62  ;;  %v2500_v63 = vadd.f32 %v5454_v24, %v2492_v21  ;;  %v3029_v9 = vrot.slane %v3021_v11, %v6546_v25  ;;  %v3036_v29 = vrot.slane %v3022_v58, %v6546_v25 }
 0x7f5   :  { %v7029_v57 = vpop.permute.xlu1 %3005 }
 0x7f6   :  { %v2493_v35 = vmul.f32 %v5453_v47, %v2485_v49  ;;  %v7013_v52 = vmul.f32 %v7008_v38, %v2500_v63  ;;  %v3089_v18 = vcombine.low %v6996_v44, %v7029_v57 }
 0x7f8   :  { %v2501_v51 = vadd.f32 %v5454_v24, %v2493_v35  ;;  %v3097_v14 = vrot.slane %v3089_v18, %v6546_v25 }
 0x7f9   :  { %v7035_v28 = vpop.permute.xlu1 %3012 }
 0x7fa   :  { %v7016_v53 = vmul.f32 %v7010_v50, %v2501_v51  ;;  %v3037_v59 = vcombine.low %v7023_v13, %v7035_v28  ;;  %v3038_v54 = vcombine.high %v7023_v13, %v7035_v28 }
 0x7fc   :  { %v2514_v19 = vpack.c.bf16 %v7016_v53, %v7013_v52  ;;  %v3045_v60 = vrot.slane %v3037_v59, %v6546_v25  ;;  %v3052_v15 = vrot.slane %v3038_v54, %v6546_v25 }
 0x7fd   :  { %v7047_v61 = vpop.permute.xlu1 %3014 }
 0x7fe   :  { %5723 = vmatmul.mubr.msk.bf16.vlgmr.msra.gmra.mxu0 %vm280_vm1, %v2514_v19  ;;  %v3053_v16 = vcombine.low %v3029_v9, %v3045_v60  ;;  %v3054_v2 = vcombine.high %v3029_v9, %v3045_v60  ;;  %v3069_v20 = vcombine.low %v3036_v29, %v3052_v15  ;;  %v3070_v8 = vcombine.high %v3036_v29, %v3052_v15 }
 0x7ff   :  { %5736 = vmatprep.mubr.msk.bf16.mxu0 %vm6302_vm0, %v6301_v0  ;;  %v3105_v40 = vcombine.low %v7025_v56, %v7047_v61 }
 0x800   :  { %v3061_v1 = vrot.slane %v3053_v16, %v6557_v34  ;;  %v3068_v39 = vrot.slane %v3054_v2, %v6557_v34  ;;  %v3077_v36 = vrot.slane %v3069_v20, %v6557_v34  ;;  %v3084_v62 = vrot.slane %v3070_v8, %v6557_v34  ;;  %v5455_v8 = vld [vmem:[#allocation11] ss:$0 sm:$0xff] }
 0x801   :  { %v3113_v4 = vrot.slane %v3105_v40, %v6546_v25 }
 0x802   :  { %v3225_v5 = vcombine.low %v3061_v1, %v3068_v39  ;;  %v5468_v6 = vcombine.high %v3061_v1, %v3068_v39  ;;  %v3241_v7 = vcombine.low %v3077_v36, %v3084_v62  ;;  %v5469_v17 = vcombine.high %v3077_v36, %v3084_v62 }
 0x803   :  { %v3121_v55 = vcombine.low %v3097_v14, %v3113_v4  ;;  %v3122_v31 = vcombine.high %v3097_v14, %v3113_v4  ;;  %v3090_v4 = vcombine.high %v6996_v44, %v7029_v57 }
 0x804   :  { %v3232_v32 = vrot.slane %v3225_v5, %v6546_v25  ;;  %v3240_v33 = vrot.slane %v5468_v6, %v6546_v25  ;;  %v3248_v42 = vrot.slane %v3241_v7, %v6546_v25  ;;  %v3256_v23 = vrot.slane %v5469_v17, %v6546_v25 }
 0x805   :  { %v3129_v27 = vrot.slane %v3121_v55, %v6557_v34  ;;  %v3136_v3 = vrot.slane %v3122_v31, %v6557_v34  ;;  %v3106_v5 = vcombine.high %v7025_v56, %v7047_v61 }
 0x806   :  { %v3257_v26 = vcombine.low %v3232_v32, %v3240_v33  ;;  %v3273_v10 = vcombine.low %v3248_v42, %v3256_v23  ;;  %v3258_v24 = vcombine.high %v3232_v32, %v3240_v33  ;;  %v3274_v49 = vcombine.high %v3248_v42, %v3256_v23 }
 0x807   :  { %v3293_v30 = vcombine.low %v3129_v27, %v3136_v3  ;;  %v5470_v45 = vcombine.high %v3129_v27, %v3136_v3  ;;  %v3120_v6 = vrot.slane %v3106_v5, %v6546_v25 }
 0x808   :  { %v3265_v46 = vrot.slane %v3257_v26, %v6557_v34  ;;  %v3281_v37 = vrot.slane %v3273_v10, %v6557_v34  ;;  %v3272_v51 = vrot.slane %v3258_v24, %v6557_v34  ;;  %v3288_v19 = vrot.slane %v3274_v49, %v6557_v34 }
 0x809   :  { %v3300_v47 = vrot.slane %v3293_v30, %v6546_v25  ;;  %v3308_v48 = vrot.slane %v5470_v45, %v6546_v25 }
 0x80a   :  { %v3289_v21 = vcombine.low %v3265_v46, %v3281_v37  ;;  %v3290_v35 = vcombine.high %v3265_v46, %v3281_v37  ;;  %v3291_v29 = vcombine.low %v3272_v51, %v3288_v19  ;;  %v3292_v15 = vcombine.high %v3272_v51, %v3288_v19 }
 0x80b   :  { %v3309_v22 = vcombine.low %v3300_v47, %v3308_v48  ;;  %v3310_v11 = vcombine.high %v3300_v47, %v3308_v48 }
 0x80d   :  { %v3317_v63 = vrot.slane %v3309_v22, %v6557_v34  ;;  %v3324_v59 = vrot.slane %v3310_v11, %v6557_v34 }
 0x80f   :  { %v3429_v58 = vpack.c.bf16 %v3317_v63, %v3289_v21  ;;  %v3325_v9 = vcombine.high %v3317_v63, %v6301_v0  ;;  %v7073_v60 = vpack.c.bf16 %v3324_v59, %v3291_v29  ;;  %v3326_v16 = vcombine.high %v3324_v59, %v6301_v0 }
 0x811   :  { %v3893_v54 = vsel %vm1240_vm2, %v3429_v58, 0  ;;  %v3430_v18 = vpack.c.bf16 %v3325_v9, %v3290_v35  ;;  %v7078_v20 = vpack.c.bf16 %v3326_v16, %v3292_v15 }
 0x812   :  { %5735 = vmatpush3.bf16.xpose.msra.mxu0 %v3893_v54 }
 0x813   :  { %v3939_v2 = vsel %vm1240_vm2, %v3430_v18, 0  ;;  %5746 = vmatprep.subr.bf16.mxu0 %v6301_v0 }
 0x814   :  { %5741 = vmatpush3.bf16.xpose.msra.mxu1 %v3939_v2 }
 0x815   :  { %5752 = vmatprep.subr.bf16.mxu1 %v6301_v0 }
 0x8be   :  { %v2575_v14 = vpop.f32.mrf.mxu0 }
 0x8bf   :  { %v2576_v40 = vadd.f32 %v5455_v8, %v2575_v14 }
 0x8c0   :  { %v5724_v1 = vpop.f32.mrf.mxu0 }
 0x8c1   :  { %2699 = vrot.lane.b32.xlu0 %v2576_v40, %s6305_s10  ;;  %2693 = vrot.lane.b32.xlu1 %v2576_v40, %s6304_s16 }
 0x8c2   :  { %v2578_v39 = vpop.f32.mrf.mxu0 }
 0x8c3   :  { %v7090_v62 = vadd.f32 %v5455_v8, %v2578_v39 }
 0x8c4   :  { %v5725_v36 = vpop.f32.mrf.mxu0 }
 0x8c5   :  { %2998 = vrot.lane.b32.xlu0 %v6990_v41, %s6304_s16  ;;  %2705 = vrot.lane.b32.xlu1 %v2576_v40, %s6303_s0 }
 0x8c9   :  { %3016 = vrot.lane.b32.xlu0 %v6990_v41, %s6303_s0  ;;  %3007 = vrot.lane.b32.xlu1 %v6990_v41, %s6305_s10 }
 0x8cd   :  { %2701 = vrot.lane.b32.xlu0 %v7090_v62, %s6305_s10  ;;  %2695 = vrot.lane.b32.xlu1 %v7090_v62, %s6304_s16  ;;  %s7637_s10 = sld [smem:[#allocation35_spill]] }
 0x8d1   :  { %3439 = vrot.lane.b32.xlu0 %v6996_v44, %s6306_s30  ;;  %2707 = vrot.lane.b32.xlu1 %v7090_v62, %s6303_s0 }
 0x8d5   :  { %3437 = vrot.lane.b32.xlu1 %v6992_v43, %s6306_s30  ;;  %3449 = vrot.lane.b32.xlu0 %v7027_v12, %s6306_s30  ;;  %v3104_v43 = vrot.slane %v3090_v4, %v6546_v25 }
 0x8d7   :  { %v3137_v12 = vcombine.low %v3104_v43, %v3120_v6  ;;  %v3138_v7 = vcombine.high %v3104_v43, %v3120_v6 }
 0x8d9   :  { %3443 = vrot.lane.b32.xlu1 %v7023_v13, %s6306_s30  ;;  %v3145_v13 = vrot.slane %v3137_v12, %v6557_v34  ;;  %v3152_v17 = vrot.slane %v3138_v7, %v6557_v34 }
 0x8db   :  { %v3327_v42 = vcombine.low %v3145_v13, %v3152_v17  ;;  %v5471_v23 = vcombine.high %v3145_v13, %v3152_v17 }
 0x8dd   :  { %3445 = vrot.lane.b32.xlu1 %v7025_v56, %s6306_s30  ;;  %v7129_v37 = vrot.slane %v3327_v42, %v6546_v25  ;;  %v7132_v47 = vrot.slane %v5471_v23, %v6546_v25 }
 0x8e1   :  { %3451 = vrot.lane.b32.xlu1 %v7029_v57, %s6306_s30 }
 0x933   :  { %v2700_v55 = vpop.permute.xlu0 %2699  ;;  %v2694_v31 = vpop.permute.xlu1 %2693 }
 0x934   :  { %v2711_v32 = vcombine.low %v2576_v40, %v2700_v55  ;;  %v2712_v33 = vcombine.high %v2576_v40, %v2700_v55 }
 0x936   :  { %v2719_v3 = vrot.slane %v2711_v32, %v6546_v25  ;;  %v2726_v26 = vrot.slane %v2712_v33, %v6546_v25  ;;  %v3359_v32 = vcombine.low %v7129_v37, %v7132_v47 }
 0x937   :  { %v7118_v44 = vpop.permute.xlu0 %2998  ;;  %v2706_v57 = vpop.permute.xlu1 %2705 }
 0x938   :  { %v2727_v56 = vcombine.low %v2694_v31, %v2706_v57  ;;  %v2728_v27 = vcombine.high %v2694_v31, %v2706_v57  ;;  %v3985_v57 = vsel %vm1240_vm2, %v7073_v60, 0 }
 0x93a   :  { %v2735_v10 = vrot.slane %v2727_v56, %v6546_v25  ;;  %v2742_v30 = vrot.slane %v2728_v27, %v6546_v25 }
 0x93b   :  { %v7124_v45 = vpop.permute.xlu0 %3016  ;;  %v7126_v46 = vpop.permute.xlu1 %3007 }
 0x93c   :  { %v2743_v48 = vcombine.low %v2719_v3, %v2735_v10  ;;  %v2744_v21 = vcombine.high %v2719_v3, %v2735_v10  ;;  %v2759_v22 = vcombine.low %v2726_v26, %v2742_v30  ;;  %v2760_v24 = vcombine.high %v2726_v26, %v2742_v30 }
 0x93d   :  { %v3173_v49 = vcombine.low %v7118_v44, %v7124_v45  ;;  %v3174_v63 = vcombine.high %v7118_v44, %v7124_v45  ;;  %v3157_v35 = vcombine.low %v6990_v41, %v7126_v46  ;;  %v3158_v51 = vcombine.high %v6990_v41, %v7126_v46 }
 0x93e   :  { %v2751_v19 = vrot.slane %v2743_v48, %v6557_v34  ;;  %v2758_v11 = vrot.slane %v2744_v21, %v6557_v34  ;;  %v2767_v58 = vrot.slane %v2759_v22, %v6557_v34  ;;  %v2774_v9 = vrot.slane %v2760_v24, %v6557_v34 }
 0x93f   :  { %v3181_v29 = vrot.slane %v3173_v49, %v6546_v25  ;;  %v3188_v59 = vrot.slane %v3174_v63, %v6546_v25  ;;  %v3165_v54 = vrot.slane %v3157_v35, %v6546_v25  ;;  %v3172_v18 = vrot.slane %v3158_v51, %v6546_v25  ;;  %v2696_v15 = vpop.permute.xlu1 %2695  ;;  %v2702_v13 = vpop.permute.xlu0 %2701 }
 0x940   :  { %v2847_v16 = vcombine.low %v2751_v19, %v2758_v11  ;;  %v5464_v2 = vcombine.high %v2751_v19, %v2758_v11  ;;  %v2863_v8 = vcombine.low %v2767_v58, %v2774_v9  ;;  %v5465_v14 = vcombine.high %v2767_v58, %v2774_v9 }
 0x941   :  { %v3189_v40 = vcombine.low %v3165_v54, %v3181_v29  ;;  %v3190_v1 = vcombine.high %v3165_v54, %v3181_v29  ;;  %v3205_v39 = vcombine.low %v3172_v18, %v3188_v59  ;;  %v3206_v7 = vcombine.high %v3172_v18, %v3188_v59 }
 0x942   :  { %v2854_v36 = vrot.slane %v2847_v16, %v6546_v25  ;;  %v2862_v4 = vrot.slane %v5464_v2, %v6546_v25  ;;  %v2870_v5 = vrot.slane %v2863_v8, %v6546_v25  ;;  %v2878_v43 = vrot.slane %v5465_v14, %v6546_v25 }
 0x943   :  { %v3197_v6 = vrot.slane %v3189_v40, %v6557_v34  ;;  %v3204_v12 = vrot.slane %v3190_v1, %v6557_v34  ;;  %v2708_v17 = vpop.permute.xlu1 %2707  ;;  %v3213_v23 = vrot.slane %v3205_v39, %v6557_v34  ;;  %v2779_v56 = vcombine.low %v7090_v62, %v2702_v13 }
 0x944   :  { %v2879_v55 = vcombine.low %v2854_v36, %v2862_v4  ;;  %v2895_v31 = vcombine.low %v2870_v5, %v2878_v43  ;;  %v2880_v33 = vcombine.high %v2854_v36, %v2862_v4  ;;  %v2896_v42 = vcombine.high %v2870_v5, %v2878_v43 }
 0x945   :  { %v2780_v27 = vcombine.high %v7090_v62, %v2702_v13  ;;  %v2795_v3 = vcombine.low %v2696_v15, %v2708_v17  ;;  %v2796_v26 = vcombine.high %v2696_v15, %v2708_v17  ;;  %v3220_v10 = vrot.slane %v3206_v7, %v6557_v34 }
 0x946   :  { %v3343_v30 = vcombine.low %v3197_v6, %v3204_v12  ;;  %v2887_v48 = vrot.slane %v2879_v55, %v6557_v34  ;;  %v2903_v21 = vrot.slane %v2895_v31, %v6557_v34  ;;  %v2787_v22 = vrot.slane %v2779_v56, %v6546_v25 }
 0x947   :  { %v2794_v24 = vrot.slane %v2780_v27, %v6546_v25  ;;  %v2803_v49 = vrot.slane %v2795_v3, %v6546_v25  ;;  %v2810_v60 = vrot.slane %v2796_v26, %v6546_v25  ;;  %v2894_v62 = vrot.slane %v2880_v33, %v6557_v34 }
 0x948   :  { %v2911_v63 = vcombine.low %v2887_v48, %v2903_v21  ;;  %v2912_v35 = vcombine.high %v2887_v48, %v2903_v21  ;;  %v2910_v51 = vrot.slane %v2896_v42, %v6557_v34  ;;  %v5472_v29 = vcombine.high %v3197_v6, %v3204_v12 }
 0x949   :  { %v2811_v19 = vcombine.low %v2787_v22, %v2803_v49  ;;  %v2812_v11 = vcombine.high %v2787_v22, %v2803_v49  ;;  %v2827_v58 = vcombine.low %v2794_v24, %v2810_v60  ;;  %v2828_v9 = vcombine.high %v2794_v24, %v2810_v60 }
 0x94a   :  { %v3395_v59 = vcombine.low %v3213_v23, %v3220_v10  ;;  %v2983_v54 = vpack.c.bf16 %v2911_v63, %v2911_v63  ;;  %v2984_v18 = vpack.c.bf16 %v2912_v35, %v2912_v35  ;;  %v5473_v14 = vcombine.high %v3213_v23, %v3220_v10 }
 0x94b   :  { %v2819_v15 = vrot.slane %v2811_v19, %v6557_v34  ;;  %v2826_v16 = vrot.slane %v2812_v11, %v6557_v34  ;;  %v2835_v2 = vrot.slane %v2827_v58, %v6557_v34  ;;  %v2842_v8 = vrot.slane %v2828_v9, %v6557_v34 }
 0x94c   :  { %5737 = vmatmul.mubr.msk.bf16.vlgmr.msra.gmra.mxu0 %vm1240_vm2, %v2983_v54  ;;  %5743 = vmatmul.mubr.msk.bf16.vlgmr.msra.gmra.mxu1 %vm1240_vm2, %v2984_v18  ;;  %v4031_v40 = vsel %vm1240_vm2, %v7078_v20, 0  ;;  %v2913_v1 = vcombine.low %v2894_v62, %v2910_v51  ;;  %v3350_v39 = vrot.slane %v3343_v30, %v6546_v25  ;;  %v2914_v6 = vcombine.high %v2894_v62, %v2910_v51 }
 0x94d   :  { %v2915_v36 = vcombine.low %v2819_v15, %v2826_v16  ;;  %v5466_v4 = vcombine.high %v2819_v15, %v2826_v16  ;;  %v2931_v5 = vcombine.low %v2835_v2, %v2842_v8  ;;  %v5467_v43 = vcombine.high %v2835_v2, %v2842_v8  ;;  %5747 = vmatpush3.bf16.xpose.msra.mxu0 %v3985_v57 }
 0x94e   :  { %5753 = vmatpush3.bf16.xpose.msra.mxu1 %v4031_v40  ;;  %5748 = vmatprep.mubr.msk.bf16.mxu0 %vm6302_vm0, %v6301_v0  ;;  %v3358_v12 = vrot.slane %v5472_v29, %v6546_v25  ;;  %v3402_v31 = vrot.slane %v3395_v59, %v6546_v25  ;;  %v3410_v33 = vrot.slane %v5473_v14, %v6546_v25 }
 0x94f   :  { %v2922_v7 = vrot.slane %v2915_v36, %v6546_v25  ;;  %v2930_v13 = vrot.slane %v5466_v4, %v6546_v25  ;;  %v2938_v20 = vrot.slane %v2931_v5, %v6546_v25  ;;  %v2946_v17 = vrot.slane %v5467_v43, %v6546_v25  ;;  %5754 = vmatprep.mubr.msk.bf16.mxu1 %vm6302_vm0, %v6301_v0 }
 0x950   :  { %5758 = vmatprep.subr.bf16.mxu0 %v6301_v0  ;;  %5764 = vmatprep.subr.bf16.mxu1 %v6301_v0  ;;  %v3375_v55 = vcombine.low %v3350_v39, %v3358_v12  ;;  %v2985_v23 = vpack.c.bf16 %v2913_v1, %v2913_v1  ;;  %v3367_v57 = vrot.slane %v3359_v32, %v6557_v34 }
 0x951   :  { %v2947_v42 = vcombine.low %v2922_v7, %v2930_v13  ;;  %v3360_v56 = vcombine.high %v7129_v37, %v7132_v47  ;;  %v2963_v27 = vcombine.low %v2938_v20, %v2946_v17  ;;  %v3411_v26 = vcombine.low %v3402_v31, %v3410_v33 }
 0x952   :  { %v3383_v3 = vrot.slane %v3375_v55, %v6557_v34  ;;  %v3376_v10 = vcombine.high %v3350_v39, %v3358_v12  ;;  %v2986_v30 = vpack.c.bf16 %v2914_v6, %v2914_v6  ;;  %v3412_v48 = vcombine.high %v3402_v31, %v3410_v33  ;;  %v248_v6 = vld [vmem:[%s7637_s10] sm:$0xff] }
 0x953   :  { %v3419_v22 = vrot.slane %v3411_v26, %v6557_v34  ;;  %v3374_v37 = vrot.slane %v3360_v56, %v6557_v34  ;;  %v2955_v60 = vrot.slane %v2947_v42, %v6557_v34  ;;  %v2971_v63 = vrot.slane %v2963_v27, %v6557_v34 }
 0x954   :  { %5749 = vmatmul.mubr.msk.bf16.vlgmr.msra.gmra.mxu0 %vm1240_vm2, %v2985_v23  ;;  %v3391_v21 = vcombine.low %v3367_v57, %v3383_v3  ;;  %v3392_v24 = vcombine.high %v3367_v57, %v3383_v3  ;;  %v3390_v49 = vrot.slane %v3376_v10, %v6557_v34  ;;  %v3426_v35 = vrot.slane %v3412_v48, %v6557_v34 }
 0x955   :  { %5755 = vmatmul.mubr.msk.bf16.vlgmr.msra.gmra.mxu1 %vm1240_vm2, %v2986_v30  ;;  %5760 = vmatprep.mubr.msk.bf16.mxu0 %vm6302_vm0, %v6301_v0  ;;  %v3427_v32 = vcombine.high %v3419_v22, %v6301_v0  ;;  %v2948_v11 = vcombine.high %v2922_v7, %v2930_v13  ;;  %v2964_v58 = vcombine.high %v2938_v20, %v2946_v17 }
 0x956   :  { %v3433_v47 = vpack.c.bf16 %v3419_v22, %v3391_v21  ;;  %5766 = vmatprep.mubr.msk.bf16.mxu1 %vm6302_vm0, %v6301_v0  ;;  %v3393_v19 = vcombine.low %v3374_v37, %v3390_v49  ;;  %v2979_v29 = vcombine.low %v2955_v60, %v2971_v63  ;;  %v3394_v59 = vcombine.high %v3374_v37, %v3390_v49 }
 0x957   :  { %v3434_v51 = vpack.c.bf16 %v3427_v32, %v3392_v24  ;;  %v3428_v54 = vcombine.high %v3426_v35, %v6301_v0  ;;  %v2980_v18 = vcombine.high %v2955_v60, %v2971_v63  ;;  %v2962_v8 = vrot.slane %v2948_v11, %v6557_v34  ;;  %v249_v32 = vld [vmem:[%s7637_s10 + $0x8] sm:$0xff] }
 0x958   :  { %v4077_v62 = vsel %vm1240_vm2, %v3433_v47, 0  ;;  %v3435_v15 = vpack.c.bf16 %v3426_v35, %v3393_v19  ;;  %v2987_v16 = vpack.c.bf16 %v2979_v29, %v2979_v29  ;;  %v2978_v14 = vrot.slane %v2964_v58, %v6557_v34 }
 0x959   :  { %5759 = vmatpush3.bf16.xpose.msra.mxu0 %v4077_v62  ;;  %v4123_v9 = vsel %vm1240_vm2, %v3434_v51, 0  ;;  %v3436_v2 = vpack.c.bf16 %v3428_v54, %v3394_v59  ;;  %v2988_v40 = vpack.c.bf16 %v2980_v18, %v2980_v18 }
 0x95a   :  { %5770 = vmatprep.subr.bf16.mxu0 %v6301_v0  ;;  %5765 = vmatpush3.bf16.xpose.msra.mxu1 %v4123_v9  ;;  %v4169_v1 = vsel %vm1240_vm2, %v3435_v15, 0  ;;  %v2981_v36 = vcombine.low %v2962_v8, %v2978_v14  ;;  %v2982_v4 = vcombine.high %v2962_v8, %v2978_v14 }
 0x95b   :  { %5776 = vmatprep.subr.bf16.mxu1 %v6301_v0  ;;  %v4215_v39 = vsel %vm1240_vm2, %v3436_v2, 0 }
 0x95c   :  { %v2989_v5 = vpack.c.bf16 %v2981_v36, %v2981_v36  ;;  %v2990_v43 = vpack.c.bf16 %v2982_v4, %v2982_v4 }
 0x960   :  { %5761 = vmatmul.mubr.msk.bf16.vlgmr.msra.gmra.mxu0 %vm1240_vm2, %v2987_v16 }
 0x961   :  { %5771 = vmatpush3.bf16.xpose.msra.mxu0 %v4169_v1  ;;  %5772 = vmatprep.mubr.msk.bf16.mxu0 %vm6302_vm0, %v6301_v0 }
 0x962   :  { %5767 = vmatmul.mubr.msk.bf16.vlgmr.msra.gmra.mxu1 %vm1240_vm2, %v2988_v40  ;;  %5782 = vmatprep.subr.bf16.mxu0 %v6301_v0 }
 0x963   :  { %5777 = vmatpush3.bf16.xpose.msra.mxu1 %v4215_v39  ;;  %5778 = vmatprep.mubr.msk.bf16.mxu1 %vm6302_vm0, %v6301_v0 }
 0x964   :  { %5788 = vmatprep.subr.bf16.mxu1 %v6301_v0 }
 0x968   :  { %5773 = vmatmul.mubr.msk.bf16.vlgmr.msra.gmra.mxu0 %vm1240_vm2, %v2989_v5 }
 0x969   :  { %5784 = vmatprep.mubr.msk.bf16.mxu0 %vm6302_vm0, %v6301_v0 }
 0x96a   :  { %5779 = vmatmul.mubr.msk.bf16.vlgmr.msra.gmra.mxu1 %vm1240_vm2, %v2990_v43  ;;  %v3438_v43 = vpop.permute.xlu1 %3437 }
 0x96b   :  { %5790 = vmatprep.mubr.msk.bf16.mxu1 %vm6302_vm0, %v6301_v0 }
 0xa0c   :  { %v3929_v12 = vpop.f32.mrf.mxu0  ;;  %v3975_v7 = vpop.f32.mrf.mxu1 }
 0xa0d   :  { %v7237_v13 = vadd.f32 %v3929_v12, %v248_v6  ;;  %v7239_v20 = vadd.f32 %v3975_v7, %v248_v6  ;;  %v3440_v12 = vpop.permute.xlu0 %3439 }
 0xa0e   :  { %v5738_v17 = vpop.f32.mrf.mxu0  ;;  %v5744_v55 = vpop.f32.mrf.mxu1 }
 0xa0f   :  { %v4269_v31 = vsel %vm4265_vm6, %v7239_v20, -inf  ;;  %v4266_v33 = vsel %vm4265_vm6, %v7237_v13, -inf }
 0xa10   :  { %4270 = vmax.xlane.f32.xlu1 %v4269_v31  ;;  %v3978_v42 = vpop.f32.mrf.mxu1  ;;  %4267 = vmax.xlane.f32.xlu0 %v4266_v33  ;;  %v3932_v23 = vpop.f32.mrf.mxu0 }
 0xa11   :  { %v3450_v17 = vpop.permute.xlu0 %3449 }
 0xa12   :  { %v5739_v57 = vpop.f32.mrf.mxu0  ;;  %v5745_v56 = vpop.f32.mrf.mxu1 }
 0xa14   :  { %v4021_v27 = vpop.f32.mrf.mxu0 }
 0xa15   :  { %v4259_v3 = vadd.f32 %v4021_v27, %v248_v6  ;;  %v4067_v26 = vpop.f32.mrf.mxu1 }
 0xa16   :  { %v5750_v10 = vpop.f32.mrf.mxu0  ;;  %v4260_v30 = vadd.f32 %v4067_v26, %v248_v6  ;;  %v3444_v6 = vpop.permute.xlu1 %3443 }
 0xa17   :  { %v5756_v48 = vpop.f32.mrf.mxu1  ;;  %v4272_v21 = vsel %vm4265_vm6, %v4259_v3, -inf }
 0xa18   :  { %4273 = vmax.xlane.f32.xlu0 %v4272_v21  ;;  %v4024_v22 = vpop.f32.mrf.mxu0  ;;  %v4275_v47 = vsel %vm4265_vm6, %v4260_v30, -inf }
 0xa19   :  { %v4070_v24 = vpop.f32.mrf.mxu1 }
 0xa1a   :  { %v5751_v49 = vpop.f32.mrf.mxu0  ;;  %v3446_v7 = vpop.permute.xlu1 %3445 }
 0xa1b   :  { %v5757_v37 = vpop.f32.mrf.mxu1 }
 0xa1c   :  { %4276 = vmax.xlane.f32.xlu0 %v4275_v47 }
 0xa1e   :  { %v3452_v55 = vpop.permute.xlu1 %3451 }
 0xa20   :  { %v4113_v60 = vpop.f32.mrf.mxu0 }
 0xa21   :  { %v4261_v63 = vadd.f32 %v4113_v60, %v249_v32 }
 0xa22   :  { %v4159_v35 = vpop.f32.mrf.mxu1  ;;  %v5762_v62 = vpop.f32.mrf.mxu0 }
 0xa23   :  { %v4262_v51 = vadd.f32 %v4159_v35, %v249_v32  ;;  %v4278_v19 = vsel %vm4265_vm6, %v4261_v63, -inf }
 0xa24   :  { %v5768_v11 = vpop.f32.mrf.mxu1  ;;  %4279 = vmax.xlane.f32.xlu1 %v4278_v19  ;;  %v4116_v58 = vpop.f32.mrf.mxu0  ;;  %v3541_v19 = vcombine.low %v3440_v12, %v3452_v55 }
 0xa25   :  { %v4281_v9 = vsel %vm4265_vm6, %v4262_v51, -inf  ;;  %v3474_v11 = vcombine.high %v3438_v43, %v3450_v17  ;;  %v3542_v58 = vcombine.high %v3440_v12, %v3452_v55 }
 0xa26   :  { %4282 = vmax.xlane.f32.xlu0 %v4281_v9  ;;  %v4162_v29 = vpop.f32.mrf.mxu1  ;;  %v5763_v59 = vpop.f32.mrf.mxu0 }
 0xa28   :  { %v5769_v54 = vpop.f32.mrf.mxu1  ;;  %v4205_v18 = vpop.f32.mrf.mxu0 }
 0xa29   :  { %v7252_v15 = vadd.f32 %v4205_v18, %v249_v32  ;;  %v3549_v18 = vrot.slane %v3541_v19, %v6546_v25 }
 0xa2a   :  { %v4251_v16 = vpop.f32.mrf.mxu1  ;;  %v5774_v2 = vpop.f32.mrf.mxu0 }
 0xa2b   :  { %v7254_v8 = vadd.f32 %v4251_v16, %v249_v32  ;;  %v4284_v14 = vsel %vm4265_vm6, %v7252_v15, -inf }
 0xa2c   :  { %v5780_v40 = vpop.f32.mrf.mxu1  ;;  %4285 = vmax.xlane.f32.xlu1 %v4284_v14  ;;  %v4208_v1 = vpop.f32.mrf.mxu0 }
 0xa2d   :  { %v4287_v39 = vsel %vm4265_vm6, %v7254_v8, -inf  ;;  %v3488_v1 = vrot.slane %v3474_v11, %v6546_v25 }
 0xa2e   :  { %4288 = vmax.xlane.f32.xlu0 %v4287_v39  ;;  %v4254_v36 = vpop.f32.mrf.mxu1  ;;  %v5775_v4 = vpop.f32.mrf.mxu0  ;;  %v3556_v39 = vrot.slane %v3542_v58, %v6546_v25 }
 0xa30   :  { %v5781_v5 = vpop.f32.mrf.mxu1 }
 0xa3d   :  { %3457 = vrot.lane.b32.xlu1 %v7047_v61, %s6306_s30 }
 0xa41   :  { %3441 = vrot.lane.b32.xlu1 %v6990_v41, %s6306_s30 }
 0xa44   :  { %3455 = vrot.lane.b32.xlu0 %v7035_v28, %s6306_s30 }
 0xa99   :  { %v4268_v31 = vpop.xlane.xlu0 %4267  ;;  %v4271_v33 = vpop.xlane.xlu1 %4270 }
 0xa9a   :  { %v4290_v42 = vsub.f32 %v7237_v13, %v4268_v31  ;;  %v4291_v23 = vsub.f32 %v7239_v20, %v4271_v33 }
 0xa9c   :  { %v4298_v57 = vmul.f32 1.442695, %v4290_v42  ;;  %v4300_v61 = vmul.f32 1.442695, %v4291_v23 }
 0xa9e   :  { %5972 = vpow2.f32 %v4298_v57 }
 0xa9f   :  { %5974 = vpow2.f32 %v4300_v61 }
 0xaa1   :  { %v4274_v41 = vpop.xlane.xlu0 %4273 }
 0xaa2   :  { %v4292_v56 = vsub.f32 %v4259_v3, %v4274_v41 }
 0xaa4   :  { %v4302_v27 = vmul.f32 1.442695, %v4292_v56 }
 0xaa5   :  { %v4277_v28 = vpop.xlane.xlu0 %4276 }
 0xaa6   :  { %5976 = vpow2.f32 %v4302_v27  ;;  %v4293_v26 = vsub.f32 %v4260_v30, %v4277_v28 }
 0xaa8   :  { %v4304_v10 = vmul.f32 1.442695, %v4293_v26 }
 0xaaa   :  { %5978 = vpow2.f32 %v4304_v10 }
 0xaab   :  { %v7268_v48 = vpop.eup %5972 }
 0xaac   :  { %v7270_v21 = vpop.eup %5974  ;;  %v4314_v13 = vsel %vm4265_vm6, %v7268_v48, 0.0 }
 0xaad   :  { %v4280_v20 = vpop.xlane.xlu1 %4279  ;;  %4315 = vadd.xlane.f32.xlu1 %v4314_v13  ;;  %v4317_v22 = vsel %vm4265_vm6, %v7270_v21, 0.0 }
 0xaae   :  { %v4294_v24 = vsub.f32 %v4261_v63, %v4280_v20  ;;  %4318 = vadd.xlane.f32.xlu0 %v4317_v22 }
 0xaaf   :  { %v4283_v3 = vpop.xlane.xlu0 %4282 }
 0xab0   :  { %v4295_v49 = vsub.f32 %v4262_v51, %v4283_v3  ;;  %v4306_v37 = vmul.f32 1.442695, %v4294_v24  ;;  %v3473_v51 = vcombine.low %v3438_v43, %v3450_v17 }
 0xab2   :  { %v4308_v32 = vmul.f32 1.442695, %v4295_v49  ;;  %5980 = vpow2.f32 %v4306_v37  ;;  %v3481_v40 = vrot.slane %v3473_v51, %v6546_v25 }
 0xab3   :  { %v7276_v30 = vpop.eup %5976 }
 0xab4   :  { %v4320_v47 = vsel %vm4265_vm6, %v7276_v30, 0.0  ;;  %5982 = vpow2.f32 %v4308_v32 }
 0xab5   :  { %v7280_v60 = vpop.xlane.xlu1 %4285  ;;  %4321 = vadd.xlane.f32.xlu0 %v4320_v47 }
 0xab7   :  { %v7282_v35 = vpop.eup %5978  ;;  %v7284_v62 = vpop.xlane.xlu0 %4288 }
 0xab8   :  { %v4323_v63 = vsel %vm4265_vm6, %v7282_v35, 0.0 }
 0xab9   :  { %v3458_v9 = vpop.permute.xlu1 %3457  ;;  %4324 = vadd.xlane.f32.xlu1 %v4323_v63 }
 0xaba   :  { %v3557_v29 = vcombine.low %v3446_v7, %v3458_v9  ;;  %v3558_v59 = vcombine.high %v3446_v7, %v3458_v9 }
 0xabb   :  { %v3456_v54 = vpop.permute.xlu0 %3455 }
 0xabc   :  { %v3489_v16 = vcombine.low %v3444_v6, %v3456_v54  ;;  %v3490_v2 = vcombine.high %v3444_v6, %v3456_v54  ;;  %v3565_v14 = vrot.slane %v3557_v29, %v6546_v25  ;;  %v3572_v36 = vrot.slane %v3558_v59, %v6546_v25 }
 0xabe   :  { %v3497_v4 = vrot.slane %v3489_v16, %v6546_v25  ;;  %v3504_v5 = vrot.slane %v3490_v2, %v6546_v25  ;;  %v3573_v43 = vcombine.low %v3549_v18, %v3565_v14  ;;  %v3574_v12 = vcombine.high %v3549_v18, %v3565_v14 }
 0xabf   :  { %v3589_v7 = vcombine.low %v3556_v39, %v3572_v36  ;;  %v3590_v17 = vcombine.high %v3556_v39, %v3572_v36  ;;  %v7300_v41 = vpop.eup %5980 }
 0xac0   :  { %v3505_v55 = vcombine.low %v3481_v40, %v3497_v4  ;;  %v3506_v6 = vcombine.high %v3481_v40, %v3497_v4  ;;  %v3521_v31 = vcombine.low %v3488_v1, %v3504_v5  ;;  %v3522_v33 = vcombine.high %v3488_v1, %v3504_v5 }
 0xac1   :  { %v3581_v42 = vrot.slane %v3573_v43, %v6557_v34  ;;  %v3588_v23 = vrot.slane %v3574_v12, %v6557_v34  ;;  %v3597_v57 = vrot.slane %v3589_v7, %v6557_v34  ;;  %v3604_v61 = vrot.slane %v3590_v17, %v6557_v34  ;;  %v7314_v63 = vpop.eup %5982 }
 0xac2   :  { %v3513_v56 = vrot.slane %v3505_v55, %v6557_v34  ;;  %v3520_v27 = vrot.slane %v3506_v6, %v6557_v34  ;;  %v3529_v28 = vrot.slane %v3521_v31, %v6557_v34  ;;  %v3536_v26 = vrot.slane %v3522_v33, %v6557_v34 }
 0xac3   :  { %v3745_v10 = vcombine.low %v3581_v42, %v3588_v23  ;;  %v5476_v13 = vcombine.high %v3581_v42, %v3588_v23  ;;  %v3779_v20 = vcombine.low %v3597_v57, %v3604_v61  ;;  %v5477_v22 = vcombine.high %v3597_v57, %v3604_v61 }
 0xac4   :  { %v3677_v24 = vcombine.low %v3513_v56, %v3520_v27  ;;  %v5474_v3 = vcombine.high %v3513_v56, %v3520_v27  ;;  %v3693_v49 = vcombine.low %v3529_v28, %v3536_v26  ;;  %v5475_v37 = vcombine.high %v3529_v28, %v3536_v26 }
 0xac5   :  { %v7307_v47 = vrot.slane %v3779_v20, %v6546_v25  ;;  %v7310_v32 = vrot.slane %v5477_v22, %v6546_v25  ;;  %v4326_v19 = vsel %vm4265_vm6, %v7300_v41, 0.0  ;;  %v3752_v29 = vrot.slane %v3745_v10, %v6546_v25 }
 0xac6   :  { %v3684_v51 = vrot.slane %v3677_v24, %v6546_v25  ;;  %v3692_v11 = vrot.slane %v5474_v3, %v6546_v25  ;;  %v3700_v58 = vrot.slane %v3693_v49, %v6546_v25  ;;  %v3708_v9 = vrot.slane %v5475_v37, %v6546_v25  ;;  %4327 = vadd.xlane.f32.xlu0 %v4326_v19 }
 0xac7   :  { %v3760_v59 = vrot.slane %v5476_v13, %v6546_v25  ;;  %v3811_v54 = vcombine.low %v7307_v47, %v7310_v32  ;;  %v3812_v18 = vcombine.high %v7307_v47, %v7310_v32  ;;  %v4329_v40 = vsel %vm4265_vm6, %v7314_v63, 0.0 }
 0xac8   :  { %v3709_v16 = vcombine.low %v3684_v51, %v3692_v11  ;;  %v3725_v2 = vcombine.low %v3700_v58, %v3708_v9  ;;  %v3710_v14 = vcombine.high %v3684_v51, %v3692_v11  ;;  %v3726_v39 = vcombine.high %v3700_v58, %v3708_v9 }
 0xac9   :  { %v3761_v1 = vcombine.low %v3752_v29, %v3760_v59  ;;  %v3762_v36 = vcombine.high %v3752_v29, %v3760_v59  ;;  %v4297_v26 = vsub.f32 %v7254_v8, %v7284_v62  ;;  %v3442_v62 = vpop.permute.xlu1 %3441 }
 0xaca   :  { %4330 = vadd.xlane.f32.xlu0 %v4329_v40  ;;  %3453 = vrot.lane.b32.xlu1 %v7126_v46, %s6306_s30  ;;  %v3717_v4 = vrot.slane %v3709_v16, %v6557_v34  ;;  %v3733_v5 = vrot.slane %v3725_v2, %v6557_v34  ;;  %v3724_v43 = vrot.slane %v3710_v14, %v6557_v34 }
 0xacb   :  { %v3769_v12 = vrot.slane %v3761_v1, %v6557_v34  ;;  %v3740_v7 = vrot.slane %v3726_v39, %v6557_v34  ;;  %v3776_v17 = vrot.slane %v3762_v36, %v6557_v34  ;;  %v4312_v10 = vmul.f32 1.442695, %v4297_v26 }
 0xacc   :  { %v3741_v55 = vcombine.low %v3717_v4, %v3733_v5  ;;  %v3742_v6 = vcombine.high %v3717_v4, %v3733_v5 }
 0xacd   :  { %v3777_v31 = vcombine.high %v3769_v12, %v6301_v0  ;;  %v3743_v33 = vcombine.low %v3724_v43, %v3740_v7  ;;  %v3744_v42 = vcombine.high %v3724_v43, %v3740_v7  ;;  %v3778_v46 = vcombine.high %v3776_v17, %v6301_v0 }
 0xace   :  { %v3881_v23 = vpack.c.bf16 %v3769_v12, %v3741_v55  ;;  %3459 = vrot.lane.b32.xlu1 %v7124_v45, %s6306_s30  ;;  %5984 = vpow2.f32 %v4312_v10  ;;  %v4296_v45 = vsub.f32 %v7252_v15, %v7280_v60 }
 0xacf   :  { %v3882_v57 = vpack.c.bf16 %v3777_v31, %v3742_v6  ;;  %v3883_v61 = vpack.c.bf16 %v3776_v17, %v3743_v33  ;;  %v3884_v56 = vpack.c.bf16 %v3778_v46, %v3744_v42 }
 0xad0   :  { %v4375_v27 = vsel %vm4373_vm7, %v3881_v23, 0  ;;  %v4310_v13 = vmul.f32 1.442695, %v4296_v45 }
 0xad1   :  { %5783 = vmatpush3.bf16.msra.mxu0 %v4375_v27  ;;  %v4421_v28 = vsel %vm4373_vm7, %v3882_v57, 0  ;;  %v4467_v9 = vsel %vm4373_vm7, %v3883_v61, 0  ;;  %v4513_v29 = vsel %vm4373_vm7, %v3884_v56, 0 }
 0xad2   :  { %5789 = vmatpush3.bf16.msra.mxu1 %v4421_v28  ;;  %5794 = vmatprep.subr.bf16.mxu0 %v6301_v0  ;;  %5986 = vpow2.f32 %v4310_v13 }
 0xad3   :  { %5800 = vmatprep.subr.bf16.mxu1 %v6301_v0 }
 0xadb   :  { %v7350_v20 = vpop.eup %5984 }
 0xadc   :  { %v4335_v22 = vsel %vm4265_vm6, %v7350_v20, 0.0 }
 0xadf   :  { %v7354_v24 = vpop.eup %5986 }
 0xae0   :  { %3447 = vrot.lane.b32.xlu0 %v7118_v44, %s6306_s30  ;;  %v4332_v8 = vsel %vm4265_vm6, %v7354_v24, 0.0 }
 0xaf2   :  { %4336 = vadd.xlane.f32.xlu1 %v4335_v22 }
 0xaff   :  { %4333 = vadd.xlane.f32.xlu0 %v4332_v8 }
 0xb36   :  { %v4316_v44 = vpop.xlane.xlu1 %4315 }
 0xb37   :  { %v4319_v3 = vpop.xlane.xlu0 %4318  ;;  %5988 = vrcp.f32 %v4316_v44 }
 0xb38   :  { %5990 = vrcp.f32 %v4319_v3 }
 0xb3e   :  { %v4322_v15 = vpop.xlane.xlu0 %4321 }
 0xb3f   :  { %5992 = vrcp.f32 %v4322_v15 }
 0xb42   :  { %v4325_v60 = vpop.xlane.xlu1 %4324 }
 0xb43   :  { %5994 = vrcp.f32 %v4325_v60 }
 0xb44   :  { %v5989_v49 = vpop.eup %5988 }
 0xb45   :  { %v5991_v37 = vpop.eup %5990  ;;  %v4339_v19 = vmul.f32 %v5989_v49, %v7268_v48 }
 0xb46   :  { %v4341_v51 = vmul.f32 %v5991_v37, %v7270_v21  ;;  %v3454_v14 = vpop.permute.xlu1 %3453  ;;  %v3819_v37 = vrot.slane %v3811_v54, %v6557_v34 }
 0xb47   :  { %4354 = vst.msk [vmem:[#allocation22] sm:$0xff] %vm4265_vm6, %v4339_v19  ;;  %v4362_v11 = vpack.c.bf16 %v4339_v19, %v4339_v19  ;;  %v3609_v39 = vcombine.low %v3442_v62, %v3454_v14  ;;  %v3610_v36 = vcombine.high %v3442_v62, %v3454_v14  ;;  %v3826_v19 = vrot.slane %v3812_v18, %v6557_v34 }
 0xb48   :  { %4355 = vst.msk [vmem:[#allocation22 + $0x8] sm:$0xff] %vm4265_vm6, %v4341_v51  ;;  %v4363_v58 = vpack.c.bf16 %v4341_v51, %v4341_v51 }
 0xb49   :  { %5785 = vmatmul.mubr.msk.bf16.vlgmr.msra.gmra.mxu0 %vm4265_vm6, %v4362_v11  ;;  %v3624_v7 = vrot.slane %v3610_v36, %v6546_v25 }
 0xb4a   :  { %5791 = vmatmul.mubr.msk.bf16.vlgmr.msra.gmra.mxu1 %vm4265_vm6, %v4363_v58  ;;  %5795 = vmatpush3.bf16.msra.mxu0 %v4467_v9  ;;  %v3460_v4 = vpop.permute.xlu1 %3459 }
 0xb4b   :  { %5801 = vmatpush3.bf16.msra.mxu1 %v4513_v29  ;;  %5796 = vmatprep.mubr.msk.bf16.mxu0 %vm6302_vm0, %v6301_v0 }
 0xb4c   :  { %v5993_v48 = vpop.eup %5992  ;;  %5802 = vmatprep.mubr.msk.bf16.mxu1 %vm6302_vm0, %v6301_v0  ;;  %5806 = vmatprep.subr.bf16.mxu0 %v6301_v0 }
 0xb4d   :  { %v4343_v21 = vmul.f32 %v5993_v48, %v7276_v30  ;;  %5812 = vmatprep.subr.bf16.mxu1 %v6301_v0 }
 0xb4f   :  { %v4328_v59 = vpop.xlane.xlu0 %4327  ;;  %4356 = vst.msk [vmem:[#allocation22 + $0x10] sm:$0xff] %vm4265_vm6, %v4343_v21  ;;  %v4364_v16 = vpack.c.bf16 %v4343_v21, %v4343_v21 }
 0xb50   :  { %v5995_v2 = vpop.eup %5994  ;;  %5996 = vrcp.f32 %v4328_v59 }
 0xb51   :  { %5797 = vmatmul.mubr.msk.bf16.vlgmr.msra.gmra.mxu0 %vm4265_vm6, %v4364_v16  ;;  %v4345_v40 = vmul.f32 %v5995_v2, %v7282_v35  ;;  %v3617_v35 = vrot.slane %v3609_v39, %v6546_v25 }
 0xb52   :  { %5808 = vmatprep.mubr.msk.bf16.mxu0 %vm6302_vm0, %v6301_v0 }
 0xb53   :  { %v4331_v1 = vpop.xlane.xlu0 %4330  ;;  %4357 = vst.msk [vmem:[#allocation22 + $0x18] sm:$0xff] %vm4265_vm6, %v4345_v40  ;;  %v4365_v30 = vpack.c.bf16 %v4345_v40, %v4345_v40 }
 0xb54   :  { %5998 = vrcp.f32 %v4331_v1 }
 0xb55   :  { %5803 = vmatmul.mubr.msk.bf16.vlgmr.msra.gmra.mxu1 %vm4265_vm6, %v4365_v30 }
 0xb56   :  { %5814 = vmatprep.mubr.msk.bf16.mxu1 %vm6302_vm0, %v6301_v0 }
 0xb57   :  { %v3448_v5 = vpop.permute.xlu0 %3447 }
 0xb58   :  { %v3625_v43 = vcombine.low %v3448_v5, %v3460_v4  ;;  %v3626_v12 = vcombine.high %v3448_v5, %v3460_v4 }
 0xb5a   :  { %v3633_v17 = vrot.slane %v3625_v43, %v6546_v25  ;;  %v3640_v55 = vrot.slane %v3626_v12, %v6546_v25 }
 0xb5c   :  { %v3641_v6 = vcombine.low %v3617_v35, %v3633_v17  ;;  %v3642_v31 = vcombine.high %v3617_v35, %v3633_v17  ;;  %v3657_v33 = vcombine.low %v3624_v7, %v3640_v55  ;;  %v3658_v42 = vcombine.high %v3624_v7, %v3640_v55 }
 0xb5d   :  { %v5997_v46 = vpop.eup %5996 }
 0xb5e   :  { %v3649_v23 = vrot.slane %v3641_v6, %v6557_v34  ;;  %v3656_v57 = vrot.slane %v3642_v31, %v6557_v34  ;;  %v3665_v61 = vrot.slane %v3657_v33, %v6557_v34  ;;  %v3672_v56 = vrot.slane %v3658_v42, %v6557_v34 }
 0xb5f   :  { %v4347_v27 = vmul.f32 %v5997_v46, %v7300_v41 }
 0xb60   :  { %v3795_v28 = vcombine.low %v3649_v23, %v3656_v57  ;;  %v5478_v26 = vcombine.high %v3649_v23, %v3656_v57  ;;  %v3847_v10 = vcombine.low %v3665_v61, %v3672_v56  ;;  %v5479_v45 = vcombine.high %v3665_v61, %v3672_v56 }
 0xb61   :  { %v5999_v13 = vpop.eup %5998  ;;  %4358 = vst.msk [vmem:[#allocation22 + $0x20] sm:$0xff] %vm4265_vm6, %v4347_v27  ;;  %v4366_v40 = vpack.c.bf16 %v4347_v27, %v4347_v27 }
 0xb62   :  { %v3802_v22 = vrot.slane %v3795_v28, %v6546_v25  ;;  %v3810_v8 = vrot.slane %v5478_v26, %v6546_v25  ;;  %v3854_v62 = vrot.slane %v3847_v10, %v6546_v25  ;;  %v3862_v44 = vrot.slane %v5479_v45, %v6546_v25 }
 0xb63   :  { %v4349_v3 = vmul.f32 %v5999_v13, %v7314_v63 }
 0xb64   :  { %v3827_v15 = vcombine.low %v3802_v22, %v3810_v8  ;;  %v3863_v60 = vcombine.low %v3854_v62, %v3862_v44  ;;  %v3828_v41 = vcombine.high %v3802_v22, %v3810_v8  ;;  %v3864_v49 = vcombine.high %v3854_v62, %v3862_v44 }
 0xb65   :  { %4359 = vst.msk [vmem:[#allocation22 + $0x28] sm:$0xff] %vm4265_vm6, %v4349_v3  ;;  %v4367_v1 = vpack.c.bf16 %v4349_v3, %v4349_v3 }
 0xb66   :  { %v3835_v51 = vrot.slane %v3827_v15, %v6557_v34  ;;  %v3871_v63 = vrot.slane %v3863_v60, %v6557_v34  ;;  %v3842_v11 = vrot.slane %v3828_v41, %v6557_v34  ;;  %v3878_v58 = vrot.slane %v3864_v49, %v6557_v34 }
 0xb68   :  { %v3843_v9 = vcombine.low %v3819_v37, %v3835_v51  ;;  %v3844_v29 = vcombine.high %v3819_v37, %v3835_v51  ;;  %v3879_v48 = vcombine.high %v3871_v63, %v6301_v0  ;;  %v3845_v54 = vcombine.low %v3826_v19, %v3842_v11 }
 0xb69   :  { %v3846_v21 = vcombine.high %v3826_v19, %v3842_v11  ;;  %v3880_v59 = vcombine.high %v3878_v58, %v6301_v0 }
 0xb6a   :  { %v3885_v16 = vpack.c.bf16 %v3871_v63, %v3843_v9  ;;  %v3886_v2 = vpack.c.bf16 %v3879_v48, %v3844_v29  ;;  %v3887_v18 = vpack.c.bf16 %v3878_v58, %v3845_v54 }
 0xb6b   :  { %v3888_v14 = vpack.c.bf16 %v3880_v59, %v3846_v21 }
 0xb6c   :  { %v4559_v47 = vsel %vm4373_vm7, %v3885_v16, 0  ;;  %v4605_v32 = vsel %vm4373_vm7, %v3886_v2, 0  ;;  %v4651_v30 = vsel %vm4373_vm7, %v3887_v18, 0 }
 0xb6d   :  { %5807 = vmatpush3.bf16.msra.mxu0 %v4559_v47  ;;  %5813 = vmatpush3.bf16.msra.mxu1 %v4605_v32  ;;  %v4697_v39 = vsel %vm4373_vm7, %v3888_v14, 0 }
 0xb6e   :  { %5818 = vmatprep.subr.bf16.mxu0 %v6301_v0  ;;  %5824 = vmatprep.subr.bf16.mxu1 %v6301_v0 }
 0xb70   :  { %5809 = vmatmul.mubr.msk.bf16.vlgmr.msra.gmra.mxu0 %vm4265_vm6, %v4366_v40  ;;  %5815 = vmatmul.mubr.msk.bf16.vlgmr.msra.gmra.mxu1 %vm4265_vm6, %v4367_v1 }
 0xb71   :  { %5819 = vmatpush3.bf16.msra.mxu0 %v4651_v30  ;;  %5825 = vmatpush3.bf16.msra.mxu1 %v4697_v39 }
 0xb72   :  { %5826 = vmatprep.mubr.msk.bf16.mxu1 %vm6302_vm0, %v6301_v0  ;;  %5820 = vmatprep.mubr.msk.bf16.mxu0 %vm6302_vm0, %v6301_v0 }
 0xb73   :  { %5830 = vmatprep.subr.bf16.mxu0 %v6301_v0  ;;  %5838 = vmatprep.subr.bf16.mxu1 %v6301_v0 }
 0xb7b   :  { %v4337_v36 = vpop.xlane.xlu1 %4336 }
 0xb7c   :  { %6000 = vrcp.f32 %v4337_v36 }
 0xb88   :  { %v4334_v4 = vpop.xlane.xlu0 %4333 }
 0xb89   :  { %v6001_v5 = vpop.eup %6000  ;;  %6002 = vrcp.f32 %v4334_v4 }
 0xb8a   :  { %v4353_v43 = vmul.f32 %v6001_v5, %v7350_v20 }
 0xb8c   :  { %4361 = vst.msk [vmem:[#allocation22 + $0x38] sm:$0xff] %vm4265_vm6, %v4353_v43  ;;  %v4369_v12 = vpack.c.bf16 %v4353_v43, %v4353_v43 }
 0xb8e   :  { %5827 = vmatmul.mubr.msk.bf16.vlgmr.msra.gmra.mxu1 %vm4265_vm6, %v4369_v12 }
 0xb8f   :  { %5842 = vmatprep.mubr.msk.bf16.mxu1 %vm6302_vm0, %v6301_v0 }
 0xb96   :  { %v6003_v35 = vpop.eup %6002 }
 0xb97   :  { %v4351_v7 = vmul.f32 %v6003_v35, %v7354_v24 }
 0xb99   :  { %4360 = vst.msk [vmem:[#allocation22 + $0x30] sm:$0xff] %vm4265_vm6, %v4351_v7  ;;  %v4368_v17 = vpack.c.bf16 %v4351_v7, %v4351_v7 }
 0xb9b   :  { %5821 = vmatmul.mubr.msk.bf16.vlgmr.msra.gmra.mxu0 %vm4265_vm6, %v4368_v17 }
 0xb9c   :  { %5834 = vmatprep.mubr.msk.bf16.mxu0 %vm6302_vm0, %v6301_v0 }
 0xc09   :  { %v4411_v20 = vpop.f32.mrf.mxu0 }
 0xc0a   :  { %v4457_v55 = vpop.f32.mrf.mxu1 }
 0xc0b   :  { %v5786_v6 = vpop.f32.mrf.mxu0 }
 0xc0c   :  { %v5792_v31 = vpop.f32.mrf.mxu1 }
 0xc0d   :  { %v4414_v33 = vpop.f32.mrf.mxu0 }
 0xc0e   :  { %v4460_v42 = vpop.f32.mrf.mxu1 }
 0xc0f   :  { %v5787_v46 = vpop.f32.mrf.mxu0 }
 0xc10   :  { %v5793_v23 = vpop.f32.mrf.mxu1 }
 0xc11   :  { %v4503_v57 = vpop.f32.mrf.mxu0 }
 0xc12   :  { %v4739_v61 = vcombine.low %v4411_v20, %v4503_v57  ;;  %v4740_v56 = vcombine.high %v4411_v20, %v4503_v57 }
 0xc13   :  { %v5798_v24 = vpop.f32.mrf.mxu0 }
 0xc14   :  { %v4747_v22 = vrot.slane %v4739_v61, %v6546_v25  ;;  %v4754_v8 = vrot.slane %v4740_v56, %v6546_v25 }
 0xc15   :  { %v4506_v27 = vpop.f32.mrf.mxu0  ;;  %v4549_v28 = vpop.f32.mrf.mxu1 }
 0xc16   :  { %v4755_v26 = vcombine.low %v4457_v55, %v4549_v28  ;;  %v4756_v10 = vcombine.high %v4457_v55, %v4549_v28 }
 0xc17   :  { %v5799_v45 = vpop.f32.mrf.mxu0  ;;  %v5804_v13 = vpop.f32.mrf.mxu1 }
 0xc18   :  { %v4763_v62 = vrot.slane %v4755_v26, %v6546_v25  ;;  %v4770_v44 = vrot.slane %v4756_v10, %v6546_v25 }
 0xc19   :  { %v4552_v3 = vpop.f32.mrf.mxu1 }
 0xc1a   :  { %v4771_v15 = vcombine.low %v4747_v22, %v4763_v62  ;;  %v4772_v60 = vcombine.high %v4747_v22, %v4763_v62  ;;  %v4787_v41 = vcombine.low %v4754_v8, %v4770_v44  ;;  %v4788_v49 = vcombine.high %v4754_v8, %v4770_v44 }
 0xc1b   :  { %v5805_v37 = vpop.f32.mrf.mxu1 }
 0xc1c   :  { %v4779_v19 = vrot.slane %v4771_v15, %v6557_v34  ;;  %v4786_v51 = vrot.slane %v4772_v60, %v6557_v34  ;;  %v4795_v63 = vrot.slane %v4787_v41, %v6557_v34  ;;  %v4802_v11 = vrot.slane %v4788_v49, %v6557_v34 }
 0xc1e   :  { %v4875_v58 = vcombine.low %v4779_v19, %v4786_v51  ;;  %v5496_v9 = vcombine.high %v4779_v19, %v4786_v51  ;;  %v4891_v29 = vcombine.low %v4795_v63, %v4802_v11  ;;  %v5497_v48 = vcombine.high %v4795_v63, %v4802_v11  ;;  %v5927_v11 = vld [vmem:[%s7594_s15 + $0x8] sm:$0xff]  }
 0xc1f   :  { %5831 = vmatpush3.bf16.msra.mxu0 %v5927_v11 }
 0xc20   :  { %v4882_v54 = vrot.slane %v4875_v58, %v6546_v25  ;;  %v4890_v21 = vrot.slane %v5496_v9, %v6546_v25  ;;  %v4898_v59 = vrot.slane %v4891_v29, %v6546_v25  ;;  %v4906_v16 = vrot.slane %v5497_v48, %v6546_v25  ;;  %5832 = vmatprep.subr.bf16.mxu0 %v6301_v0 }
 0xc22   :  { %v4908_v2 = vcombine.high %v4882_v54, %v4890_v21  ;;  %v4924_v47 = vcombine.high %v4898_v59, %v4906_v16  ;;  %v4907_v32 = vcombine.low %v4882_v54, %v4890_v21  ;;  %v4923_v18 = vcombine.low %v4898_v59, %v4906_v16 }
 0xc24   :  { %v7449_v14 = vrot.slane %v4908_v2, %v6557_v34  ;;  %v7452_v40 = vrot.slane %v4924_v47, %v6557_v34  ;;  %v7455_v1 = vrot.slane %v4907_v32, %v6557_v34  ;;  %v7458_v30 = vrot.slane %v4923_v18, %v6557_v34 }
 0xc26   :  { %v4941_v39 = vcombine.low %v7449_v14, %v7452_v40  ;;  %v4939_v36 = vcombine.low %v7455_v1, %v7458_v30  ;;  %v4940_v4 = vcombine.high %v7455_v1, %v7458_v30  ;;  %v4942_v5 = vcombine.high %v7449_v14, %v7452_v40  ;;  %v5500_v1 = vld [vmem:[#allocation14] ss:$0 sm:$0xff] }
 0xc30   :  { %v4595_v43 = vpop.f32.mrf.mxu0  ;;  %v4641_v12 = vpop.f32.mrf.mxu1 }
 0xc32   :  { %v5810_v35 = vpop.f32.mrf.mxu0  ;;  %v5816_v7 = vpop.f32.mrf.mxu1 }
 0xc34   :  { %v4598_v17 = vpop.f32.mrf.mxu0  ;;  %v4644_v20 = vpop.f32.mrf.mxu1 }
 0xc36   :  { %v5811_v55 = vpop.f32.mrf.mxu0  ;;  %v5817_v6 = vpop.f32.mrf.mxu1 }
 0xc4e   :  { %v4733_v31 = vpop.f32.mrf.mxu1 }
 0xc4f   :  { %v4823_v23 = vcombine.low %v4641_v12, %v4733_v31  ;;  %v4824_v57 = vcombine.high %v4641_v12, %v4733_v31 }
 0xc50   :  { %v5828_v33 = vpop.f32.mrf.mxu1 }
 0xc51   :  { %v4831_v28 = vrot.slane %v4823_v23, %v6546_v25  ;;  %v4838_v26 = vrot.slane %v4824_v57, %v6546_v25 }
 0xc52   :  { %v4736_v42 = vpop.f32.mrf.mxu1 }
 0xc54   :  { %v5829_v46 = vpop.f32.mrf.mxu1 }
 0xc5b   :  { %v4687_v61 = vpop.f32.mrf.mxu0 }
 0xc5c   :  { %v4807_v56 = vcombine.low %v4595_v43, %v4687_v61  ;;  %v4808_v24 = vcombine.high %v4595_v43, %v4687_v61  ;;  %v5928_v43 = vld [vmem:[%s7594_s15] sm:$0xff]  }
 0xc5d   :  { %v5822_v27 = vpop.f32.mrf.mxu0  ;;  %5833 = vmatpush3.bf16.msra.mxu0 %v5928_v43 }
 0xc5e   :  { %v4815_v10 = vrot.slane %v4807_v56, %v6546_v25  ;;  %v4822_v45 = vrot.slane %v4808_v24, %v6546_v25  ;;  %5846 = vmatprep.subr.bf16.mxu0 %v6301_v0 }
 0xc5f   :  { %v4690_v13 = vpop.f32.mrf.mxu0 }
 0xc60   :  { %v4839_v22 = vcombine.low %v4815_v10, %v4831_v28  ;;  %v4840_v8 = vcombine.high %v4815_v10, %v4831_v28  ;;  %v4855_v62 = vcombine.low %v4822_v45, %v4838_v26  ;;  %v4856_v44 = vcombine.high %v4822_v45, %v4838_v26 }
 0xc61   :  { %v5823_v3 = vpop.f32.mrf.mxu0 }
 0xc62   :  { %v4847_v15 = vrot.slane %v4839_v22, %v6557_v34  ;;  %v4854_v60 = vrot.slane %v4840_v8, %v6557_v34  ;;  %v4863_v41 = vrot.slane %v4855_v62, %v6557_v34  ;;  %v4870_v49 = vrot.slane %v4856_v44, %v6557_v34 }
 0xc64   :  { %v4943_v37 = vcombine.low %v4847_v15, %v4854_v60  ;;  %v5498_v19 = vcombine.high %v4847_v15, %v4854_v60  ;;  %v4959_v51 = vcombine.low %v4863_v41, %v4870_v49  ;;  %v5499_v63 = vcombine.high %v4863_v41, %v4870_v49 }
 0xc66   :  { %v4950_v58 = vrot.slane %v4943_v37, %v6546_v25  ;;  %v4958_v9 = vrot.slane %v5498_v19, %v6546_v25  ;;  %v4966_v29 = vrot.slane %v4959_v51, %v6546_v25  ;;  %v4974_v48 = vrot.slane %v5499_v63, %v6546_v25  ;;  %v5930_v51 = vld [vmem:[%s7598_s19] sm:$0xff]   ;;  %v5931_v63 = vld [vmem:[%s7600_s21 + $0x18] sm:$0xff]  }
 0xc68   :  { %v4976_v54 = vcombine.high %v4950_v58, %v4958_v9  ;;  %v4992_v21 = vcombine.high %v4966_v29, %v4974_v48  ;;  %v4975_v59 = vcombine.low %v4950_v58, %v4958_v9  ;;  %v4991_v16 = vcombine.low %v4966_v29, %v4974_v48 }
 0xc6a   :  { %v4990_v2 = vrot.slane %v4976_v54, %v6557_v34  ;;  %v5006_v47 = vrot.slane %v4992_v21, %v6557_v34  ;;  %v4983_v32 = vrot.slane %v4975_v59, %v6557_v34  ;;  %v4999_v18 = vrot.slane %v4991_v16, %v6557_v34  ;;  %v5504_v59 = vld [vmem:[#allocation16] ss:$0 sm:$0xff] }
 0xc6c   :  { %v5009_v25 = vcombine.low %v4990_v2, %v5006_v47  ;;  %v5008_v12 = vcombine.high %v4983_v32, %v4999_v18  ;;  %v5007_v35 = vcombine.low %v4983_v32, %v4999_v18  ;;  %v5010_v20 = vcombine.high %v4990_v2, %v5006_v47  ;;  %v5505_v32 = vld [vmem:[#allocation17] ss:$0 sm:$0xff] }
 0xc6e   :  { %v5908_v7 = vpack.i.bf16 %v5009_v25, %v4941_v39  ;;  %v5903_v17 = vpack.i.bf16 %v5008_v12, %v4940_v4  ;;  %v5913_v34 = vpack.i.bf16 %v5010_v20, %v4942_v5  ;;  %v5932_v20 = vld [vmem:[%s7600_s21 + $0x10] sm:$0xff]  }
 0xc70   :  { %5909 = vrot.lane.b32.xlu1 %v5908_v7, %s6309_s8  ;;  %5904 = vrot.lane.b32.xlu0 %v5903_v17, %s6310_s17 }
 0xc74   :  { %5914 = vrot.lane.b32.xlu0 %v5913_v34, %s6311_s18  ;;  %v5933_v34 = vld [vmem:[%s7600_s21 + $0x8] sm:$0xff]  }
 0xce2   :  { %v5910_v55 = vpop.permute.xlu1 %5909  ;;  %v5905_v6 = vpop.permute.xlu0 %5904 }
 0xce3   :  { %v5907_v31 = vunpack.i.h.bf16 %v5905_v6  ;;  %v5906_v33 = vunpack.i.l.bf16 %v5905_v6  ;;  %v5912_v42 = vunpack.i.h.bf16 %v5910_v55  ;;  %v5911_v46 = vunpack.i.l.bf16 %v5910_v55  ;;  %v5934_v55 = vld [vmem:[%s7600_s21] sm:$0xff]  }
 0xce4   :  { %v5506_v6 = vld [vmem:[%s7599_s20] ss:$0 sm:$0xff]  ;;  %s6313_s20 = smov [#allocation20]  }
 0xce5   :  { %v5035_v39 = vsel %vm1240_vm2, %v4939_v36, %v5906_v33  ;;  %v5036_v4 = vsel %vm1240_vm2, %v5007_v35, %v5907_v31  ;;  %s5372_s21 = sshll.u32 %s6313_s20, 4  ;;  %s5373_s21 = int_to_ptr.vmem [resolvable:$true] %s5372_s21 }
 0xce6   :  { %v5915_v23 = vpop.permute.xlu0 %5914  ;;  %v5037_v14 = vsel %vm2388_vm4, %v5035_v39, %v5911_v46  ;;  %v5038_v40 = vsel %vm2388_vm4, %v5036_v4, %v5912_v42  ;;  %p6218_p9 = scmp.lt.s32.totalorder %s5373_s21, %s5373_s21 }
 0xce7   :  { %v5917_v57 = vunpack.i.h.bf16 %v5915_v23  ;;  %v5916_v61 = vunpack.i.l.bf16 %v5915_v23 }
 0xce9   :  { %v5039_v5 = vsel %vm2391_vm5, %v5037_v14, %v5916_v61  ;;  %v5040_v56 = vsel %vm2391_vm5, %v5038_v40, %v5917_v57 }
 0xcea   :  { %v5041_v24 = vpack.c.bf16 %v5040_v56, %v5039_v5 }
 0xcec   :  { %5835 = vmatmul.mubr.msk.bf16.vlgmr.msra.gmra.mxu0 %vm280_vm1, %v5041_v24 }
 0xced   :  { %5854 = vmatprep.mubr.msk.bf16.mxu0 %vm6302_vm0, %v6301_v0  ;;  %5847 = vmatpush3.bf16.msra.mxu0 %v5931_v63 }
 0xcee   :  { %5848 = vmatprep.subr.bf16.mxu0 %v6301_v0 }
 0xcf1   :  { %5849 = vmatpush3.bf16.msra.mxu0 %v5932_v20 }
 0xcf2   :  { %5850 = vmatprep.subr.bf16.mxu0 %v6301_v0 }
 0xcf5   :  { %5851 = vmatpush3.bf16.msra.mxu0 %v5933_v34 }
 0xcf6   :  { %5852 = vmatprep.subr.bf16.mxu0 %v6301_v0 }
 0xcf9   :  { %5853 = vmatpush3.bf16.msra.mxu0 %v5934_v55 }
 0xdac   :  { %v5097_v30 = vpop.f32.mrf.mxu0 }
 0xdad   :  { %v5098_v36 = vadd.f32 %v5500_v1, %v5097_v30 }
 0xdae   :  { %v5836_v27 = vpop.f32.mrf.mxu0 }
 0xdaf   :  { %v5104_v28 = vadd.f32 %v5098_v36, %v7013_v52 }
 0xdb0   :  { %v5100_v26 = vpop.f32.mrf.mxu0 }
 0xdb1   :  { %v5101_v10 = vadd.f32 %v5500_v1, %v5100_v26  ;;  %v5106_v45 = vsel %vm280_vm1, %v5104_v28, 0.0 }
 0xdb2   :  { %5107 = vadd.xlane.f32.xlu1 %v5106_v45  ;;  %v5837_v13 = vpop.f32.mrf.mxu0 }
 0xdb3   :  { %v5105_v22 = vadd.f32 %v5101_v10, %v7016_v53  ;;  %v5929_v53 = vld [vmem:[%s7598_s19 + $0x8] sm:$0xff]  }
 0xdb4   :  { %5839 = vmatpush3.bf16.msra.mxu1 %v5929_v53 }
 0xdb5   :  { %v5109_v8 = vsel %vm280_vm1, %v5105_v22, 0.0  ;;  %5840 = vmatprep.subr.bf16.mxu1 %v6301_v0  ;;  %v5510_v0 = vld [vmem:[%s7601_s22] ss:$0 sm:$0xff]  ;;  %s6213_s22 = scalar_lea.vmem %s5373_s21, 1024 }
 0xdb6   :  { %5110 = vadd.xlane.f32.xlu0 %v5109_v8  ;;  %p6214_p8 = scmp.ne.s32.totalorder %s5373_s21, %s6213_s22  ;;  %p6219_p10 = scmp.lt.s32.totalorder %s6213_s22, %s6213_s22 }
 0xdb8   :  { %5841 = vmatpush3.bf16.msra.mxu1 %v5930_v51  ;;  %p6220_p11 = por %p6219_p10, %p6218_p9 }
 0xdba   :  { %p6221_p12 = pnand %p6220_p11, %p6214_p8 }
 0xe3b   :  { %v5108_v62 = vpop.xlane.xlu1 %5107 }
 0xe3c   :  { %v5112_v44 = vmul.f32 0.03125, %v5108_v62 }
 0xe3e   :  { %v5114_v3 = vsub.f32 %v5104_v28, %v5112_v44 }
 0xe3f   :  { %v5111_v15 = vpop.xlane.xlu0 %5110 }
 0xe40   :  { %v5113_v60 = vmul.f32 0.03125, %v5111_v15  ;;  %v5116_v41 = vmul.f32 %v5114_v3, %v5114_v3 }
 0xe42   :  { %v5115_v49 = vsub.f32 %v5105_v22, %v5113_v60  ;;  %v5118_v52 = vsel %vm280_vm1, %v5116_v41, 0.0 }
 0xe43   :  { %5119 = vadd.xlane.f32.xlu0 %v5118_v52 }
 0xe44   :  { %v5117_v37 = vmul.f32 %v5115_v49, %v5115_v49 }
 0xe46   :  { %v5121_v19 = vsel %vm280_vm1, %v5117_v37, 0.0 }
 0xe47   :  { %5122 = vadd.xlane.f32.xlu1 %v5121_v19 }
 0xecc   :  { %v5120_v11 = vpop.xlane.xlu0 %5119 }
 0xecd   :  { %v5124_v58 = vmul.f32 0.03125, %v5120_v11 }
 0xecf   :  { %v5126_v9 = vadd.f32 1e-05, %v5124_v58 }
 0xed0   :  { %v5123_v29 = vpop.xlane.xlu1 %5122 }
 0xed1   :  { %6004 = vrsqrt.f32 %v5126_v9  ;;  %v5125_v48 = vmul.f32 0.03125, %v5123_v29 }
 0xed3   :  { %v5127_v54 = vadd.f32 1e-05, %v5125_v48 }
 0xed5   :  { %6006 = vrsqrt.f32 %v5127_v54 }
 0xede   :  { %v6005_v21 = vpop.eup %6004 }
 0xedf   :  { %v5130_v16 = vmul.f32 %v6005_v21, %v5114_v3 }
 0xee1   :  { %v5138_v2 = vmul.f32 %v5504_v59, %v5130_v16 }
 0xee2   :  { %v6007_v47 = vpop.eup %6006 }
 0xee3   :  { %v5131_v18 = vmul.f32 %v6007_v47, %v5115_v49  ;;  %v5146_v25 = vadd.f32 %v5505_v32, %v5138_v2 }
 0xee5   :  { %v5139_v43 = vmul.f32 %v5504_v59, %v5131_v18  ;;  %v5148_v35 = vmul.f32 %v5146_v25, %v7008_v38 }
 0xee7   :  { %v5147_v12 = vadd.f32 %v5505_v32, %v5139_v43 }
 0xee9   :  { %v5149_v7 = vmul.f32 %v5147_v12, %v7010_v50 }
 0xeeb   :  { %v5150_v17 = vpack.c.bf16 %v5149_v7, %v5148_v35 }
 0xeed   :  { %5843 = vmatmul.mubr.msk.bf16.vlgmr.msra.gmra.mxu1 %vm280_vm1, %v5150_v17 }
 0xfad   :  { %v5211_v31 = vpop.f32.mrf.mxu1 }
 0xfae   :  { %v5212_v42 = vadd.f32 %v5506_v6, %v5211_v31 }
 0xfaf   :  { %v5844_v33 = vpop.f32.mrf.mxu1 }
 0xfb0   :  { %v5218_v23 = vmax.f32 %v5212_v42, 0.0 }
 0xfb1   :  { %v5214_v46 = vpop.f32.mrf.mxu1 }
 0xfb2   :  { %v5215_v39 = vadd.f32 %v5506_v6, %v5214_v46 }
 0xfb3   :  { %v5845_v4 = vpop.f32.mrf.mxu1 }
 0xfb4   :  { %v5219_v57 = vmax.f32 %v5215_v39, 0.0 }
 0xfb6   :  { %v5220_v61 = vpack.c.bf16 %v5219_v57, %v5218_v23 }
 0xfb8   :  { %5855 = vmatmul.mubr.msk.bf16.vlgmr.msra.gmra.mxu0 %vm5260_vm8, %v5220_v61 }
0x1078   :  { %v5298_v14 = vpop.f32.mrf.mxu0 }
0x1079   :  { %v5299_v40 = vadd.f32 %v5510_v0, %v5298_v14 }
0x107a   :  { %v5856_v5 = vpop.f32.mrf.mxu0 }
0x107b   :  { %v5305_v56 = vadd.f32 %v5299_v40, %v5148_v35 }
0x107c   :  { %v5301_v24 = vpop.f32.mrf.mxu0 }
0x107d   :  { %v5302_v1 = vadd.f32 %v5510_v0, %v5301_v24  ;;  %v5309_v30 = vsel %vm280_vm1, %v5305_v56, 0.0 }
0x107e   :  { %5310 = vadd.xlane.f32.xlu0 %v5309_v30  ;;  %v5857_v36 = vpop.f32.mrf.mxu0 }
0x107f   :  { %v5306_v27 = vadd.f32 %v5302_v1, %v5149_v7 }
0x1081   :  { %v5312_v28 = vsel %vm280_vm1, %v5306_v27, 0.0 }
0x1082   :  { %5313 = vadd.xlane.f32.xlu1 %v5312_v28 }
0x1107   :  { %v5311_v26 = vpop.xlane.xlu0 %5310 }
0x1108   :  { %v5315_v10 = vmul.f32 0.03125, %v5311_v26 }
0x110a   :  { %v5317_v45 = vsub.f32 %v5305_v56, %v5315_v10 }
0x110b   :  { %v5314_v13 = vpop.xlane.xlu1 %5313 }
0x110c   :  { %v5316_v22 = vmul.f32 0.03125, %v5314_v13  ;;  %v5319_v8 = vmul.f32 %v5317_v45, %v5317_v45 }
0x110e   :  { %v5318_v62 = vsub.f32 %v5306_v27, %v5316_v22  ;;  %v5321_v44 = vsel %vm280_vm1, %v5319_v8, 0.0 }
0x110f   :  { %5322 = vadd.xlane.f32.xlu0 %v5321_v44 }
0x1110   :  { %v5320_v3 = vmul.f32 %v5318_v62, %v5318_v62 }
0x1112   :  { %v5324_v15 = vsel %vm280_vm1, %v5320_v3, 0.0 }
0x1113   :  { %5325 = vadd.xlane.f32.xlu1 %v5324_v15 }
0x1114   :  { %6224 = shalt.err (!%p6221_p12)
}
0x1115   :  { %s6314_s2 = smov 128   ;;  %s6315_s7 = smov [#allocation22]  }
0x1116   :  { %5378 = dma.vmem_to_hbm [thread:$0]  %s5373_s21, 1024, %s7605_s26, [#allocation21], %s6314_s2, %s6314_s2, %s6310_s17  }
0x1117   :  { %s5384_s14 = sshll.u32 %s6315_s7, 4  ;;  %s5385_s14 = int_to_ptr.vmem [resolvable:$true] %s5384_s14 }
0x1118   :  { %s6233_s13 = scalar_lea.vmem %s5385_s14, 1024  ;;  %p6238_p0 = scmp.lt.s32.totalorder %s5385_s14, %s5385_s14 }
0x1119   :  { %p6234_p13 = scmp.ne.s32.totalorder %s5385_s14, %s6233_s13  ;;  %p6239_p1 = scmp.lt.s32.totalorder %s6233_s13, %s6233_s13 }
0x111b   :  { %p6240_p2 = por %p6239_p1, %p6238_p0 }
0x111d   :  { %p6241_p3 = pnand %p6240_p2, %p6234_p13 }
0x111f   :  { %6244 = shalt.err (!%p6241_p3)
}
0x1120   :  { %5390 = dma.vmem_to_hbm [thread:$0]  %s5385_s14, 1024, %s7606_s27, [#allocation21], %s6314_s2, %s6314_s2, %s6310_s17  }
0x1121   :  { %v5516_v51 = vld [vmem:[%s7602_s23] ss:$0 sm:$0xff]  ;;  %s6316_s27 = smov [#allocation19]  }
0x1122   :  { %v5517_v11 = vld [vmem:[%s7603_s24] ss:$0 sm:$0xff]  ;;  %s5360_s9 = sshll.u32 %s6316_s27, 4  ;;  %s5361_s9 = int_to_ptr.vmem [resolvable:$true] %s5360_s9 }
0x1123   :  { %s6253_s23 = scalar_lea.vmem %s5361_s9, 256  ;;  %p6258_p5 = scmp.lt.s32.totalorder %s5361_s9, %s5361_s9 }
0x1124   :  { %p6254_p4 = scmp.ne.s32.totalorder %s5361_s9, %s6253_s23  ;;  %p6259_p6 = scmp.lt.s32.totalorder %s6253_s23, %s6253_s23 }
0x1126   :  { %p6260_p7 = por %p6259_p6, %p6258_p5 }
0x1128   :  { %p6261_p8 = pnand %p6260_p7, %p6254_p4 }
0x1198   :  { %v5323_v60 = vpop.xlane.xlu0 %5322 }
0x1199   :  { %v5327_v41 = vmul.f32 0.03125, %v5323_v60 }
0x119b   :  { %v5329_v49 = vadd.f32 1e-05, %v5327_v41 }
0x119c   :  { %v5326_v52 = vpop.xlane.xlu1 %5325 }
0x119d   :  { %6008 = vrsqrt.f32 %v5329_v49  ;;  %v5328_v37 = vmul.f32 0.03125, %v5326_v52 }
0x119f   :  { %v5330_v19 = vadd.f32 1e-05, %v5328_v37 }
0x11a1   :  { %6010 = vrsqrt.f32 %v5330_v19 }
0x11aa   :  { %v6009_v53 = vpop.eup %6008 }
0x11ab   :  { %v5333_v63 = vmul.f32 %v6009_v53, %v5317_v45 }
0x11ad   :  { %v5341_v58 = vmul.f32 %v5516_v51, %v5333_v63 }
0x11ae   :  { %v6011_v9 = vpop.eup %6010 }
0x11af   :  { %v5334_v29 = vmul.f32 %v6011_v9, %v5318_v62  ;;  %v5349_v48 = vadd.f32 %v5517_v11, %v5341_v58 }
0x11b1   :  { %v5342_v54 = vmul.f32 %v5516_v51, %v5334_v29  ;;  %v5351_v21 = vmul.f32 %v5349_v48, %v7008_v38 }
0x11b3   :  { %v5350_v59 = vadd.f32 %v5517_v11, %v5342_v54  ;;  %5353 = vst.msk [vmem:[#allocation19] sm:$0xff] %vm280_vm1, %v5351_v21 }
0x11b5   :  { %v5352_v16 = vmul.f32 %v5350_v59, %v7010_v50 }
0x11b7   :  { %5354 = vst.msk [vmem:[#allocation19 + $0x8] sm:$0xff] %vm280_vm1, %v5352_v16 }
0x11b8   :  { %6264 = shalt.err (!%p6261_p8)
}
0x11b9   :  { %5366 = dma.vmem_to_hbm [thread:$0]  %s5361_s9, 256, %s7604_s25, [#allocation4], %s6314_s2, %s6314_s2, %s6310_s17  }
0x11ba   :  { %6285 = dma.done.wait [#allocation4], 256  }
0x11bb   :  { %6286 = vsyncadd [#allocation4], 4294967040 }
0x11bc   :  { %6287 = dma.done.wait [#allocation21], 2048  }
0x11bd   :  { %6288 = vsyncadd [#allocation21], 4294965248 }
0x11be   :  { %5400 = vsyncpa [#allocation3], 1 }
0x11bf   :  { %5401 = vsyncpa [#allocation6], 1 }
0x11c0   :  { %5402 = vsyncpa [#allocation9], 1 }
0x11c1   :  { %5403 = vsyncpa [#allocation12], 1 }
0x11c2   :  { %5404 = vsyncpa [#allocation15], 1 }
0x11c3   :  { %5405 = vsyncpa [#allocation18], 1 }
0x11c4   :  { %5406 = vsyncpa [#allocation4], 1 }
0x11c5   :  { %5407 = vsyncpa [#allocation21], 1 }

</bundles_post_ra>
